<compile_context>
chip_gen: v7x
topology: tpu7x:2x2x1
jax: 0.10.0
libtpu: 0.0.40
codegen_flags: <defaults>
</compile_context>

<pallas_src>
import math

import jax
import jax.numpy as jnp
from jax.experimental import pallas as pl
from jax.experimental.pallas import tpu as pltpu


def _ceil8(c):
    return ((c + 7) // 8) * 8


# ---------------------------------------------------------------------------
# host-side random parameter generation (stand-in for trained torch weights)
# ---------------------------------------------------------------------------
class ParamGen:
    def __init__(self, seed=0):
        self._key = jax.random.PRNGKey(seed)

    def _next(self):
        self._key, sub = jax.random.split(self._key)
        return sub

    def conv(self, kh, kw, cin, cout, bias=True):
        fan_in = kh * kw * cin
        bound = 1.0 / math.sqrt(fan_in)
        w = jax.random.uniform(self._next(), (kh, kw, cin, cout),
                               jnp.float32, -bound, bound)
        b = (jax.random.uniform(self._next(), (cout,), jnp.float32, -bound, bound)
             if bias else jnp.zeros((cout,), jnp.float32))
        return {"w": w, "b": b}

    def bn(self, c, eps=1e-5):
        gamma = 1.0 + 0.1 * jax.random.normal(self._next(), (c,), jnp.float32)
        beta = 0.1 * jax.random.normal(self._next(), (c,), jnp.float32)
        mean = 0.1 * jax.random.normal(self._next(), (c,), jnp.float32)
        var = 1.0 + 0.2 * jax.random.uniform(self._next(), (c,), jnp.float32)
        scale = gamma / jnp.sqrt(var + eps)
        shift = beta - mean * scale
        return {"scale": scale, "shift": shift}


# ---------------------------------------------------------------------------
# host-side packing: one weight slab, one shift/scale slab, one mask slab
# ---------------------------------------------------------------------------
class _SlabPacker:
    """All per-(layer, tap, source) weight blocks go into one (R, Cmax) slab;
    all folded shift / BN-scale vectors go into one (S, 1) slab.  Layers
    address them with static row offsets -> a single DMA per slab instead of
    ~50 tiny operands."""

    def __init__(self):
        self._w, self._w_off = [], 0
        self._v, self._v_off = [], 0

    def add_w(self, block):                       # (cout_p, cin_p), both %8==0
        off = self._w_off
        self._w.append(jnp.asarray(block, jnp.float32))
        self._w_off += block.shape[0]
        return off

    def add_vec(self, vec):                       # (cout_p,)
        off = self._v_off
        self._v.append(jnp.asarray(vec, jnp.float32))
        self._v_off += vec.shape[0]
        return off

    def finalize(self):
        cmax = max(b.shape[1] for b in self._w)
        w = jnp.concatenate(
            [jnp.pad(b, ((0, 0), (0, cmax - b.shape[1]))) for b in self._w], 0)
        v = jnp.concatenate(self._v, axis=0)[:, None]
        return w, v


class _MaskPacker:
    """Deduplicated boundary / stride-congruence masks, one (1, H*W) row each,
    packed as a (n_masks, 1, H*W) slab so the kernel can index a mask with a
    plain leading-dim integer (always tile-aligned)."""

    def __init__(self, H, W):
        self.H, self.W = H, W
        self.hg = jnp.repeat(jnp.arange(H, dtype=jnp.int32), W)   # row of flat px
        self.wg = jnp.tile(jnp.arange(W, dtype=jnp.int32), H)     # col of flat px
        self.rows, self.index = [], {}

    def _add(self, key, m):
        if key not in self.index:
            self.index[key] = len(self.rows)
            self.rows.append(m.astype(jnp.float32))
        return self.index[key]

    def boundary(self, dy, dx):
        H, W = self.H, self.W
        m = ((self.hg + dy >= 0) & (self.hg + dy < H) &
             (self.wg + dx >= 0) & (self.wg + dx < W))
        return self._add(("b", dy, dx), m)

    def congruence(self, S, oh, ow):
        m = ((self.hg % S) == oh) & ((self.wg % S) == ow)
        return self._add(("c", S, oh, ow), m)

    def finalize(self):
        rows = self.rows if self.rows else [jnp.zeros((self.H * self.W,),
                                                      jnp.float32)]
        return jnp.stack(rows, axis=0)[:, None, :]


def _fold(w, b, bn):
    """Fold conv bias + BatchNorm into weights (scale) and a single shift."""
    cout = w.shape[-1]
    if bn is None:
        scale = jnp.ones((cout,), jnp.float32)
        base = jnp.zeros((cout,), jnp.float32)
    else:
        scale, base = bn["scale"], bn["shift"]
    wf = w * scale[None, None, None, :]
    shift = scale * b + base
    return wf, shift


def _pack_gconv(pk, mk, w, b, bn, src_cins, stride, centered, masked):
    """Pack a KxK conv as per-tap, per-source (cout_p, cin_p) blocks plus
    roll / boundary-mask metadata.  centered=True -> 'same' conv (offsets
    kh - k//2); centered=False -> kernel==stride down-conv (offsets kh >= 0,
    valid only on the coarser aligned sub-grid, no masks needed)."""
    wf, shift = _fold(w, b, bn)
    KH, KW, _, Cout = w.shape
    cout_p = _ceil8(Cout)
    splits, c0 = [], 0
    for cin in src_cins:
        splits.append((c0, cin, _ceil8(cin)))
        c0 += cin
    pad = KH // 2 if centered else 0
    taps = []
    for kh in range(KH):
        for kw in range(KW):
            dy, dx = (kh - pad) * stride, (kw - pad) * stride
            w_offs = []
            for (o, cin, cin_p) in splits:
                blk = jnp.zeros((cout_p, cin_p), jnp.float32)
                blk = blk.at[:Cout, :cin].set(wf[kh, kw, o:o + cin, :].T)
                w_offs.append(pk.add_w(blk))
            mrow = mk.boundary(dy, dx) if (masked and (dy, dx) != (0, 0)) else None
            taps.append({"roll": dy * mk.W + dx, "mask": mrow, "w": w_offs})
    sh = jnp.zeros((cout_p,), jnp.float32).at[:Cout].set(shift)
    return {"taps": taps, "shift": pk.add_vec(sh), "cout_p": cout_p,
            "cin_ps": [s[2] for s in splits]}


def _pack_up(pk, mk, w, b, bn, cin_p, out_stride):
    """ConvTranspose2d(kernel == stride == ds): per-tap (cout_p, cin_p) block,
    a forward roll to the target fine positions and a congruence mask.
    NOTE: weights here are generated as (kH, kW, Cin, Cout); PyTorch stores
    ConvTranspose2d weights as (Cin, Cout, kH, kW) -- transpose if ever loading
    trained checkpoints."""
    wf, shift = _fold(w, b, bn)
    KH, KW, Cin, Cout = w.shape
    cout_p = _ceil8(Cout)
    S = out_stride * KH
    taps = []
    for kh in range(KH):
        for kw in range(KW):
            blk = jnp.zeros((cout_p, cin_p), jnp.float32)
            blk = blk.at[:Cout, :Cin].set(wf[kh, kw].T)
            taps.append({"w": pk.add_w(blk),
                         "roll": (kh * mk.W + kw) * out_stride,
                         "mask": mk.congruence(S, kh * out_stride,
                                               kw * out_stride)})
    sh = jnp.zeros((cout_p,), jnp.float32).at[:Cout].set(shift)
    return {"taps": taps, "shift": pk.add_vec(sh),
            "cout_p": cout_p, "cin_p": cin_p}


def _plan_unet(pg, pk, mk, nPlanes, reps, fs, ds, bias, stride):
    n = nPlanes[0]
    plan = {"pre": [], "post": []}
    cin = n
    for _ in range(reps):
        cw = pg.conv(fs, fs, cin, n, bias)
        plan["pre"].append(_pack_gconv(pk, mk, cw["w"], cw["b"], pg.bn(n),
                                       [cin], stride, True, True))
        cin = n
    if len(nPlanes) > 1:
        n2 = nPlanes[1]
        dw = pg.conv(ds, ds, n, n2, bias)
        plan["down"] = _pack_gconv(pk, mk, dw["w"], dw["b"], pg.bn(n2),
                                   [n], stride, False, False)
        plan["inner"] = _plan_unet(pg, pk, mk, nPlanes[1:], reps, fs, ds, bias,
                                   stride * ds)
        uw = pg.conv(ds, ds, n2, n, bias)
        plan["up"] = _pack_up(pk, mk, uw["w"], uw["b"], pg.bn(n),
                              _ceil8(n2), stride)
        srcs = [n, n]                      # decoder input = [skip | upsampled]
        for _ in range(reps):
            cw = pg.conv(fs, fs, sum(srcs), n, bias)
            plan["post"].append(_pack_gconv(pk, mk, cw["w"], cw["b"], pg.bn(n),
                                            srcs, stride, True, True))
            srcs = [n]
    return plan


def build_sunet(seed, *, geometry, nIn, filter_size, bias, downsample, reps,
                nPlanes, n_anchors, head_kernel_size, H, W,
                compute_dtype=jnp.bfloat16):
    noR = {"circles": 3, "rectangles": 4, "cylinders": 5, "cuboids": 6}[geometry]
    noC = 1
    A = n_anchors
    m = nPlanes[0]
    nOut = (noC + noR) * A                       # FlattenNet width
    head_out = (noR + noC) * A                   # fused reg + obj head width
    ds, st = downsample
    assert ds == st, "only kernel==stride down/up-sampling is supported"
    depth = len(nPlanes)
    assert H % (ds ** (depth - 1)) == 0 and W % (ds ** (depth - 1)) == 0

    pg = ParamGen(seed)
    pk = _SlabPacker()
    mk = _MaskPacker(H, W)

    plan = {}
    sw = pg.conv(filter_size, filter_size, nIn, m, bias)
    plan["stem"] = _pack_gconv(pk, mk, sw["w"], sw["b"], None,
                               [nIn], 1, True, True)
    plan["unet"] = _plan_unet(pg, pk, mk, nPlanes, reps, filter_size, ds,
                              bias, 1)
    bn = pg.bn(m)
    m_p = _ceil8(m)
    sc = jnp.ones((m_p,), jnp.float32).at[:m].set(bn["scale"])
    sh = jnp.zeros((m_p,), jnp.float32).at[:m].set(bn["shift"])
    plan["model_bn"] = {"scale": pk.add_vec(sc), "shift": pk.add_vec(sh),
                        "c_p": m_p}
    fw = pg.conv(1, 1, m, nOut, bias)
    plan["flat"] = _pack_gconv(pk, mk, fw["w"], fw["b"], pg.bn(nOut),
                               [m], 1, True, True)
    # Fused regression + objectness head.  Output channel c = a*noR + r
    # (anchor-major), matching the reference's permute(0,2,3,1) + reshape.
    # TODO(synk): only n_regression_layers == 1 is implemented.
    hks = head_kernel_size
    rw = pg.conv(hks, hks, nOut, noR * A, True)
    ow = pg.conv(hks, hks, nOut, noC * A, True)
    hw = jnp.concatenate([rw["w"], ow["w"]], axis=3)
    hb = jnp.concatenate([rw["b"], ow["b"]], axis=0)
    plan["head"] = _pack_gconv(pk, mk, hw, hb, None, [nOut], 1, True, True)

    w_slab, s_slab = pk.finalize()
    m_slab = mk.finalize()
    meta = dict(H=H, W=W, nIn=nIn, nIn_p=_ceil8(nIn), noR=noR, noC=noC, A=A,
                head_p=_ceil8(head_out), compute_dtype=compute_dtype)
    return plan, w_slab, s_slab, m_slab, meta


# ---------------------------------------------------------------------------
# the fused kernel (one image per grid step, everything VMEM resident)
# ---------------------------------------------------------------------------
def _build_kernel(plan, meta, leakiness):
    N = meta["H"] * meta["W"]
    cdt = meta["compute_dtype"]
    lk = float(leakiness)

    def kernel(x_ref, w_ref, s_ref, m_ref, o_ref):
        mcache = {}

        def mask(j):                       # (1, N) boundary / congruence mask
            if j not in mcache:
                mcache[j] = m_ref[j]
            return mcache[j]

        def act(y):
            if lk == 0.0:
                return jnp.maximum(y, 0.0)
            return jnp.where(y >= 0.0, y, lk * y)

        def vec(off, cp):                  # (cp, 1) folded shift / BN scale
            return s_ref[off:off + cp, :]

        def mdot(w_off, cout_p, cin_p, x):
            wb = w_ref[w_off:w_off + cout_p, 0:cin_p]
            return jnp.dot(wb.astype(cdt), x.astype(cdt),
                           preferred_element_type=jnp.float32)

        def gconv(xs, d, do_act):
            """Generic conv: per-tap roll + mask of each source, then a small
            MXU matmul, accumulated in f32 (no im2col concat)."""
            cout_p = d["cout_p"]
            acc = None
            for tap in d["taps"]:
                for si, xsrc in enumerate(xs):
                    if tap["roll"] != 0:
                        xsrc = pltpu.roll(xsrc, shift=(-tap["roll"]) % N, axis=1)
                    if tap["mask"] is not None:
                        xsrc = xsrc * mask(tap["mask"])
                    y = mdot(tap["w"][si], cout_p, d["cin_ps"][si], xsrc)
                    acc = y if acc is None else acc + y
            acc = acc + vec(d["shift"], cout_p)
            return act(acc) if do_act else acc

        def up(x, d):
            """ConvTranspose (kernel==stride): per-tap matmul, roll to the
            target fine positions, congruence-mask, sum."""
            cout_p, cin_p = d["cout_p"], d["cin_p"]
            acc = None
            for tap in d["taps"]:
                y = mdot(tap["w"], cout_p, cin_p, x)
                if tap["roll"] != 0:
                    y = pltpu.roll(y, shift=tap["roll"] % N, axis=1)
                y = y * mask(tap["mask"])
                acc = y if acc is None else acc + y
            return act(acc + vec(d["shift"], cout_p))

        def unet(x, p):
            for d in p["pre"]:
                x = gconv([x], d, True)
            if "down" in p:
                skip = x
                z = gconv([x], p["down"], True)
                z = unet(z, p["inner"])
                u = up(z, p["up"])
                srcs = [skip, u]           # decoder concat -> two matmuls/tap
                for d in p["post"]:
                    x = gconv(srcs, d, True)
                    srcs = [x]
            return x

        x = x_ref[...]                               # (nIn_p, H*W), one image
        y = gconv([x], plan["stem"], False)          # stem conv: bias, no act
        y = unet(y, plan["unet"])
        bn = plan["model_bn"]
        y = act(y * vec(bn["scale"], bn["c_p"]) + vec(bn["shift"], bn["c_p"]))
        y = gconv([y], plan["flat"], True)           # FlattenNet 1x1 conv+BN+act
        # nn.Dropout(p=0.5) is identity at inference.
        o_ref[...] = gconv([y], plan["head"], False)

    return kernel


# ---------------------------------------------------------------------------
# forward pass (single fused pallas_call, grid over batch) + output glue
# ---------------------------------------------------------------------------
def sunet2d_forward(x_org, bundle, *, input_size, leakiness=0.0):
    plan, w_slab, s_slab, m_slab, meta = bundle
    coords, feats = x_org            # coords carried but unused (matches ref)
    B, nIn, H, W = feats.shape       # NCHW like the PyTorch reference
    assert (H, W, nIn) == (meta["H"], meta["W"], meta["nIn"])
    N = H * W
    nIn_p, head_p = meta["nIn_p"], meta["head_p"]
    A, noR, noC = meta["A"], meta["noR"], meta["noC"]

    # channel-major, per-image lane-dense layout (B, Cin_p, H*W)
    xin = feats.astype(jnp.float32).reshape(B, nIn, N)
    if nIn_p > nIn:
        xin = jnp.pad(xin, ((0, 0), (0, nIn_p - nIn), (0, 0)))

    kernel = _build_kernel(plan, meta, leakiness)
    head = pl.pallas_call(
        kernel,
        out_shape=jax.ShapeDtypeStruct((B, head_p, N), jnp.float32),
        grid=(B,),
        in_specs=[
            pl.BlockSpec((None, nIn_p, N), lambda b: (b, 0, 0)),
            pl.BlockSpec(w_slab.shape, lambda b: (0, 0)),
            pl.BlockSpec(s_slab.shape, lambda b: (0, 0)),
            pl.BlockSpec(m_slab.shape, lambda b: (0, 0, 0)),
        ],
        out_specs=pl.BlockSpec((None, head_p, N), lambda b: (b, 0, 0)),
        compiler_params=pltpu.CompilerParams(
            dimension_semantics=("parallel",)),
    )(xin, w_slab, s_slab, m_slab)

    # split the fused head output and match the reference permute / reshape
    nR, nC_ = noR * A, noC * A
    reg = head[:, :nR, :]                            # channel c = a*noR + r
    obj = head[:, nR:nR + nC_, :]
    y_reg = reg.reshape(B, A, noR, N).transpose(0, 3, 1, 2).reshape(B, N * A, noR)
    y_obj = obj.reshape(B, A, noC, N).transpose(0, 3, 1, 2).reshape(B, N * A, noC)

    gx = jnp.broadcast_to(
        jnp.arange(H, dtype=jnp.float32)[:, None] * (input_size[0] / H), (H, W))
    gy = jnp.broadcast_to(
        jnp.arange(W, dtype=jnp.float32)[None, :] * (input_size[1] / W), (H, W))
    locations = jnp.stack((gx, gy), axis=2).reshape(-1, 2)
    locations = jnp.repeat(locations, A, axis=0)
    return locations, y_reg, y_obj


# ---------------------------------------------------------------------------
# driver
# ---------------------------------------------------------------------------
if __name__ == "__main__":
    B, nIn, Hs, Ws = 2, 4, 16, 16
    geometry = "circles"            # -> noR = 3, noC = 1
    n_anchors = 2
    cfg = dict(geometry=geometry, nIn=nIn, input_size=[Hs, Ws], filter_size=3,
               bias=True, residual_blocks=False, downsample=[2, 2], reps=1,
               nPlanes=[8, 16], n_anchors=n_anchors, head_kernel_size=1,
               n_regression_layers=1, leakiness=0.0)
    # TODO(synk): downsample_flatten_fsize / downsample_flatten_stride are
    # constructor args of the reference module but unused in its forward.

    bundle = build_sunet(
        0, geometry=geometry, nIn=nIn, filter_size=cfg["filter_size"],
        bias=cfg["bias"], downsample=cfg["downsample"], reps=cfg["reps"],
        nPlanes=cfg["nPlanes"], n_anchors=n_anchors,
        head_kernel_size=cfg["head_kernel_size"], H=Hs, W=Ws)

    key = jax.random.PRNGKey(0)
    kc, kf = jax.random.split(key)
    coords = jax.random.randint(kc, (B, Hs * Ws, 3), 0, Hs).astype(jnp.int32)
    feats = jax.random.normal(kf, (B, nIn, Hs, Ws), jnp.float32)   # NCHW

    fwd = jax.jit(lambda c, f: sunet2d_forward(
        (c, f), bundle, input_size=cfg["input_size"],
        leakiness=cfg["leakiness"]))
    locations, y_reg, y_obj = fwd(coords, feats)
    (locations, y_reg, y_obj) = jax.block_until_ready((locations, y_reg, y_obj))

    noR, noC = bundle[4]["noR"], bundle[4]["noC"]
    assert locations.shape == (Hs * Ws * n_anchors, 2)
    assert y_reg.shape == (B, Hs * Ws * n_anchors, noR)
    assert y_obj.shape == (B, Hs * Ws * n_anchors, noC)
    assert bool(jnp.all(jnp.isfinite(y_reg))) and bool(jnp.all(jnp.isfinite(y_obj)))
    print("KERNEL_OK")
</pallas_src>

<mosaic_0001>
module attributes {stable_mosaic.version = 11 : i64} {
  func.func @kernel(%arg0: i32, %arg1: memref<1x8x256xf32, #tpu.memory_space<vmem>>, %arg2: memref<544x16xf32, #tpu.memory_space<vmem>>, %arg3: memref<96x1xf32, #tpu.memory_space<vmem>>, %arg4: memref<20x1x256xf32, #tpu.memory_space<vmem>>, %arg5: memref<1x8x256xf32, #tpu.memory_space<vmem>>) attributes {dimension_semantics = [#tpu.dimension_semantics<parallel>], iteration_bounds = array<i64: 2>, scalar_prefetch = 0 : i64, scratch_operands = 0 : i64, tpu.core_type = #tpu.core_type<tc>, window_params = [{transform_indices = @transform_0, window_bounds = array<i64: 1, 8, 256>}, {pipeline_mode = #tpu.pipeline_mode<synchronous>, transform_indices = @transform_1, window_bounds = array<i64: 544, 16>}, {pipeline_mode = #tpu.pipeline_mode<synchronous>, transform_indices = @transform_2, window_bounds = array<i64: 96, 1>}, {pipeline_mode = #tpu.pipeline_mode<synchronous>, transform_indices = @transform_3, window_bounds = array<i64: 20, 1, 256>}, {transform_indices = @transform_4, window_bounds = array<i64: 1, 8, 256>}]} {
    %c0 = arith.constant 0 : index
    %c0_0 = arith.constant 0 : index
    %c0_1 = arith.constant 0 : index
    %0 = vector.load %arg1[%c0, %c0_0, %c0_1] : memref<1x8x256xf32, #tpu.memory_space<vmem>>, vector<1x8x256xf32>
    %1 = vector.shape_cast %0 : vector<1x8x256xf32> to vector<8x256xf32>
    %c17_i32 = arith.constant 17 : i32
    %2 = tpu.dynamic_rotate %1 by %c17_i32 dim 1 : vector<8x256xf32>, i32 -> vector<8x256xf32>
    %c0_2 = arith.constant 0 : index
    %c0_3 = arith.constant 0 : index
    %c0_4 = arith.constant 0 : index
    %3 = vector.load %arg4[%c0_2, %c0_3, %c0_4] : memref<20x1x256xf32, #tpu.memory_space<vmem>>, vector<1x1x256xf32>
    %4 = vector.shape_cast %3 : vector<1x1x256xf32> to vector<1x256xf32>
    %5 = vector.broadcast %4 : vector<1x256xf32> to vector<8x256xf32>
    %6 = arith.mulf %2, %5 : vector<8x256xf32>
    %c0_5 = arith.constant 0 : index
    %c0_6 = arith.constant 0 : index
    %7 = vector.load %arg2[%c0_5, %c0_6] : memref<544x16xf32, #tpu.memory_space<vmem>>, vector<8x8xf32>
    %8 = arith.truncf %7 : vector<8x8xf32> to vector<8x8xbf16>
    %9 = arith.truncf %6 : vector<8x256xf32> to vector<8x256xbf16>
    %cst = arith.constant dense<0.000000e+00> : vector<8x256xf32>
    %10 = tpu.matmul %8, %9, %cst {dimension_numbers = #tpu.dot_dimension_numbers<[1], [0], [0], [1], [0, 0, 1, 1], [], []>} : vector<8x8xbf16>, vector<8x256xbf16>, vector<8x256xf32> -> vector<8x256xf32>
    %c16_i32 = arith.constant 16 : i32
    %11 = tpu.dynamic_rotate %1 by %c16_i32 dim 1 : vector<8x256xf32>, i32 -> vector<8x256xf32>
    %c1 = arith.constant 1 : index
    %c0_7 = arith.constant 0 : index
    %c0_8 = arith.constant 0 : index
    %12 = vector.load %arg4[%c1, %c0_7, %c0_8] : memref<20x1x256xf32, #tpu.memory_space<vmem>>, vector<1x1x256xf32>
    %13 = vector.shape_cast %12 : vector<1x1x256xf32> to vector<1x256xf32>
    %14 = vector.broadcast %13 : vector<1x256xf32> to vector<8x256xf32>
    %15 = arith.mulf %11, %14 : vector<8x256xf32>
    %c8 = arith.constant 8 : index
    %c0_9 = arith.constant 0 : index
    %16 = vector.load %arg2[%c8, %c0_9] : memref<544x16xf32, #tpu.memory_space<vmem>>, vector<8x8xf32>
    %17 = arith.truncf %16 : vector<8x8xf32> to vector<8x8xbf16>
    %18 = arith.truncf %15 : vector<8x256xf32> to vector<8x256xbf16>
    %cst_10 = arith.constant dense<0.000000e+00> : vector<8x256xf32>
    %19 = tpu.matmul %17, %18, %cst_10 {dimension_numbers = #tpu.dot_dimension_numbers<[1], [0], [0], [1], [0, 0, 1, 1], [], []>} : vector<8x8xbf16>, vector<8x256xbf16>, vector<8x256xf32> -> vector<8x256xf32>
    %20 = arith.addf %10, %19 : vector<8x256xf32>
    %c15_i32 = arith.constant 15 : i32
    %21 = tpu.dynamic_rotate %1 by %c15_i32 dim 1 : vector<8x256xf32>, i32 -> vector<8x256xf32>
    %c2 = arith.constant 2 : index
    %c0_11 = arith.constant 0 : index
    %c0_12 = arith.constant 0 : index
    %22 = vector.load %arg4[%c2, %c0_11, %c0_12] : memref<20x1x256xf32, #tpu.memory_space<vmem>>, vector<1x1x256xf32>
    %23 = vector.shape_cast %22 : vector<1x1x256xf32> to vector<1x256xf32>
    %24 = vector.broadcast %23 : vector<1x256xf32> to vector<8x256xf32>
    %25 = arith.mulf %21, %24 : vector<8x256xf32>
    %c16 = arith.constant 16 : index
    %c0_13 = arith.constant 0 : index
    %26 = vector.load %arg2[%c16, %c0_13] : memref<544x16xf32, #tpu.memory_space<vmem>>, vector<8x8xf32>
    %27 = arith.truncf %26 : vector<8x8xf32> to vector<8x8xbf16>
    %28 = arith.truncf %25 : vector<8x256xf32> to vector<8x256xbf16>
    %cst_14 = arith.constant dense<0.000000e+00> : vector<8x256xf32>
    %29 = tpu.matmul %27, %28, %cst_14 {dimension_numbers = #tpu.dot_dimension_numbers<[1], [0], [0], [1], [0, 0, 1, 1], [], []>} : vector<8x8xbf16>, vector<8x256xbf16>, vector<8x256xf32> -> vector<8x256xf32>
    %30 = arith.addf %20, %29 : vector<8x256xf32>
    %c1_i32 = arith.constant 1 : i32
    %31 = tpu.dynamic_rotate %1 by %c1_i32 dim 1 : vector<8x256xf32>, i32 -> vector<8x256xf32>
    %c3 = arith.constant 3 : index
    %c0_15 = arith.constant 0 : index
    %c0_16 = arith.constant 0 : index
    %32 = vector.load %arg4[%c3, %c0_15, %c0_16] : memref<20x1x256xf32, #tpu.memory_space<vmem>>, vector<1x1x256xf32>
    %33 = vector.shape_cast %32 : vector<1x1x256xf32> to vector<1x256xf32>
    %34 = vector.broadcast %33 : vector<1x256xf32> to vector<8x256xf32>
    %35 = arith.mulf %31, %34 : vector<8x256xf32>
    %c24 = arith.constant 24 : index
    %c0_17 = arith.constant 0 : index
    %36 = vector.load %arg2[%c24, %c0_17] : memref<544x16xf32, #tpu.memory_space<vmem>>, vector<8x8xf32>
    %37 = arith.truncf %36 : vector<8x8xf32> to vector<8x8xbf16>
    %38 = arith.truncf %35 : vector<8x256xf32> to vector<8x256xbf16>
    %cst_18 = arith.constant dense<0.000000e+00> : vector<8x256xf32>
    %39 = tpu.matmul %37, %38, %cst_18 {dimension_numbers = #tpu.dot_dimension_numbers<[1], [0], [0], [1], [0, 0, 1, 1], [], []>} : vector<8x8xbf16>, vector<8x256xbf16>, vector<8x256xf32> -> vector<8x256xf32>
    %40 = arith.addf %30, %39 : vector<8x256xf32>
    %c32 = arith.constant 32 : index
    %c0_19 = arith.constant 0 : index
    %41 = vector.load %arg2[%c32, %c0_19] : memref<544x16xf32, #tpu.memory_space<vmem>>, vector<8x8xf32>
    %42 = arith.truncf %41 : vector<8x8xf32> to vector<8x8xbf16>
    %43 = arith.truncf %1 : vector<8x256xf32> to vector<8x256xbf16>
    %cst_20 = arith.constant dense<0.000000e+00> : vector<8x256xf32>
    %44 = tpu.matmul %42, %43, %cst_20 {dimension_numbers = #tpu.dot_dimension_numbers<[1], [0], [0], [1], [0, 0, 1, 1], [], []>} : vector<8x8xbf16>, vector<8x256xbf16>, vector<8x256xf32> -> vector<8x256xf32>
    %45 = arith.addf %40, %44 : vector<8x256xf32>
    %c255_i32 = arith.constant 255 : i32
    %46 = tpu.dynamic_rotate %1 by %c255_i32 dim 1 : vector<8x256xf32>, i32 -> vector<8x256xf32>
    %c4 = arith.constant 4 : index
    %c0_21 = arith.constant 0 : index
    %c0_22 = arith.constant 0 : index
    %47 = vector.load %arg4[%c4, %c0_21, %c0_22] : memref<20x1x256xf32, #tpu.memory_space<vmem>>, vector<1x1x256xf32>
    %48 = vector.shape_cast %47 : vector<1x1x256xf32> to vector<1x256xf32>
    %49 = vector.broadcast %48 : vector<1x256xf32> to vector<8x256xf32>
    %50 = arith.mulf %46, %49 : vector<8x256xf32>
    %c40 = arith.constant 40 : index
    %c0_23 = arith.constant 0 : index
    %51 = vector.load %arg2[%c40, %c0_23] : memref<544x16xf32, #tpu.memory_space<vmem>>, vector<8x8xf32>
    %52 = arith.truncf %51 : vector<8x8xf32> to vector<8x8xbf16>
    %53 = arith.truncf %50 : vector<8x256xf32> to vector<8x256xbf16>
    %cst_24 = arith.constant dense<0.000000e+00> : vector<8x256xf32>
    %54 = tpu.matmul %52, %53, %cst_24 {dimension_numbers = #tpu.dot_dimension_numbers<[1], [0], [0], [1], [0, 0, 1, 1], [], []>} : vector<8x8xbf16>, vector<8x256xbf16>, vector<8x256xf32> -> vector<8x256xf32>
    %55 = arith.addf %45, %54 : vector<8x256xf32>
    %c241_i32 = arith.constant 241 : i32
    %56 = tpu.dynamic_rotate %1 by %c241_i32 dim 1 : vector<8x256xf32>, i32 -> vector<8x256xf32>
    %c5 = arith.constant 5 : index
    %c0_25 = arith.constant 0 : index
    %c0_26 = arith.constant 0 : index
    %57 = vector.load %arg4[%c5, %c0_25, %c0_26] : memref<20x1x256xf32, #tpu.memory_space<vmem>>, vector<1x1x256xf32>
    %58 = vector.shape_cast %57 : vector<1x1x256xf32> to vector<1x256xf32>
    %59 = vector.broadcast %58 : vector<1x256xf32> to vector<8x256xf32>
    %60 = arith.mulf %56, %59 : vector<8x256xf32>
    %c48 = arith.constant 48 : index
    %c0_27 = arith.constant 0 : index
    %61 = vector.load %arg2[%c48, %c0_27] : memref<544x16xf32, #tpu.memory_space<vmem>>, vector<8x8xf32>
    %62 = arith.truncf %61 : vector<8x8xf32> to vector<8x8xbf16>
    %63 = arith.truncf %60 : vector<8x256xf32> to vector<8x256xbf16>
    %cst_28 = arith.constant dense<0.000000e+00> : vector<8x256xf32>
    %64 = tpu.matmul %62, %63, %cst_28 {dimension_numbers = #tpu.dot_dimension_numbers<[1], [0], [0], [1], [0, 0, 1, 1], [], []>} : vector<8x8xbf16>, vector<8x256xbf16>, vector<8x256xf32> -> vector<8x256xf32>
    %65 = arith.addf %55, %64 : vector<8x256xf32>
    %c240_i32 = arith.constant 240 : i32
    %66 = tpu.dynamic_rotate %1 by %c240_i32 dim 1 : vector<8x256xf32>, i32 -> vector<8x256xf32>
    %c6 = arith.constant 6 : index
    %c0_29 = arith.constant 0 : index
    %c0_30 = arith.constant 0 : index
    %67 = vector.load %arg4[%c6, %c0_29, %c0_30] : memref<20x1x256xf32, #tpu.memory_space<vmem>>, vector<1x1x256xf32>
    %68 = vector.shape_cast %67 : vector<1x1x256xf32> to vector<1x256xf32>
    %69 = vector.broadcast %68 : vector<1x256xf32> to vector<8x256xf32>
    %70 = arith.mulf %66, %69 : vector<8x256xf32>
    %c56 = arith.constant 56 : index
    %c0_31 = arith.constant 0 : index
    %71 = vector.load %arg2[%c56, %c0_31] : memref<544x16xf32, #tpu.memory_space<vmem>>, vector<8x8xf32>
    %72 = arith.truncf %71 : vector<8x8xf32> to vector<8x8xbf16>
    %73 = arith.truncf %70 : vector<8x256xf32> to vector<8x256xbf16>
    %cst_32 = arith.constant dense<0.000000e+00> : vector<8x256xf32>
    %74 = tpu.matmul %72, %73, %cst_32 {dimension_numbers = #tpu.dot_dimension_numbers<[1], [0], [0], [1], [0, 0, 1, 1], [], []>} : vector<8x8xbf16>, vector<8x256xbf16>, vector<8x256xf32> -> vector<8x256xf32>
    %75 = arith.addf %65, %74 : vector<8x256xf32>
    %c239_i32 = arith.constant 239 : i32
    %76 = tpu.dynamic_rotate %1 by %c239_i32 dim 1 : vector<8x256xf32>, i32 -> vector<8x256xf32>
    %c7 = arith.constant 7 : index
    %c0_33 = arith.constant 0 : index
    %c0_34 = arith.constant 0 : index
    %77 = vector.load %arg4[%c7, %c0_33, %c0_34] : memref<20x1x256xf32, #tpu.memory_space<vmem>>, vector<1x1x256xf32>
    %78 = vector.shape_cast %77 : vector<1x1x256xf32> to vector<1x256xf32>
    %79 = vector.broadcast %78 : vector<1x256xf32> to vector<8x256xf32>
    %80 = arith.mulf %76, %79 : vector<8x256xf32>
    %c64 = arith.constant 64 : index
    %c0_35 = arith.constant 0 : index
    %81 = vector.load %arg2[%c64, %c0_35] : memref<544x16xf32, #tpu.memory_space<vmem>>, vector<8x8xf32>
    %82 = arith.truncf %81 : vector<8x8xf32> to vector<8x8xbf16>
    %83 = arith.truncf %80 : vector<8x256xf32> to vector<8x256xbf16>
    %cst_36 = arith.constant dense<0.000000e+00> : vector<8x256xf32>
    %84 = tpu.matmul %82, %83, %cst_36 {dimension_numbers = #tpu.dot_dimension_numbers<[1], [0], [0], [1], [0, 0, 1, 1], [], []>} : vector<8x8xbf16>, vector<8x256xbf16>, vector<8x256xf32> -> vector<8x256xf32>
    %85 = arith.addf %75, %84 : vector<8x256xf32>
    %c0_37 = arith.constant 0 : index
    %c0_38 = arith.constant 0 : index
    %86 = vector.load %arg3[%c0_37, %c0_38] : memref<96x1xf32, #tpu.memory_space<vmem>>, vector<8x1xf32>
    %87 = vector.broadcast %86 : vector<8x1xf32> to vector<8x256xf32>
    %88 = arith.addf %85, %87 : vector<8x256xf32>
    %c17_i32_39 = arith.constant 17 : i32
    %89 = tpu.dynamic_rotate %88 by %c17_i32_39 dim 1 : vector<8x256xf32>, i32 -> vector<8x256xf32>
    %90 = vector.broadcast %4 : vector<1x256xf32> to vector<8x256xf32>
    %91 = arith.mulf %89, %90 : vector<8x256xf32>
    %c72 = arith.constant 72 : index
    %c0_40 = arith.constant 0 : index
    %92 = vector.load %arg2[%c72, %c0_40] : memref<544x16xf32, #tpu.memory_space<vmem>>, vector<8x8xf32>
    %93 = arith.truncf %92 : vector<8x8xf32> to vector<8x8xbf16>
    %94 = arith.truncf %91 : vector<8x256xf32> to vector<8x256xbf16>
    %cst_41 = arith.constant dense<0.000000e+00> : vector<8x256xf32>
    %95 = tpu.matmul %93, %94, %cst_41 {dimension_numbers = #tpu.dot_dimension_numbers<[1], [0], [0], [1], [0, 0, 1, 1], [], []>} : vector<8x8xbf16>, vector<8x256xbf16>, vector<8x256xf32> -> vector<8x256xf32>
    %c16_i32_42 = arith.constant 16 : i32
    %96 = tpu.dynamic_rotate %88 by %c16_i32_42 dim 1 : vector<8x256xf32>, i32 -> vector<8x256xf32>
    %97 = vector.broadcast %13 : vector<1x256xf32> to vector<8x256xf32>
    %98 = arith.mulf %96, %97 : vector<8x256xf32>
    %c80 = arith.constant 80 : index
    %c0_43 = arith.constant 0 : index
    %99 = vector.load %arg2[%c80, %c0_43] : memref<544x16xf32, #tpu.memory_space<vmem>>, vector<8x8xf32>
    %100 = arith.truncf %99 : vector<8x8xf32> to vector<8x8xbf16>
    %101 = arith.truncf %98 : vector<8x256xf32> to vector<8x256xbf16>
    %cst_44 = arith.constant dense<0.000000e+00> : vector<8x256xf32>
    %102 = tpu.matmul %100, %101, %cst_44 {dimension_numbers = #tpu.dot_dimension_numbers<[1], [0], [0], [1], [0, 0, 1, 1], [], []>} : vector<8x8xbf16>, vector<8x256xbf16>, vector<8x256xf32> -> vector<8x256xf32>
    %103 = arith.addf %95, %102 : vector<8x256xf32>
    %c15_i32_45 = arith.constant 15 : i32
    %104 = tpu.dynamic_rotate %88 by %c15_i32_45 dim 1 : vector<8x256xf32>, i32 -> vector<8x256xf32>
    %105 = vector.broadcast %23 : vector<1x256xf32> to vector<8x256xf32>
    %106 = arith.mulf %104, %105 : vector<8x256xf32>
    %c88 = arith.constant 88 : index
    %c0_46 = arith.constant 0 : index
    %107 = vector.load %arg2[%c88, %c0_46] : memref<544x16xf32, #tpu.memory_space<vmem>>, vector<8x8xf32>
    %108 = arith.truncf %107 : vector<8x8xf32> to vector<8x8xbf16>
    %109 = arith.truncf %106 : vector<8x256xf32> to vector<8x256xbf16>
    %cst_47 = arith.constant dense<0.000000e+00> : vector<8x256xf32>
    %110 = tpu.matmul %108, %109, %cst_47 {dimension_numbers = #tpu.dot_dimension_numbers<[1], [0], [0], [1], [0, 0, 1, 1], [], []>} : vector<8x8xbf16>, vector<8x256xbf16>, vector<8x256xf32> -> vector<8x256xf32>
    %111 = arith.addf %103, %110 : vector<8x256xf32>
    %c1_i32_48 = arith.constant 1 : i32
    %112 = tpu.dynamic_rotate %88 by %c1_i32_48 dim 1 : vector<8x256xf32>, i32 -> vector<8x256xf32>
    %113 = vector.broadcast %33 : vector<1x256xf32> to vector<8x256xf32>
    %114 = arith.mulf %112, %113 : vector<8x256xf32>
    %c96 = arith.constant 96 : index
    %c0_49 = arith.constant 0 : index
    %115 = vector.load %arg2[%c96, %c0_49] : memref<544x16xf32, #tpu.memory_space<vmem>>, vector<8x8xf32>
    %116 = arith.truncf %115 : vector<8x8xf32> to vector<8x8xbf16>
    %117 = arith.truncf %114 : vector<8x256xf32> to vector<8x256xbf16>
    %cst_50 = arith.constant dense<0.000000e+00> : vector<8x256xf32>
    %118 = tpu.matmul %116, %117, %cst_50 {dimension_numbers = #tpu.dot_dimension_numbers<[1], [0], [0], [1], [0, 0, 1, 1], [], []>} : vector<8x8xbf16>, vector<8x256xbf16>, vector<8x256xf32> -> vector<8x256xf32>
    %119 = arith.addf %111, %118 : vector<8x256xf32>
    %c104 = arith.constant 104 : index
    %c0_51 = arith.constant 0 : index
    %120 = vector.load %arg2[%c104, %c0_51] : memref<544x16xf32, #tpu.memory_space<vmem>>, vector<8x8xf32>
    %121 = arith.truncf %120 : vector<8x8xf32> to vector<8x8xbf16>
    %122 = arith.truncf %88 : vector<8x256xf32> to vector<8x256xbf16>
    %cst_52 = arith.constant dense<0.000000e+00> : vector<8x256xf32>
    %123 = tpu.matmul %121, %122, %cst_52 {dimension_numbers = #tpu.dot_dimension_numbers<[1], [0], [0], [1], [0, 0, 1, 1], [], []>} : vector<8x8xbf16>, vector<8x256xbf16>, vector<8x256xf32> -> vector<8x256xf32>
    %124 = arith.addf %119, %123 : vector<8x256xf32>
    %c255_i32_53 = arith.constant 255 : i32
    %125 = tpu.dynamic_rotate %88 by %c255_i32_53 dim 1 : vector<8x256xf32>, i32 -> vector<8x256xf32>
    %126 = vector.broadcast %48 : vector<1x256xf32> to vector<8x256xf32>
    %127 = arith.mulf %125, %126 : vector<8x256xf32>
    %c112 = arith.constant 112 : index
    %c0_54 = arith.constant 0 : index
    %128 = vector.load %arg2[%c112, %c0_54] : memref<544x16xf32, #tpu.memory_space<vmem>>, vector<8x8xf32>
    %129 = arith.truncf %128 : vector<8x8xf32> to vector<8x8xbf16>
    %130 = arith.truncf %127 : vector<8x256xf32> to vector<8x256xbf16>
    %cst_55 = arith.constant dense<0.000000e+00> : vector<8x256xf32>
    %131 = tpu.matmul %129, %130, %cst_55 {dimension_numbers = #tpu.dot_dimension_numbers<[1], [0], [0], [1], [0, 0, 1, 1], [], []>} : vector<8x8xbf16>, vector<8x256xbf16>, vector<8x256xf32> -> vector<8x256xf32>
    %132 = arith.addf %124, %131 : vector<8x256xf32>
    %c241_i32_56 = arith.constant 241 : i32
    %133 = tpu.dynamic_rotate %88 by %c241_i32_56 dim 1 : vector<8x256xf32>, i32 -> vector<8x256xf32>
    %134 = vector.broadcast %58 : vector<1x256xf32> to vector<8x256xf32>
    %135 = arith.mulf %133, %134 : vector<8x256xf32>
    %c120 = arith.constant 120 : index
    %c0_57 = arith.constant 0 : index
    %136 = vector.load %arg2[%c120, %c0_57] : memref<544x16xf32, #tpu.memory_space<vmem>>, vector<8x8xf32>
    %137 = arith.truncf %136 : vector<8x8xf32> to vector<8x8xbf16>
    %138 = arith.truncf %135 : vector<8x256xf32> to vector<8x256xbf16>
    %cst_58 = arith.constant dense<0.000000e+00> : vector<8x256xf32>
    %139 = tpu.matmul %137, %138, %cst_58 {dimension_numbers = #tpu.dot_dimension_numbers<[1], [0], [0], [1], [0, 0, 1, 1], [], []>} : vector<8x8xbf16>, vector<8x256xbf16>, vector<8x256xf32> -> vector<8x256xf32>
    %140 = arith.addf %132, %139 : vector<8x256xf32>
    %c240_i32_59 = arith.constant 240 : i32
    %141 = tpu.dynamic_rotate %88 by %c240_i32_59 dim 1 : vector<8x256xf32>, i32 -> vector<8x256xf32>
    %142 = vector.broadcast %68 : vector<1x256xf32> to vector<8x256xf32>
    %143 = arith.mulf %141, %142 : vector<8x256xf32>
    %c128 = arith.constant 128 : index
    %c0_60 = arith.constant 0 : index
    %144 = vector.load %arg2[%c128, %c0_60] : memref<544x16xf32, #tpu.memory_space<vmem>>, vector<8x8xf32>
    %145 = arith.truncf %144 : vector<8x8xf32> to vector<8x8xbf16>
    %146 = arith.truncf %143 : vector<8x256xf32> to vector<8x256xbf16>
    %cst_61 = arith.constant dense<0.000000e+00> : vector<8x256xf32>
    %147 = tpu.matmul %145, %146, %cst_61 {dimension_numbers = #tpu.dot_dimension_numbers<[1], [0], [0], [1], [0, 0, 1, 1], [], []>} : vector<8x8xbf16>, vector<8x256xbf16>, vector<8x256xf32> -> vector<8x256xf32>
    %148 = arith.addf %140, %147 : vector<8x256xf32>
    %c239_i32_62 = arith.constant 239 : i32
    %149 = tpu.dynamic_rotate %88 by %c239_i32_62 dim 1 : vector<8x256xf32>, i32 -> vector<8x256xf32>
    %150 = vector.broadcast %78 : vector<1x256xf32> to vector<8x256xf32>
    %151 = arith.mulf %149, %150 : vector<8x256xf32>
    %c136 = arith.constant 136 : index
    %c0_63 = arith.constant 0 : index
    %152 = vector.load %arg2[%c136, %c0_63] : memref<544x16xf32, #tpu.memory_space<vmem>>, vector<8x8xf32>
    %153 = arith.truncf %152 : vector<8x8xf32> to vector<8x8xbf16>
    %154 = arith.truncf %151 : vector<8x256xf32> to vector<8x256xbf16>
    %cst_64 = arith.constant dense<0.000000e+00> : vector<8x256xf32>
    %155 = tpu.matmul %153, %154, %cst_64 {dimension_numbers = #tpu.dot_dimension_numbers<[1], [0], [0], [1], [0, 0, 1, 1], [], []>} : vector<8x8xbf16>, vector<8x256xbf16>, vector<8x256xf32> -> vector<8x256xf32>
    %156 = arith.addf %148, %155 : vector<8x256xf32>
    %c8_65 = arith.constant 8 : index
    %c0_66 = arith.constant 0 : index
    %157 = vector.load %arg3[%c8_65, %c0_66] : memref<96x1xf32, #tpu.memory_space<vmem>>, vector<8x1xf32>
    %158 = vector.broadcast %157 : vector<8x1xf32> to vector<8x256xf32>
    %159 = arith.addf %156, %158 : vector<8x256xf32>
    %cst_67 = arith.constant 0.000000e+00 : f32
    %160 = vector.broadcast %cst_67 : f32 to vector<8x256xf32>
    %161 = arith.maximumf %159, %160 : vector<8x256xf32>
    %c144 = arith.constant 144 : index
    %c0_68 = arith.constant 0 : index
    %162 = vector.load %arg2[%c144, %c0_68] : memref<544x16xf32, #tpu.memory_space<vmem>>, vector<16x8xf32>
    %163 = arith.truncf %162 : vector<16x8xf32> to vector<16x8xbf16>
    %164 = arith.truncf %161 : vector<8x256xf32> to vector<8x256xbf16>
    %cst_69 = arith.constant dense<0.000000e+00> : vector<16x256xf32>
    %165 = tpu.matmul %163, %164, %cst_69 {dimension_numbers = #tpu.dot_dimension_numbers<[1], [0], [0], [1], [0, 0, 1, 1], [], []>} : vector<16x8xbf16>, vector<8x256xbf16>, vector<16x256xf32> -> vector<16x256xf32>
    %c255_i32_70 = arith.constant 255 : i32
    %166 = tpu.dynamic_rotate %161 by %c255_i32_70 dim 1 : vector<8x256xf32>, i32 -> vector<8x256xf32>
    %c160 = arith.constant 160 : index
    %c0_71 = arith.constant 0 : index
    %167 = vector.load %arg2[%c160, %c0_71] : memref<544x16xf32, #tpu.memory_space<vmem>>, vector<16x8xf32>
    %168 = arith.truncf %167 : vector<16x8xf32> to vector<16x8xbf16>
    %169 = arith.truncf %166 : vector<8x256xf32> to vector<8x256xbf16>
    %cst_72 = arith.constant dense<0.000000e+00> : vector<16x256xf32>
    %170 = tpu.matmul %168, %169, %cst_72 {dimension_numbers = #tpu.dot_dimension_numbers<[1], [0], [0], [1], [0, 0, 1, 1], [], []>} : vector<16x8xbf16>, vector<8x256xbf16>, vector<16x256xf32> -> vector<16x256xf32>
    %171 = arith.addf %165, %170 : vector<16x256xf32>
    %c240_i32_73 = arith.constant 240 : i32
    %172 = tpu.dynamic_rotate %161 by %c240_i32_73 dim 1 : vector<8x256xf32>, i32 -> vector<8x256xf32>
    %c176 = arith.constant 176 : index
    %c0_74 = arith.constant 0 : index
    %173 = vector.load %arg2[%c176, %c0_74] : memref<544x16xf32, #tpu.memory_space<vmem>>, vector<16x8xf32>
    %174 = arith.truncf %173 : vector<16x8xf32> to vector<16x8xbf16>
    %175 = arith.truncf %172 : vector<8x256xf32> to vector<8x256xbf16>
    %cst_75 = arith.constant dense<0.000000e+00> : vector<16x256xf32>
    %176 = tpu.matmul %174, %175, %cst_75 {dimension_numbers = #tpu.dot_dimension_numbers<[1], [0], [0], [1], [0, 0, 1, 1], [], []>} : vector<16x8xbf16>, vector<8x256xbf16>, vector<16x256xf32> -> vector<16x256xf32>
    %177 = arith.addf %171, %176 : vector<16x256xf32>
    %c239_i32_76 = arith.constant 239 : i32
    %178 = tpu.dynamic_rotate %161 by %c239_i32_76 dim 1 : vector<8x256xf32>, i32 -> vector<8x256xf32>
    %c192 = arith.constant 192 : index
    %c0_77 = arith.constant 0 : index
    %179 = vector.load %arg2[%c192, %c0_77] : memref<544x16xf32, #tpu.memory_space<vmem>>, vector<16x8xf32>
    %180 = arith.truncf %179 : vector<16x8xf32> to vector<16x8xbf16>
    %181 = arith.truncf %178 : vector<8x256xf32> to vector<8x256xbf16>
    %cst_78 = arith.constant dense<0.000000e+00> : vector<16x256xf32>
    %182 = tpu.matmul %180, %181, %cst_78 {dimension_numbers = #tpu.dot_dimension_numbers<[1], [0], [0], [1], [0, 0, 1, 1], [], []>} : vector<16x8xbf16>, vector<8x256xbf16>, vector<16x256xf32> -> vector<16x256xf32>
    %183 = arith.addf %177, %182 : vector<16x256xf32>
    %c16_79 = arith.constant 16 : index
    %c0_80 = arith.constant 0 : index
    %184 = vector.load %arg3[%c16_79, %c0_80] : memref<96x1xf32, #tpu.memory_space<vmem>>, vector<16x1xf32>
    %185 = vector.broadcast %184 : vector<16x1xf32> to vector<16x256xf32>
    %186 = arith.addf %183, %185 : vector<16x256xf32>
    %cst_81 = arith.constant 0.000000e+00 : f32
    %187 = vector.broadcast %cst_81 : f32 to vector<16x256xf32>
    %188 = arith.maximumf %186, %187 : vector<16x256xf32>
    %c34_i32 = arith.constant 34 : i32
    %189 = tpu.dynamic_rotate %188 by %c34_i32 dim 1 : vector<16x256xf32>, i32 -> vector<16x256xf32>
    %c8_82 = arith.constant 8 : index
    %c0_83 = arith.constant 0 : index
    %c0_84 = arith.constant 0 : index
    %190 = vector.load %arg4[%c8_82, %c0_83, %c0_84] : memref<20x1x256xf32, #tpu.memory_space<vmem>>, vector<1x1x256xf32>
    %191 = vector.shape_cast %190 : vector<1x1x256xf32> to vector<1x256xf32>
    %192 = vector.broadcast %191 : vector<1x256xf32> to vector<16x256xf32>
    %193 = arith.mulf %189, %192 : vector<16x256xf32>
    %c208 = arith.constant 208 : index
    %c0_85 = arith.constant 0 : index
    %194 = vector.load %arg2[%c208, %c0_85] : memref<544x16xf32, #tpu.memory_space<vmem>>, vector<16x16xf32>
    %195 = arith.truncf %194 : vector<16x16xf32> to vector<16x16xbf16>
    %196 = arith.truncf %193 : vector<16x256xf32> to vector<16x256xbf16>
    %cst_86 = arith.constant dense<0.000000e+00> : vector<16x256xf32>
    %197 = tpu.matmul %195, %196, %cst_86 {dimension_numbers = #tpu.dot_dimension_numbers<[1], [0], [0], [1], [0, 0, 1, 1], [], []>} : vector<16x16xbf16>, vector<16x256xbf16>, vector<16x256xf32> -> vector<16x256xf32>
    %c32_i32 = arith.constant 32 : i32
    %198 = tpu.dynamic_rotate %188 by %c32_i32 dim 1 : vector<16x256xf32>, i32 -> vector<16x256xf32>
    %c9 = arith.constant 9 : index
    %c0_87 = arith.constant 0 : index
    %c0_88 = arith.constant 0 : index
    %199 = vector.load %arg4[%c9, %c0_87, %c0_88] : memref<20x1x256xf32, #tpu.memory_space<vmem>>, vector<1x1x256xf32>
    %200 = vector.shape_cast %199 : vector<1x1x256xf32> to vector<1x256xf32>
    %201 = vector.broadcast %200 : vector<1x256xf32> to vector<16x256xf32>
    %202 = arith.mulf %198, %201 : vector<16x256xf32>
    %c224 = arith.constant 224 : index
    %c0_89 = arith.constant 0 : index
    %203 = vector.load %arg2[%c224, %c0_89] : memref<544x16xf32, #tpu.memory_space<vmem>>, vector<16x16xf32>
    %204 = arith.truncf %203 : vector<16x16xf32> to vector<16x16xbf16>
    %205 = arith.truncf %202 : vector<16x256xf32> to vector<16x256xbf16>
    %cst_90 = arith.constant dense<0.000000e+00> : vector<16x256xf32>
    %206 = tpu.matmul %204, %205, %cst_90 {dimension_numbers = #tpu.dot_dimension_numbers<[1], [0], [0], [1], [0, 0, 1, 1], [], []>} : vector<16x16xbf16>, vector<16x256xbf16>, vector<16x256xf32> -> vector<16x256xf32>
    %207 = arith.addf %197, %206 : vector<16x256xf32>
    %c30_i32 = arith.constant 30 : i32
    %208 = tpu.dynamic_rotate %188 by %c30_i32 dim 1 : vector<16x256xf32>, i32 -> vector<16x256xf32>
    %c10 = arith.constant 10 : index
    %c0_91 = arith.constant 0 : index
    %c0_92 = arith.constant 0 : index
    %209 = vector.load %arg4[%c10, %c0_91, %c0_92] : memref<20x1x256xf32, #tpu.memory_space<vmem>>, vector<1x1x256xf32>
    %210 = vector.shape_cast %209 : vector<1x1x256xf32> to vector<1x256xf32>
    %211 = vector.broadcast %210 : vector<1x256xf32> to vector<16x256xf32>
    %212 = arith.mulf %208, %211 : vector<16x256xf32>
    %c240 = arith.constant 240 : index
    %c0_93 = arith.constant 0 : index
    %213 = vector.load %arg2[%c240, %c0_93] : memref<544x16xf32, #tpu.memory_space<vmem>>, vector<16x16xf32>
    %214 = arith.truncf %213 : vector<16x16xf32> to vector<16x16xbf16>
    %215 = arith.truncf %212 : vector<16x256xf32> to vector<16x256xbf16>
    %cst_94 = arith.constant dense<0.000000e+00> : vector<16x256xf32>
    %216 = tpu.matmul %214, %215, %cst_94 {dimension_numbers = #tpu.dot_dimension_numbers<[1], [0], [0], [1], [0, 0, 1, 1], [], []>} : vector<16x16xbf16>, vector<16x256xbf16>, vector<16x256xf32> -> vector<16x256xf32>
    %217 = arith.addf %207, %216 : vector<16x256xf32>
    %c2_i32 = arith.constant 2 : i32
    %218 = tpu.dynamic_rotate %188 by %c2_i32 dim 1 : vector<16x256xf32>, i32 -> vector<16x256xf32>
    %c11 = arith.constant 11 : index
    %c0_95 = arith.constant 0 : index
    %c0_96 = arith.constant 0 : index
    %219 = vector.load %arg4[%c11, %c0_95, %c0_96] : memref<20x1x256xf32, #tpu.memory_space<vmem>>, vector<1x1x256xf32>
    %220 = vector.shape_cast %219 : vector<1x1x256xf32> to vector<1x256xf32>
    %221 = vector.broadcast %220 : vector<1x256xf32> to vector<16x256xf32>
    %222 = arith.mulf %218, %221 : vector<16x256xf32>
    %c256 = arith.constant 256 : index
    %c0_97 = arith.constant 0 : index
    %223 = vector.load %arg2[%c256, %c0_97] : memref<544x16xf32, #tpu.memory_space<vmem>>, vector<16x16xf32>
    %224 = arith.truncf %223 : vector<16x16xf32> to vector<16x16xbf16>
    %225 = arith.truncf %222 : vector<16x256xf32> to vector<16x256xbf16>
    %cst_98 = arith.constant dense<0.000000e+00> : vector<16x256xf32>
    %226 = tpu.matmul %224, %225, %cst_98 {dimension_numbers = #tpu.dot_dimension_numbers<[1], [0], [0], [1], [0, 0, 1, 1], [], []>} : vector<16x16xbf16>, vector<16x256xbf16>, vector<16x256xf32> -> vector<16x256xf32>
    %227 = arith.addf %217, %226 : vector<16x256xf32>
    %c272 = arith.constant 272 : index
    %c0_99 = arith.constant 0 : index
    %228 = vector.load %arg2[%c272, %c0_99] : memref<544x16xf32, #tpu.memory_space<vmem>>, vector<16x16xf32>
    %229 = arith.truncf %228 : vector<16x16xf32> to vector<16x16xbf16>
    %230 = arith.truncf %188 : vector<16x256xf32> to vector<16x256xbf16>
    %cst_100 = arith.constant dense<0.000000e+00> : vector<16x256xf32>
    %231 = tpu.matmul %229, %230, %cst_100 {dimension_numbers = #tpu.dot_dimension_numbers<[1], [0], [0], [1], [0, 0, 1, 1], [], []>} : vector<16x16xbf16>, vector<16x256xbf16>, vector<16x256xf32> -> vector<16x256xf32>
    %232 = arith.addf %227, %231 : vector<16x256xf32>
    %c254_i32 = arith.constant 254 : i32
    %233 = tpu.dynamic_rotate %188 by %c254_i32 dim 1 : vector<16x256xf32>, i32 -> vector<16x256xf32>
    %c12 = arith.constant 12 : index
    %c0_101 = arith.constant 0 : index
    %c0_102 = arith.constant 0 : index
    %234 = vector.load %arg4[%c12, %c0_101, %c0_102] : memref<20x1x256xf32, #tpu.memory_space<vmem>>, vector<1x1x256xf32>
    %235 = vector.shape_cast %234 : vector<1x1x256xf32> to vector<1x256xf32>
    %236 = vector.broadcast %235 : vector<1x256xf32> to vector<16x256xf32>
    %237 = arith.mulf %233, %236 : vector<16x256xf32>
    %c288 = arith.constant 288 : index
    %c0_103 = arith.constant 0 : index
    %238 = vector.load %arg2[%c288, %c0_103] : memref<544x16xf32, #tpu.memory_space<vmem>>, vector<16x16xf32>
    %239 = arith.truncf %238 : vector<16x16xf32> to vector<16x16xbf16>
    %240 = arith.truncf %237 : vector<16x256xf32> to vector<16x256xbf16>
    %cst_104 = arith.constant dense<0.000000e+00> : vector<16x256xf32>
    %241 = tpu.matmul %239, %240, %cst_104 {dimension_numbers = #tpu.dot_dimension_numbers<[1], [0], [0], [1], [0, 0, 1, 1], [], []>} : vector<16x16xbf16>, vector<16x256xbf16>, vector<16x256xf32> -> vector<16x256xf32>
    %242 = arith.addf %232, %241 : vector<16x256xf32>
    %c226_i32 = arith.constant 226 : i32
    %243 = tpu.dynamic_rotate %188 by %c226_i32 dim 1 : vector<16x256xf32>, i32 -> vector<16x256xf32>
    %c13 = arith.constant 13 : index
    %c0_105 = arith.constant 0 : index
    %c0_106 = arith.constant 0 : index
    %244 = vector.load %arg4[%c13, %c0_105, %c0_106] : memref<20x1x256xf32, #tpu.memory_space<vmem>>, vector<1x1x256xf32>
    %245 = vector.shape_cast %244 : vector<1x1x256xf32> to vector<1x256xf32>
    %246 = vector.broadcast %245 : vector<1x256xf32> to vector<16x256xf32>
    %247 = arith.mulf %243, %246 : vector<16x256xf32>
    %c304 = arith.constant 304 : index
    %c0_107 = arith.constant 0 : index
    %248 = vector.load %arg2[%c304, %c0_107] : memref<544x16xf32, #tpu.memory_space<vmem>>, vector<16x16xf32>
    %249 = arith.truncf %248 : vector<16x16xf32> to vector<16x16xbf16>
    %250 = arith.truncf %247 : vector<16x256xf32> to vector<16x256xbf16>
    %cst_108 = arith.constant dense<0.000000e+00> : vector<16x256xf32>
    %251 = tpu.matmul %249, %250, %cst_108 {dimension_numbers = #tpu.dot_dimension_numbers<[1], [0], [0], [1], [0, 0, 1, 1], [], []>} : vector<16x16xbf16>, vector<16x256xbf16>, vector<16x256xf32> -> vector<16x256xf32>
    %252 = arith.addf %242, %251 : vector<16x256xf32>
    %c224_i32 = arith.constant 224 : i32
    %253 = tpu.dynamic_rotate %188 by %c224_i32 dim 1 : vector<16x256xf32>, i32 -> vector<16x256xf32>
    %c14 = arith.constant 14 : index
    %c0_109 = arith.constant 0 : index
    %c0_110 = arith.constant 0 : index
    %254 = vector.load %arg4[%c14, %c0_109, %c0_110] : memref<20x1x256xf32, #tpu.memory_space<vmem>>, vector<1x1x256xf32>
    %255 = vector.shape_cast %254 : vector<1x1x256xf32> to vector<1x256xf32>
    %256 = vector.broadcast %255 : vector<1x256xf32> to vector<16x256xf32>
    %257 = arith.mulf %253, %256 : vector<16x256xf32>
    %c320 = arith.constant 320 : index
    %c0_111 = arith.constant 0 : index
    %258 = vector.load %arg2[%c320, %c0_111] : memref<544x16xf32, #tpu.memory_space<vmem>>, vector<16x16xf32>
    %259 = arith.truncf %258 : vector<16x16xf32> to vector<16x16xbf16>
    %260 = arith.truncf %257 : vector<16x256xf32> to vector<16x256xbf16>
    %cst_112 = arith.constant dense<0.000000e+00> : vector<16x256xf32>
    %261 = tpu.matmul %259, %260, %cst_112 {dimension_numbers = #tpu.dot_dimension_numbers<[1], [0], [0], [1], [0, 0, 1, 1], [], []>} : vector<16x16xbf16>, vector<16x256xbf16>, vector<16x256xf32> -> vector<16x256xf32>
    %262 = arith.addf %252, %261 : vector<16x256xf32>
    %c222_i32 = arith.constant 222 : i32
    %263 = tpu.dynamic_rotate %188 by %c222_i32 dim 1 : vector<16x256xf32>, i32 -> vector<16x256xf32>
    %c15 = arith.constant 15 : index
    %c0_113 = arith.constant 0 : index
    %c0_114 = arith.constant 0 : index
    %264 = vector.load %arg4[%c15, %c0_113, %c0_114] : memref<20x1x256xf32, #tpu.memory_space<vmem>>, vector<1x1x256xf32>
    %265 = vector.shape_cast %264 : vector<1x1x256xf32> to vector<1x256xf32>
    %266 = vector.broadcast %265 : vector<1x256xf32> to vector<16x256xf32>
    %267 = arith.mulf %263, %266 : vector<16x256xf32>
    %c336 = arith.constant 336 : index
    %c0_115 = arith.constant 0 : index
    %268 = vector.load %arg2[%c336, %c0_115] : memref<544x16xf32, #tpu.memory_space<vmem>>, vector<16x16xf32>
    %269 = arith.truncf %268 : vector<16x16xf32> to vector<16x16xbf16>
    %270 = arith.truncf %267 : vector<16x256xf32> to vector<16x256xbf16>
    %cst_116 = arith.constant dense<0.000000e+00> : vector<16x256xf32>
    %271 = tpu.matmul %269, %270, %cst_116 {dimension_numbers = #tpu.dot_dimension_numbers<[1], [0], [0], [1], [0, 0, 1, 1], [], []>} : vector<16x16xbf16>, vector<16x256xbf16>, vector<16x256xf32> -> vector<16x256xf32>
    %272 = arith.addf %262, %271 : vector<16x256xf32>
    %c32_117 = arith.constant 32 : index
    %c0_118 = arith.constant 0 : index
    %273 = vector.load %arg3[%c32_117, %c0_118] : memref<96x1xf32, #tpu.memory_space<vmem>>, vector<16x1xf32>
    %274 = vector.broadcast %273 : vector<16x1xf32> to vector<16x256xf32>
    %275 = arith.addf %272, %274 : vector<16x256xf32>
    %cst_119 = arith.constant 0.000000e+00 : f32
    %276 = vector.broadcast %cst_119 : f32 to vector<16x256xf32>
    %277 = arith.maximumf %275, %276 : vector<16x256xf32>
    %c352 = arith.constant 352 : index
    %c0_120 = arith.constant 0 : index
    %278 = vector.load %arg2[%c352, %c0_120] : memref<544x16xf32, #tpu.memory_space<vmem>>, vector<8x16xf32>
    %279 = arith.truncf %278 : vector<8x16xf32> to vector<8x16xbf16>
    %280 = arith.truncf %277 : vector<16x256xf32> to vector<16x256xbf16>
    %cst_121 = arith.constant dense<0.000000e+00> : vector<8x256xf32>
    %281 = tpu.matmul %279, %280, %cst_121 {dimension_numbers = #tpu.dot_dimension_numbers<[1], [0], [0], [1], [0, 0, 1, 1], [], []>} : vector<8x16xbf16>, vector<16x256xbf16>, vector<8x256xf32> -> vector<8x256xf32>
    %c16_122 = arith.constant 16 : index
    %c0_123 = arith.constant 0 : index
    %c0_124 = arith.constant 0 : index
    %282 = vector.load %arg4[%c16_122, %c0_123, %c0_124] : memref<20x1x256xf32, #tpu.memory_space<vmem>>, vector<1x1x256xf32>
    %283 = vector.shape_cast %282 : vector<1x1x256xf32> to vector<1x256xf32>
    %284 = vector.broadcast %283 : vector<1x256xf32> to vector<8x256xf32>
    %285 = arith.mulf %281, %284 : vector<8x256xf32>
    %c360 = arith.constant 360 : index
    %c0_125 = arith.constant 0 : index
    %286 = vector.load %arg2[%c360, %c0_125] : memref<544x16xf32, #tpu.memory_space<vmem>>, vector<8x16xf32>
    %287 = arith.truncf %286 : vector<8x16xf32> to vector<8x16xbf16>
    %288 = arith.truncf %277 : vector<16x256xf32> to vector<16x256xbf16>
    %cst_126 = arith.constant dense<0.000000e+00> : vector<8x256xf32>
    %289 = tpu.matmul %287, %288, %cst_126 {dimension_numbers = #tpu.dot_dimension_numbers<[1], [0], [0], [1], [0, 0, 1, 1], [], []>} : vector<8x16xbf16>, vector<16x256xbf16>, vector<8x256xf32> -> vector<8x256xf32>
    %c1_i32_127 = arith.constant 1 : i32
    %290 = tpu.dynamic_rotate %289 by %c1_i32_127 dim 1 : vector<8x256xf32>, i32 -> vector<8x256xf32>
    %c17 = arith.constant 17 : index
    %c0_128 = arith.constant 0 : index
    %c0_129 = arith.constant 0 : index
    %291 = vector.load %arg4[%c17, %c0_128, %c0_129] : memref<20x1x256xf32, #tpu.memory_space<vmem>>, vector<1x1x256xf32>
    %292 = vector.shape_cast %291 : vector<1x1x256xf32> to vector<1x256xf32>
    %293 = vector.broadcast %292 : vector<1x256xf32> to vector<8x256xf32>
    %294 = arith.mulf %290, %293 : vector<8x256xf32>
    %295 = arith.addf %285, %294 : vector<8x256xf32>
    %c368 = arith.constant 368 : index
    %c0_130 = arith.constant 0 : index
    %296 = vector.load %arg2[%c368, %c0_130] : memref<544x16xf32, #tpu.memory_space<vmem>>, vector<8x16xf32>
    %297 = arith.truncf %296 : vector<8x16xf32> to vector<8x16xbf16>
    %298 = arith.truncf %277 : vector<16x256xf32> to vector<16x256xbf16>
    %cst_131 = arith.constant dense<0.000000e+00> : vector<8x256xf32>
    %299 = tpu.matmul %297, %298, %cst_131 {dimension_numbers = #tpu.dot_dimension_numbers<[1], [0], [0], [1], [0, 0, 1, 1], [], []>} : vector<8x16xbf16>, vector<16x256xbf16>, vector<8x256xf32> -> vector<8x256xf32>
    %c16_i32_132 = arith.constant 16 : i32
    %300 = tpu.dynamic_rotate %299 by %c16_i32_132 dim 1 : vector<8x256xf32>, i32 -> vector<8x256xf32>
    %c18 = arith.constant 18 : index
    %c0_133 = arith.constant 0 : index
    %c0_134 = arith.constant 0 : index
    %301 = vector.load %arg4[%c18, %c0_133, %c0_134] : memref<20x1x256xf32, #tpu.memory_space<vmem>>, vector<1x1x256xf32>
    %302 = vector.shape_cast %301 : vector<1x1x256xf32> to vector<1x256xf32>
    %303 = vector.broadcast %302 : vector<1x256xf32> to vector<8x256xf32>
    %304 = arith.mulf %300, %303 : vector<8x256xf32>
    %305 = arith.addf %295, %304 : vector<8x256xf32>
    %c376 = arith.constant 376 : index
    %c0_135 = arith.constant 0 : index
    %306 = vector.load %arg2[%c376, %c0_135] : memref<544x16xf32, #tpu.memory_space<vmem>>, vector<8x16xf32>
    %307 = arith.truncf %306 : vector<8x16xf32> to vector<8x16xbf16>
    %308 = arith.truncf %277 : vector<16x256xf32> to vector<16x256xbf16>
    %cst_136 = arith.constant dense<0.000000e+00> : vector<8x256xf32>
    %309 = tpu.matmul %307, %308, %cst_136 {dimension_numbers = #tpu.dot_dimension_numbers<[1], [0], [0], [1], [0, 0, 1, 1], [], []>} : vector<8x16xbf16>, vector<16x256xbf16>, vector<8x256xf32> -> vector<8x256xf32>
    %c17_i32_137 = arith.constant 17 : i32
    %310 = tpu.dynamic_rotate %309 by %c17_i32_137 dim 1 : vector<8x256xf32>, i32 -> vector<8x256xf32>
    %c19 = arith.constant 19 : index
    %c0_138 = arith.constant 0 : index
    %c0_139 = arith.constant 0 : index
    %311 = vector.load %arg4[%c19, %c0_138, %c0_139] : memref<20x1x256xf32, #tpu.memory_space<vmem>>, vector<1x1x256xf32>
    %312 = vector.shape_cast %311 : vector<1x1x256xf32> to vector<1x256xf32>
    %313 = vector.broadcast %312 : vector<1x256xf32> to vector<8x256xf32>
    %314 = arith.mulf %310, %313 : vector<8x256xf32>
    %315 = arith.addf %305, %314 : vector<8x256xf32>
    %c48_140 = arith.constant 48 : index
    %c0_141 = arith.constant 0 : index
    %316 = vector.load %arg3[%c48_140, %c0_141] : memref<96x1xf32, #tpu.memory_space<vmem>>, vector<8x1xf32>
    %317 = vector.broadcast %316 : vector<8x1xf32> to vector<8x256xf32>
    %318 = arith.addf %315, %317 : vector<8x256xf32>
    %cst_142 = arith.constant 0.000000e+00 : f32
    %319 = vector.broadcast %cst_142 : f32 to vector<8x256xf32>
    %320 = arith.maximumf %318, %319 : vector<8x256xf32>
    %c17_i32_143 = arith.constant 17 : i32
    %321 = tpu.dynamic_rotate %161 by %c17_i32_143 dim 1 : vector<8x256xf32>, i32 -> vector<8x256xf32>
    %322 = vector.broadcast %4 : vector<1x256xf32> to vector<8x256xf32>
    %323 = arith.mulf %321, %322 : vector<8x256xf32>
    %c384 = arith.constant 384 : index
    %c0_144 = arith.constant 0 : index
    %324 = vector.load %arg2[%c384, %c0_144] : memref<544x16xf32, #tpu.memory_space<vmem>>, vector<8x8xf32>
    %325 = arith.truncf %324 : vector<8x8xf32> to vector<8x8xbf16>
    %326 = arith.truncf %323 : vector<8x256xf32> to vector<8x256xbf16>
    %cst_145 = arith.constant dense<0.000000e+00> : vector<8x256xf32>
    %327 = tpu.matmul %325, %326, %cst_145 {dimension_numbers = #tpu.dot_dimension_numbers<[1], [0], [0], [1], [0, 0, 1, 1], [], []>} : vector<8x8xbf16>, vector<8x256xbf16>, vector<8x256xf32> -> vector<8x256xf32>
    %c17_i32_146 = arith.constant 17 : i32
    %328 = tpu.dynamic_rotate %320 by %c17_i32_146 dim 1 : vector<8x256xf32>, i32 -> vector<8x256xf32>
    %329 = vector.broadcast %4 : vector<1x256xf32> to vector<8x256xf32>
    %330 = arith.mulf %328, %329 : vector<8x256xf32>
    %c392 = arith.constant 392 : index
    %c0_147 = arith.constant 0 : index
    %331 = vector.load %arg2[%c392, %c0_147] : memref<544x16xf32, #tpu.memory_space<vmem>>, vector<8x8xf32>
    %332 = arith.truncf %331 : vector<8x8xf32> to vector<8x8xbf16>
    %333 = arith.truncf %330 : vector<8x256xf32> to vector<8x256xbf16>
    %cst_148 = arith.constant dense<0.000000e+00> : vector<8x256xf32>
    %334 = tpu.matmul %332, %333, %cst_148 {dimension_numbers = #tpu.dot_dimension_numbers<[1], [0], [0], [1], [0, 0, 1, 1], [], []>} : vector<8x8xbf16>, vector<8x256xbf16>, vector<8x256xf32> -> vector<8x256xf32>
    %335 = arith.addf %327, %334 : vector<8x256xf32>
    %c16_i32_149 = arith.constant 16 : i32
    %336 = tpu.dynamic_rotate %161 by %c16_i32_149 dim 1 : vector<8x256xf32>, i32 -> vector<8x256xf32>
    %337 = vector.broadcast %13 : vector<1x256xf32> to vector<8x256xf32>
    %338 = arith.mulf %336, %337 : vector<8x256xf32>
    %c400 = arith.constant 400 : index
    %c0_150 = arith.constant 0 : index
    %339 = vector.load %arg2[%c400, %c0_150] : memref<544x16xf32, #tpu.memory_space<vmem>>, vector<8x8xf32>
    %340 = arith.truncf %339 : vector<8x8xf32> to vector<8x8xbf16>
    %341 = arith.truncf %338 : vector<8x256xf32> to vector<8x256xbf16>
    %cst_151 = arith.constant dense<0.000000e+00> : vector<8x256xf32>
    %342 = tpu.matmul %340, %341, %cst_151 {dimension_numbers = #tpu.dot_dimension_numbers<[1], [0], [0], [1], [0, 0, 1, 1], [], []>} : vector<8x8xbf16>, vector<8x256xbf16>, vector<8x256xf32> -> vector<8x256xf32>
    %343 = arith.addf %335, %342 : vector<8x256xf32>
    %c16_i32_152 = arith.constant 16 : i32
    %344 = tpu.dynamic_rotate %320 by %c16_i32_152 dim 1 : vector<8x256xf32>, i32 -> vector<8x256xf32>
    %345 = vector.broadcast %13 : vector<1x256xf32> to vector<8x256xf32>
    %346 = arith.mulf %344, %345 : vector<8x256xf32>
    %c408 = arith.constant 408 : index
    %c0_153 = arith.constant 0 : index
    %347 = vector.load %arg2[%c408, %c0_153] : memref<544x16xf32, #tpu.memory_space<vmem>>, vector<8x8xf32>
    %348 = arith.truncf %347 : vector<8x8xf32> to vector<8x8xbf16>
    %349 = arith.truncf %346 : vector<8x256xf32> to vector<8x256xbf16>
    %cst_154 = arith.constant dense<0.000000e+00> : vector<8x256xf32>
    %350 = tpu.matmul %348, %349, %cst_154 {dimension_numbers = #tpu.dot_dimension_numbers<[1], [0], [0], [1], [0, 0, 1, 1], [], []>} : vector<8x8xbf16>, vector<8x256xbf16>, vector<8x256xf32> -> vector<8x256xf32>
    %351 = arith.addf %343, %350 : vector<8x256xf32>
    %c15_i32_155 = arith.constant 15 : i32
    %352 = tpu.dynamic_rotate %161 by %c15_i32_155 dim 1 : vector<8x256xf32>, i32 -> vector<8x256xf32>
    %353 = vector.broadcast %23 : vector<1x256xf32> to vector<8x256xf32>
    %354 = arith.mulf %352, %353 : vector<8x256xf32>
    %c416 = arith.constant 416 : index
    %c0_156 = arith.constant 0 : index
    %355 = vector.load %arg2[%c416, %c0_156] : memref<544x16xf32, #tpu.memory_space<vmem>>, vector<8x8xf32>
    %356 = arith.truncf %355 : vector<8x8xf32> to vector<8x8xbf16>
    %357 = arith.truncf %354 : vector<8x256xf32> to vector<8x256xbf16>
    %cst_157 = arith.constant dense<0.000000e+00> : vector<8x256xf32>
    %358 = tpu.matmul %356, %357, %cst_157 {dimension_numbers = #tpu.dot_dimension_numbers<[1], [0], [0], [1], [0, 0, 1, 1], [], []>} : vector<8x8xbf16>, vector<8x256xbf16>, vector<8x256xf32> -> vector<8x256xf32>
    %359 = arith.addf %351, %358 : vector<8x256xf32>
    %c15_i32_158 = arith.constant 15 : i32
    %360 = tpu.dynamic_rotate %320 by %c15_i32_158 dim 1 : vector<8x256xf32>, i32 -> vector<8x256xf32>
    %361 = vector.broadcast %23 : vector<1x256xf32> to vector<8x256xf32>
    %362 = arith.mulf %360, %361 : vector<8x256xf32>
    %c424 = arith.constant 424 : index
    %c0_159 = arith.constant 0 : index
    %363 = vector.load %arg2[%c424, %c0_159] : memref<544x16xf32, #tpu.memory_space<vmem>>, vector<8x8xf32>
    %364 = arith.truncf %363 : vector<8x8xf32> to vector<8x8xbf16>
    %365 = arith.truncf %362 : vector<8x256xf32> to vector<8x256xbf16>
    %cst_160 = arith.constant dense<0.000000e+00> : vector<8x256xf32>
    %366 = tpu.matmul %364, %365, %cst_160 {dimension_numbers = #tpu.dot_dimension_numbers<[1], [0], [0], [1], [0, 0, 1, 1], [], []>} : vector<8x8xbf16>, vector<8x256xbf16>, vector<8x256xf32> -> vector<8x256xf32>
    %367 = arith.addf %359, %366 : vector<8x256xf32>
    %c1_i32_161 = arith.constant 1 : i32
    %368 = tpu.dynamic_rotate %161 by %c1_i32_161 dim 1 : vector<8x256xf32>, i32 -> vector<8x256xf32>
    %369 = vector.broadcast %33 : vector<1x256xf32> to vector<8x256xf32>
    %370 = arith.mulf %368, %369 : vector<8x256xf32>
    %c432 = arith.constant 432 : index
    %c0_162 = arith.constant 0 : index
    %371 = vector.load %arg2[%c432, %c0_162] : memref<544x16xf32, #tpu.memory_space<vmem>>, vector<8x8xf32>
    %372 = arith.truncf %371 : vector<8x8xf32> to vector<8x8xbf16>
    %373 = arith.truncf %370 : vector<8x256xf32> to vector<8x256xbf16>
    %cst_163 = arith.constant dense<0.000000e+00> : vector<8x256xf32>
    %374 = tpu.matmul %372, %373, %cst_163 {dimension_numbers = #tpu.dot_dimension_numbers<[1], [0], [0], [1], [0, 0, 1, 1], [], []>} : vector<8x8xbf16>, vector<8x256xbf16>, vector<8x256xf32> -> vector<8x256xf32>
    %375 = arith.addf %367, %374 : vector<8x256xf32>
    %c1_i32_164 = arith.constant 1 : i32
    %376 = tpu.dynamic_rotate %320 by %c1_i32_164 dim 1 : vector<8x256xf32>, i32 -> vector<8x256xf32>
    %377 = vector.broadcast %33 : vector<1x256xf32> to vector<8x256xf32>
    %378 = arith.mulf %376, %377 : vector<8x256xf32>
    %c440 = arith.constant 440 : index
    %c0_165 = arith.constant 0 : index
    %379 = vector.load %arg2[%c440, %c0_165] : memref<544x16xf32, #tpu.memory_space<vmem>>, vector<8x8xf32>
    %380 = arith.truncf %379 : vector<8x8xf32> to vector<8x8xbf16>
    %381 = arith.truncf %378 : vector<8x256xf32> to vector<8x256xbf16>
    %cst_166 = arith.constant dense<0.000000e+00> : vector<8x256xf32>
    %382 = tpu.matmul %380, %381, %cst_166 {dimension_numbers = #tpu.dot_dimension_numbers<[1], [0], [0], [1], [0, 0, 1, 1], [], []>} : vector<8x8xbf16>, vector<8x256xbf16>, vector<8x256xf32> -> vector<8x256xf32>
    %383 = arith.addf %375, %382 : vector<8x256xf32>
    %c448 = arith.constant 448 : index
    %c0_167 = arith.constant 0 : index
    %384 = vector.load %arg2[%c448, %c0_167] : memref<544x16xf32, #tpu.memory_space<vmem>>, vector<8x8xf32>
    %385 = arith.truncf %384 : vector<8x8xf32> to vector<8x8xbf16>
    %386 = arith.truncf %161 : vector<8x256xf32> to vector<8x256xbf16>
    %cst_168 = arith.constant dense<0.000000e+00> : vector<8x256xf32>
    %387 = tpu.matmul %385, %386, %cst_168 {dimension_numbers = #tpu.dot_dimension_numbers<[1], [0], [0], [1], [0, 0, 1, 1], [], []>} : vector<8x8xbf16>, vector<8x256xbf16>, vector<8x256xf32> -> vector<8x256xf32>
    %388 = arith.addf %383, %387 : vector<8x256xf32>
    %c456 = arith.constant 456 : index
    %c0_169 = arith.constant 0 : index
    %389 = vector.load %arg2[%c456, %c0_169] : memref<544x16xf32, #tpu.memory_space<vmem>>, vector<8x8xf32>
    %390 = arith.truncf %389 : vector<8x8xf32> to vector<8x8xbf16>
    %391 = arith.truncf %320 : vector<8x256xf32> to vector<8x256xbf16>
    %cst_170 = arith.constant dense<0.000000e+00> : vector<8x256xf32>
    %392 = tpu.matmul %390, %391, %cst_170 {dimension_numbers = #tpu.dot_dimension_numbers<[1], [0], [0], [1], [0, 0, 1, 1], [], []>} : vector<8x8xbf16>, vector<8x256xbf16>, vector<8x256xf32> -> vector<8x256xf32>
    %393 = arith.addf %388, %392 : vector<8x256xf32>
    %c255_i32_171 = arith.constant 255 : i32
    %394 = tpu.dynamic_rotate %161 by %c255_i32_171 dim 1 : vector<8x256xf32>, i32 -> vector<8x256xf32>
    %395 = vector.broadcast %48 : vector<1x256xf32> to vector<8x256xf32>
    %396 = arith.mulf %394, %395 : vector<8x256xf32>
    %c464 = arith.constant 464 : index
    %c0_172 = arith.constant 0 : index
    %397 = vector.load %arg2[%c464, %c0_172] : memref<544x16xf32, #tpu.memory_space<vmem>>, vector<8x8xf32>
    %398 = arith.truncf %397 : vector<8x8xf32> to vector<8x8xbf16>
    %399 = arith.truncf %396 : vector<8x256xf32> to vector<8x256xbf16>
    %cst_173 = arith.constant dense<0.000000e+00> : vector<8x256xf32>
    %400 = tpu.matmul %398, %399, %cst_173 {dimension_numbers = #tpu.dot_dimension_numbers<[1], [0], [0], [1], [0, 0, 1, 1], [], []>} : vector<8x8xbf16>, vector<8x256xbf16>, vector<8x256xf32> -> vector<8x256xf32>
    %401 = arith.addf %393, %400 : vector<8x256xf32>
    %c255_i32_174 = arith.constant 255 : i32
    %402 = tpu.dynamic_rotate %320 by %c255_i32_174 dim 1 : vector<8x256xf32>, i32 -> vector<8x256xf32>
    %403 = vector.broadcast %48 : vector<1x256xf32> to vector<8x256xf32>
    %404 = arith.mulf %402, %403 : vector<8x256xf32>
    %c472 = arith.constant 472 : index
    %c0_175 = arith.constant 0 : index
    %405 = vector.load %arg2[%c472, %c0_175] : memref<544x16xf32, #tpu.memory_space<vmem>>, vector<8x8xf32>
    %406 = arith.truncf %405 : vector<8x8xf32> to vector<8x8xbf16>
    %407 = arith.truncf %404 : vector<8x256xf32> to vector<8x256xbf16>
    %cst_176 = arith.constant dense<0.000000e+00> : vector<8x256xf32>
    %408 = tpu.matmul %406, %407, %cst_176 {dimension_numbers = #tpu.dot_dimension_numbers<[1], [0], [0], [1], [0, 0, 1, 1], [], []>} : vector<8x8xbf16>, vector<8x256xbf16>, vector<8x256xf32> -> vector<8x256xf32>
    %409 = arith.addf %401, %408 : vector<8x256xf32>
    %c241_i32_177 = arith.constant 241 : i32
    %410 = tpu.dynamic_rotate %161 by %c241_i32_177 dim 1 : vector<8x256xf32>, i32 -> vector<8x256xf32>
    %411 = vector.broadcast %58 : vector<1x256xf32> to vector<8x256xf32>
    %412 = arith.mulf %410, %411 : vector<8x256xf32>
    %c480 = arith.constant 480 : index
    %c0_178 = arith.constant 0 : index
    %413 = vector.load %arg2[%c480, %c0_178] : memref<544x16xf32, #tpu.memory_space<vmem>>, vector<8x8xf32>
    %414 = arith.truncf %413 : vector<8x8xf32> to vector<8x8xbf16>
    %415 = arith.truncf %412 : vector<8x256xf32> to vector<8x256xbf16>
    %cst_179 = arith.constant dense<0.000000e+00> : vector<8x256xf32>
    %416 = tpu.matmul %414, %415, %cst_179 {dimension_numbers = #tpu.dot_dimension_numbers<[1], [0], [0], [1], [0, 0, 1, 1], [], []>} : vector<8x8xbf16>, vector<8x256xbf16>, vector<8x256xf32> -> vector<8x256xf32>
    %417 = arith.addf %409, %416 : vector<8x256xf32>
    %c241_i32_180 = arith.constant 241 : i32
    %418 = tpu.dynamic_rotate %320 by %c241_i32_180 dim 1 : vector<8x256xf32>, i32 -> vector<8x256xf32>
    %419 = vector.broadcast %58 : vector<1x256xf32> to vector<8x256xf32>
    %420 = arith.mulf %418, %419 : vector<8x256xf32>
    %c488 = arith.constant 488 : index
    %c0_181 = arith.constant 0 : index
    %421 = vector.load %arg2[%c488, %c0_181] : memref<544x16xf32, #tpu.memory_space<vmem>>, vector<8x8xf32>
    %422 = arith.truncf %421 : vector<8x8xf32> to vector<8x8xbf16>
    %423 = arith.truncf %420 : vector<8x256xf32> to vector<8x256xbf16>
    %cst_182 = arith.constant dense<0.000000e+00> : vector<8x256xf32>
    %424 = tpu.matmul %422, %423, %cst_182 {dimension_numbers = #tpu.dot_dimension_numbers<[1], [0], [0], [1], [0, 0, 1, 1], [], []>} : vector<8x8xbf16>, vector<8x256xbf16>, vector<8x256xf32> -> vector<8x256xf32>
    %425 = arith.addf %417, %424 : vector<8x256xf32>
    %c240_i32_183 = arith.constant 240 : i32
    %426 = tpu.dynamic_rotate %161 by %c240_i32_183 dim 1 : vector<8x256xf32>, i32 -> vector<8x256xf32>
    %427 = vector.broadcast %68 : vector<1x256xf32> to vector<8x256xf32>
    %428 = arith.mulf %426, %427 : vector<8x256xf32>
    %c496 = arith.constant 496 : index
    %c0_184 = arith.constant 0 : index
    %429 = vector.load %arg2[%c496, %c0_184] : memref<544x16xf32, #tpu.memory_space<vmem>>, vector<8x8xf32>
    %430 = arith.truncf %429 : vector<8x8xf32> to vector<8x8xbf16>
    %431 = arith.truncf %428 : vector<8x256xf32> to vector<8x256xbf16>
    %cst_185 = arith.constant dense<0.000000e+00> : vector<8x256xf32>
    %432 = tpu.matmul %430, %431, %cst_185 {dimension_numbers = #tpu.dot_dimension_numbers<[1], [0], [0], [1], [0, 0, 1, 1], [], []>} : vector<8x8xbf16>, vector<8x256xbf16>, vector<8x256xf32> -> vector<8x256xf32>
    %433 = arith.addf %425, %432 : vector<8x256xf32>
    %c240_i32_186 = arith.constant 240 : i32
    %434 = tpu.dynamic_rotate %320 by %c240_i32_186 dim 1 : vector<8x256xf32>, i32 -> vector<8x256xf32>
    %435 = vector.broadcast %68 : vector<1x256xf32> to vector<8x256xf32>
    %436 = arith.mulf %434, %435 : vector<8x256xf32>
    %c504 = arith.constant 504 : index
    %c0_187 = arith.constant 0 : index
    %437 = vector.load %arg2[%c504, %c0_187] : memref<544x16xf32, #tpu.memory_space<vmem>>, vector<8x8xf32>
    %438 = arith.truncf %437 : vector<8x8xf32> to vector<8x8xbf16>
    %439 = arith.truncf %436 : vector<8x256xf32> to vector<8x256xbf16>
    %cst_188 = arith.constant dense<0.000000e+00> : vector<8x256xf32>
    %440 = tpu.matmul %438, %439, %cst_188 {dimension_numbers = #tpu.dot_dimension_numbers<[1], [0], [0], [1], [0, 0, 1, 1], [], []>} : vector<8x8xbf16>, vector<8x256xbf16>, vector<8x256xf32> -> vector<8x256xf32>
    %441 = arith.addf %433, %440 : vector<8x256xf32>
    %c239_i32_189 = arith.constant 239 : i32
    %442 = tpu.dynamic_rotate %161 by %c239_i32_189 dim 1 : vector<8x256xf32>, i32 -> vector<8x256xf32>
    %443 = vector.broadcast %78 : vector<1x256xf32> to vector<8x256xf32>
    %444 = arith.mulf %442, %443 : vector<8x256xf32>
    %c512 = arith.constant 512 : index
    %c0_190 = arith.constant 0 : index
    %445 = vector.load %arg2[%c512, %c0_190] : memref<544x16xf32, #tpu.memory_space<vmem>>, vector<8x8xf32>
    %446 = arith.truncf %445 : vector<8x8xf32> to vector<8x8xbf16>
    %447 = arith.truncf %444 : vector<8x256xf32> to vector<8x256xbf16>
    %cst_191 = arith.constant dense<0.000000e+00> : vector<8x256xf32>
    %448 = tpu.matmul %446, %447, %cst_191 {dimension_numbers = #tpu.dot_dimension_numbers<[1], [0], [0], [1], [0, 0, 1, 1], [], []>} : vector<8x8xbf16>, vector<8x256xbf16>, vector<8x256xf32> -> vector<8x256xf32>
    %449 = arith.addf %441, %448 : vector<8x256xf32>
    %c239_i32_192 = arith.constant 239 : i32
    %450 = tpu.dynamic_rotate %320 by %c239_i32_192 dim 1 : vector<8x256xf32>, i32 -> vector<8x256xf32>
    %451 = vector.broadcast %78 : vector<1x256xf32> to vector<8x256xf32>
    %452 = arith.mulf %450, %451 : vector<8x256xf32>
    %c520 = arith.constant 520 : index
    %c0_193 = arith.constant 0 : index
    %453 = vector.load %arg2[%c520, %c0_193] : memref<544x16xf32, #tpu.memory_space<vmem>>, vector<8x8xf32>
    %454 = arith.truncf %453 : vector<8x8xf32> to vector<8x8xbf16>
    %455 = arith.truncf %452 : vector<8x256xf32> to vector<8x256xbf16>
    %cst_194 = arith.constant dense<0.000000e+00> : vector<8x256xf32>
    %456 = tpu.matmul %454, %455, %cst_194 {dimension_numbers = #tpu.dot_dimension_numbers<[1], [0], [0], [1], [0, 0, 1, 1], [], []>} : vector<8x8xbf16>, vector<8x256xbf16>, vector<8x256xf32> -> vector<8x256xf32>
    %457 = arith.addf %449, %456 : vector<8x256xf32>
    %c56_195 = arith.constant 56 : index
    %c0_196 = arith.constant 0 : index
    %458 = vector.load %arg3[%c56_195, %c0_196] : memref<96x1xf32, #tpu.memory_space<vmem>>, vector<8x1xf32>
    %459 = vector.broadcast %458 : vector<8x1xf32> to vector<8x256xf32>
    %460 = arith.addf %457, %459 : vector<8x256xf32>
    %cst_197 = arith.constant 0.000000e+00 : f32
    %461 = vector.broadcast %cst_197 : f32 to vector<8x256xf32>
    %462 = arith.maximumf %460, %461 : vector<8x256xf32>
    %c64_198 = arith.constant 64 : index
    %c0_199 = arith.constant 0 : index
    %463 = vector.load %arg3[%c64_198, %c0_199] : memref<96x1xf32, #tpu.memory_space<vmem>>, vector<8x1xf32>
    %464 = vector.broadcast %463 : vector<8x1xf32> to vector<8x256xf32>
    %465 = arith.mulf %462, %464 : vector<8x256xf32>
    %c72_200 = arith.constant 72 : index
    %c0_201 = arith.constant 0 : index
    %466 = vector.load %arg3[%c72_200, %c0_201] : memref<96x1xf32, #tpu.memory_space<vmem>>, vector<8x1xf32>
    %467 = vector.broadcast %466 : vector<8x1xf32> to vector<8x256xf32>
    %468 = arith.addf %465, %467 : vector<8x256xf32>
    %cst_202 = arith.constant 0.000000e+00 : f32
    %469 = vector.broadcast %cst_202 : f32 to vector<8x256xf32>
    %470 = arith.maximumf %468, %469 : vector<8x256xf32>
    %c528 = arith.constant 528 : index
    %c0_203 = arith.constant 0 : index
    %471 = vector.load %arg2[%c528, %c0_203] : memref<544x16xf32, #tpu.memory_space<vmem>>, vector<8x8xf32>
    %472 = arith.truncf %471 : vector<8x8xf32> to vector<8x8xbf16>
    %473 = arith.truncf %470 : vector<8x256xf32> to vector<8x256xbf16>
    %cst_204 = arith.constant dense<0.000000e+00> : vector<8x256xf32>
    %474 = tpu.matmul %472, %473, %cst_204 {dimension_numbers = #tpu.dot_dimension_numbers<[1], [0], [0], [1], [0, 0, 1, 1], [], []>} : vector<8x8xbf16>, vector<8x256xbf16>, vector<8x256xf32> -> vector<8x256xf32>
    %c80_205 = arith.constant 80 : index
    %c0_206 = arith.constant 0 : index
    %475 = vector.load %arg3[%c80_205, %c0_206] : memref<96x1xf32, #tpu.memory_space<vmem>>, vector<8x1xf32>
    %476 = vector.broadcast %475 : vector<8x1xf32> to vector<8x256xf32>
    %477 = arith.addf %474, %476 : vector<8x256xf32>
    %cst_207 = arith.constant 0.000000e+00 : f32
    %478 = vector.broadcast %cst_207 : f32 to vector<8x256xf32>
    %479 = arith.maximumf %477, %478 : vector<8x256xf32>
    %c536 = arith.constant 536 : index
    %c0_208 = arith.constant 0 : index
    %480 = vector.load %arg2[%c536, %c0_208] : memref<544x16xf32, #tpu.memory_space<vmem>>, vector<8x8xf32>
    %481 = arith.truncf %480 : vector<8x8xf32> to vector<8x8xbf16>
    %482 = arith.truncf %479 : vector<8x256xf32> to vector<8x256xbf16>
    %cst_209 = arith.constant dense<0.000000e+00> : vector<8x256xf32>
    %483 = tpu.matmul %481, %482, %cst_209 {dimension_numbers = #tpu.dot_dimension_numbers<[1], [0], [0], [1], [0, 0, 1, 1], [], []>} : vector<8x8xbf16>, vector<8x256xbf16>, vector<8x256xf32> -> vector<8x256xf32>
    %c88_210 = arith.constant 88 : index
    %c0_211 = arith.constant 0 : index
    %484 = vector.load %arg3[%c88_210, %c0_211] : memref<96x1xf32, #tpu.memory_space<vmem>>, vector<8x1xf32>
    %485 = vector.broadcast %484 : vector<8x1xf32> to vector<8x256xf32>
    %486 = arith.addf %483, %485 : vector<8x256xf32>
    %c0_212 = arith.constant 0 : index
    %c0_213 = arith.constant 0 : index
    %c0_214 = arith.constant 0 : index
    %487 = vector.load %arg5[%c0_212, %c0_213, %c0_214] : memref<1x8x256xf32, #tpu.memory_space<vmem>>, vector<1x8x256xf32>
    %488 = vector.shape_cast %487 : vector<1x8x256xf32> to vector<8x256xf32>
    %489 = vector.shape_cast %486 : vector<8x256xf32> to vector<1x8x256xf32>
    tpu.vector_store %arg5[%c0_212, %c0_213, %c0_214], %489 {strides = array<i32>} : memref<1x8x256xf32, #tpu.memory_space<vmem>>, vector<1x8x256xf32>,
    return
  }
  func.func @transform_0(%arg0: i32) -> (i32, i32, i32) {
    %c0_i32 = arith.constant 0 : i32
    %c0_i32_0 = arith.constant 0 : i32
    %c0_i32_1 = arith.constant 0 : i32
    return %arg0, %c0_i32, %c0_i32_0 : i32, i32, i32
  }
  func.func @transform_1(%arg0: i32) -> (i32, i32) {
    %c0_i32 = arith.constant 0 : i32
    %c0_i32_0 = arith.constant 0 : i32
    %c0_i32_1 = arith.constant 0 : i32
    return %c0_i32, %c0_i32_0 : i32, i32
  }
  func.func @transform_2(%arg0: i32) -> (i32, i32) {
    %c0_i32 = arith.constant 0 : i32
    %c0_i32_0 = arith.constant 0 : i32
    %c0_i32_1 = arith.constant 0 : i32
    return %c0_i32, %c0_i32_0 : i32, i32
  }
  func.func @transform_3(%arg0: i32) -> (i32, i32, i32) {
    %c0_i32 = arith.constant 0 : i32
    %c0_i32_0 = arith.constant 0 : i32
    %c0_i32_1 = arith.constant 0 : i32
    %c0_i32_2 = arith.constant 0 : i32
    return %c0_i32, %c0_i32_0, %c0_i32_1 : i32, i32, i32
  }
  func.func @transform_4(%arg0: i32) -> (i32, i32, i32) {
    %c0_i32 = arith.constant 0 : i32
    %c0_i32_0 = arith.constant 0 : i32
    %c0_i32_1 = arith.constant 0 : i32
    return %arg0, %c0_i32, %c0_i32_0 : i32, i32, i32
  }
}

</mosaic_0001>

<bundles_post_ra>
// kernel: _lambda_.1
= control target key start
LH: loop header
LB: loop body
LE: loop exit
PB: predicated region body
PF: predicated region fallthrough
CT: control target
= control target key end

     0   :  { %9 = vsyncpa [#allocation3], 0  ;;  %s4404_s15 = smov 0   ;;  %s5350_s0 = inlined_call_operand.vmem [shape: f32[2,8,256], index: 0, kind: input, shape index: {}]   ;;  %s5351_s1 = inlined_call_operand.hbm [shape: f32[544,16], index: 1, kind: input, shape index: {}]   ;;  %s5352_s2 = inlined_call_operand.vmem [shape: f32[96,1], index: 2, kind: input, shape index: {}]   ;;  %s5353_s3 = inlined_call_operand.vmem [shape: f32[20,1,256], index: 3, kind: input, shape index: {}]   ;;  %s5354_s4 = inlined_call_operand.vmem [shape: f32[2,8,256], index: 4, kind: output, shape index: {}]  }
   0x1 LB: > { %s4410_s16 = sadd.s32 4294967295, %s4357_s15   ;;  %p4106_p0 = scmp.ge.s32.totalorder %s4357_s15, 1  ;;  %s4357_s15 = sphi %s4404_s15, %s15_s15  }
   0x2   : > { %p135_p1 = scmp.lt.s32.totalorder %s4357_s15, 3  ;;  %s4359_s17 = smov [#allocation2]  }
   0x3   : > { %s147_s18 = sshll.u32 %s4359_s17, 4  ;;  %p5355_p3 = scmp.eq.s32.totalorder %s4410_s16, 0  ;;  %s148_s18 = int_to_ptr.vmem [resolvable:$true] %s147_s18 }
   0x4   : > { %p4414_p2 = pnand %p4106_p0, %p135_p1  ;;  %s4319_s23 = scalar_lea.hbm %s5351_s1, 8704 }
   0x5   : > { %p4320_p6 = scmp.ne.s32.totalorder %s5351_s1, %s4319_s23  ;;  %p4326_p10 = scmp.lt.u32.totalorder %s4319_s23, %s5351_s1 }
   0x6   : > { %s5357_s19 = scalar_select %p4414_p2, 1, 0 }
   0x7   : > { %p4283_p4 = pneg %p4414_p2 }
   0x9   : > { %p4423_p5 = pnand %p5355_p3, %p4283_p4 }
   0xb   : > { %p4321_p7 = pneg %p4423_p5 }
   0xd   : > { %p4322_p8 = pnand %p4321_p7, %p4320_p6 }
   0xf   : > { %p4323_p9 = pneg %p4322_p8 }
  0x11   : > { %p4328_p11 = pnand %p4326_p10, %p4323_p9 }
  0x13   : > { %4331 = shalt.err (!%p4328_p11)
}
  0x14   : > { %s4332_s28 = scalar_lea.vmem %s148_s18, 8704  ;;  %p4340_p1 = scmp.lt.s32.totalorder %s148_s18, %s148_s18 }
  0x15   : > { %p4333_p12 = scmp.ne.s32.totalorder %s148_s18, %s4332_s28  ;;  %p4341_p4 = scmp.lt.s32.totalorder %s4332_s28, %s4332_s28 }
  0x17   : > { %p4335_p13 = pnand %p4333_p12, %p4321_p7  ;;  %p4342_p3 = por %p4341_p4, %p4340_p1 }
  0x19   : > { %p4336_p0 = pneg %p4335_p13 }
  0x1b   : > { %p4343_p2 = pnand %p4342_p3, %p4336_p0 }
  0x1d   : > { %4346 = shalt.err (!%p4343_p2)
}
  0x1e   : > { %s4360_s29 = smov 128   ;;  %s4361_s30 = smov 8  }
  0x1f   : > { %4286 = dma.hbm_to_vmem [thread:$0]  (!%p4423_p5), %s5351_s1, 8704, %s148_s18, [#allocation3], %s4360_s29, %s4360_s29, %s4361_s30  }
  0x20   : > { %p5359_p6 = scmp.ne.s32.totalorder %s5357_s19, 0 }
  0x21   : > { %p5360_p8 = scmp.eq.s32.totalorder (!%p5359_p6), %s4410_s16, 0 }
  0x22   : > { %177 = sbr.rel (%p5359_p6) target bundleno = 2855 (0xb27), region = 36 }
  0x29   : > { %4352 = dma.done.wait (%p5360_p8), [#allocation3], 8704   ;;  %p5361_p7 = pmov %p5360_p8 }
  0x2a   : > { %p203_p2 = scmp.lt.s32.totalorder %s4410_s16, 1  ;;  %v4362_v1 = vmov 0   ;;  %s4363_s11 = smov 17   ;;  %v895_v3 = vld [vmem:[%s5352_s2] sm:$0xff]  ;;  %v220_v4 = vlaneseq  ;;  %v265_v23 = vld [vmem:[#allocation2 + $0x8] sm:$0xff]  ;;  %vm273_vm3 = vcmask 1043456  }
  0x2b   : > { %4354 = vsyncadd (%p5361_p7), [#allocation3], 4294958592  ;;  %312 = vmatprep.mubr.bf16.mxu0 %v4362_v1  ;;  %362 = vmatprep.mubr.bf16.mxu1 %v4362_v1  ;;  %s4364_s12 = smov 16   ;;  %s4365_s13 = smov 15   ;;  %v225_v9 = vld [vmem:[%s5353_s3] sm:$0x3]  ;;  %v266_v34 = vpack.c.bf16 %v265_v23, %v265_v23 }
  0x2c   : > { %s5363_s16 = smov (!%p203_p2, %s4410_s16), 1  ;;  %4317 = vset.pattern.permute.xlu0 %v4362_v1  ;;  %4318 = vset.pattern.permute.xlu1 %v4362_v1  ;;  %s4366_s14 = smov 1   ;;  %v228_v5 = vshrl.u32 %v220_v4, 7  ;;  %v4502_v6 = vand.u32 127, %v220_v4  ;;  %v4115_v10 = vld [vmem:[%s5353_s3 + $0x2] sm:$0x3] }
  0x2d   : > { %s4233_s7 = sshll.u32 %s5363_s16, 4  ;;  %s4367_s17 = smov 127   ;;  %v4120_v13 = vld [vmem:[%s5353_s3 + $0x4] sm:$0x3]  ;;  %v4123_v32 = vld [vmem:[%s5353_s3 + $0x6] sm:$0x3] }
  0x2e   : > { %s207_s10 = scalar_lea.vmem %s5350_s0, %s4233_s7  ;;  %s4368_s18 = smov 113   ;;  %v4504_v7 = vsub.s32 0, %v228_v5  ;;  %v4506_v8 = vsub.s32 1, %v228_v5  ;;  %vm222_vm0 = vcmp.lt.s32.totalorder %v4502_v6, 17  ;;  %vm247_vm1 = vcmp.lt.s32.totalorder %v4502_v6, 16  ;;  %v239_v22 = vld [vmem:[#allocation2] sm:$0xff] }
  0x2f   : > { %v4459_v0 = vld [vmem:[%s207_s10] sm:$0xff]  ;;  %v4467_v2 = vld [vmem:[%s207_s10 + $0x8] sm:$0xff]  ;;  %s4369_s19 = smov 112   ;;  %s4370_s20 = smov 111   ;;  %vm375_vm2 = vcmp.lt.s32.totalorder %v4502_v6, 15  ;;  %v240_v33 = vpack.c.bf16 %v239_v22, %v239_v22  ;;  %vm453_vm4 = vcmp.lt.s32.totalorder %v4502_v6, 1 }
  0x30   : > { %216 = vrot.lane.b32.xlu1 %v4459_v0, %s4363_s11  ;;  %243 = vrot.lane.b32.xlu0 %v4459_v0, %s4364_s12  ;;  %v4520_v14 = vrot.slane %v225_v9, %v4506_v8  ;;  %v4523_v15 = vrot.slane %v4115_v10, %v4506_v8  ;;  %v4526_v16 = vrot.slane %v4115_v10, %v4504_v7  ;;  %v4128_v49 = vld [vmem:[%s5353_s3 + $0x8] sm:$0x3]  ;;  %vm269_vm5 = vcmask 64512   ;;  %v393_v54 = vld [vmem:[#allocation2 + $0x10] sm:$0xff]  ;;  %v471_v55 = vld [vmem:[#allocation2 + $0x18] sm:$0xff]  ;;  %s4371_s30 = smov 32   ;;  %s212_s27 = scalar_lea.vmem %s5354_s4, %s4233_s7 }
  0x31   : > { %v4529_v17 = vrot.slane %v225_v9, %v4504_v7  ;;  %v4533_v20 = vrot.slane %v4120_v13, %v4504_v7  ;;  %v4536_v21 = vrot.slane %v4120_v13, %v4506_v8  ;;  %v4559_v43 = vrot.slane %v4123_v32, %v4504_v7  ;;  %s4372_s5 = smov 34   ;;  %s4373_s6 = smov 30  }
  0x32   : > { %v4562_v44 = vrot.slane %v4123_v32, %v4506_v8  ;;  %vm587_vm6 = vcmp.lt.s32.totalorder %v4502_v6, 127  ;;  %v4579_v58 = vrot.slane %v4128_v49, %v4504_v7  ;;  %v530_v59 = vpack.c.bf16 %v4467_v2, %v4467_v2  ;;  %s4374_s8 = smov 2   ;;  %s4375_s9 = smov 126  }
  0x33   : > { %v4589_v63 = vrot.slane %v4128_v49, %v4506_v8  ;;  %v472_v4 = vpack.c.bf16 %v471_v55, %v471_v55  ;;  %vm665_vm7 = vcmp.lt.s32.totalorder %v4502_v6, 113  ;;  %vm743_vm8 = vcmp.lt.s32.totalorder %v4502_v6, 112  ;;  %s4376_s10 = smov 98   ;;  %s4377_s21 = smov 96  }
  0x34   : > { %218 = vrot.lane.b32.xlu1 %v4467_v2, %s4363_s11  ;;  %245 = vrot.lane.b32.xlu0 %v4467_v2, %s4364_s12  ;;  %vm821_vm9 = vcmp.lt.s32.totalorder %v4502_v6, 111  ;;  %s4378_s22 = smov 94   ;;  %vm1794_vm10 = vcmp.lt.s32.totalorder %v4502_v6, 32  ;;  %vm1759_vm11 = vcmp.lt.s32.totalorder %v4502_v6, 34  ;;  %vm1821_vm12 = vcmask 130048  }
  0x35   : > { %vm1922_vm13 = vcmp.lt.s32.totalorder %v4502_v6, 30  ;;  %vm2007_vm14 = vcmp.lt.s32.totalorder %v4502_v6, 2  ;;  %vm2147_vm15 = vcmp.lt.s32.totalorder %v4502_v6, 126 }
  0x38   : > { %373 = vrot.lane.b32.xlu1 %v4467_v2, %s4365_s13  ;;  %371 = vrot.lane.b32.xlu0 %v4459_v0, %s4365_s13 }
  0x3c   : > { %451 = vrot.lane.b32.xlu1 %v4467_v2, %s4366_s14  ;;  %449 = vrot.lane.b32.xlu0 %v4459_v0, %s4366_s14 }
  0x40   : > { %585 = vrot.lane.b32.xlu1 %v4467_v2, %s4367_s17  ;;  %583 = vrot.lane.b32.xlu0 %v4459_v0, %s4367_s17 }
  0x44   : > { %663 = vrot.lane.b32.xlu1 %v4467_v2, %s4368_s18  ;;  %661 = vrot.lane.b32.xlu0 %v4459_v0, %s4368_s18 }
  0x48   : > { %741 = vrot.lane.b32.xlu1 %v4467_v2, %s4369_s19  ;;  %739 = vrot.lane.b32.xlu0 %v4459_v0, %s4369_s19 }
  0x4c   : > { %819 = vrot.lane.b32.xlu1 %v4467_v2, %s4370_s20  ;;  %817 = vrot.lane.b32.xlu0 %v4459_v0, %s4370_s20  ;;  %v394_v2 = vpack.c.bf16 %v393_v54, %v393_v54 }
  0x50   : > { %898 = vperm.xlu0 %4317, %v895_v3   ;;  %v4131_v3 = vld [vmem:[%s5353_s3 + $0xa] sm:$0x3] }
  0xa2   : > { %v217_v11 = vpop.permute.xlu1 %216  ;;  %v244_v12 = vpop.permute.xlu0 %243 }
  0xa6   : > { %v219_v18 = vpop.permute.xlu1 %218  ;;  %v246_v19 = vpop.permute.xlu0 %245 }
  0xa7   : > { %v224_v24 = vsel %vm222_vm0, %v219_v18, %v217_v11  ;;  %v249_v25 = vsel %vm247_vm1, %v246_v19, %v244_v12  ;;  %v223_v26 = vsel %vm222_vm0, %v217_v11, %v219_v18  ;;  %v248_v27 = vsel %vm247_vm1, %v244_v12, %v246_v19 }
  0xa8   : > { %v238_v28 = vmul.f32 %v4520_v14, %v223_v26  ;;  %v264_v29 = vmul.f32 %v4523_v15, %v248_v27  ;;  %v263_v30 = vmul.f32 %v4526_v16, %v249_v25  ;;  %v237_v31 = vmul.f32 %v4529_v17, %v224_v24  ;;  %v4134_v25 = vld [vmem:[%s5353_s3 + $0xc] sm:$0x3] }
  0xa9   : > { %v529_v12 = vpack.c.bf16 %v4459_v0, %v4459_v0  ;;  %v4606_v19 = vrot.slane %v4131_v3, %v4504_v7  ;;  %v4613_v24 = vrot.slane %v4131_v3, %v4506_v8 }
  0xaa   : > { %v242_v35 = vpack.c.bf16 %v238_v28, %v238_v28  ;;  %v374_v36 = vpop.permute.xlu1 %373  ;;  %v268_v37 = vpack.c.bf16 %v264_v29, %v264_v29  ;;  %v372_v38 = vpop.permute.xlu0 %371  ;;  %v267_v39 = vpack.c.bf16 %v263_v30, %v263_v30  ;;  %v241_v40 = vpack.c.bf16 %v237_v31, %v237_v31 }
  0xab   : > { %v376_v41 = vsel %vm375_vm2, %v372_v38, %v374_v36  ;;  %v377_v42 = vsel %vm375_vm2, %v374_v36, %v372_v38  ;;  %v535_v30 = vsel %vm273_vm3, %v529_v12, 0  ;;  %v4633_v38 = vrot.slane %v4134_v25, %v4506_v8 }
  0xac   : > { %4118 = vmatprep.subr.msk.bf16.mxu1 %vm273_vm3, %v242_v35  ;;  %4116 = vmatprep.subr.msk.bf16.mxu0 %vm273_vm3, %v268_v37  ;;  %v391_v45 = vmul.f32 %v4533_v20, %v377_v42  ;;  %v392_v46 = vmul.f32 %v4536_v21, %v376_v41  ;;  %v275_v47 = vsel %vm273_vm3, %v267_v39, 0  ;;  %v325_v48 = vsel %vm273_vm3, %v241_v40, 0  ;;  %v605_v39 = vld [vmem:[#allocation2 + $0x28] sm:$0xff] }
  0xad   : > { %281 = vmatpush1.bf16.msra.mxu0 %v275_v47  ;;  %331 = vmatpush1.bf16.msra.mxu1 %v325_v48  ;;  %v4137_v40 = vld [vmem:[%s5353_s3 + $0xe] sm:$0x3] }
  0xae   : > { %v395_v50 = vpack.c.bf16 %v391_v45, %v391_v45  ;;  %v396_v51 = vpack.c.bf16 %v392_v46, %v392_v46  ;;  %v452_v52 = vpop.permute.xlu1 %451  ;;  %v450_v53 = vpop.permute.xlu0 %449  ;;  %v4653_v54 = vrot.slane %v4137_v40, %v4506_v8 }
  0xaf   : > { %v454_v56 = vsel %vm453_vm4, %v450_v53, %v452_v52  ;;  %v455_v57 = vsel %vm453_vm4, %v452_v52, %v450_v53  ;;  %v4650_v53 = vrot.slane %v4137_v40, %v4504_v7 }
  0xb0   : > { %4119 = vmatmul.mubr.msk.bf16.vlgmr.msra.gmra.mrb[0].mxu1 %vm269_vm5, %v240_v33  ;;  %4117 = vmatmul.mubr.msk.bf16.vlgmr.msra.gmra.mrb[0].mxu0 %vm269_vm5, %v266_v34  ;;  %v469_v60 = vmul.f32 %v4559_v43, %v455_v57  ;;  %v470_v61 = vmul.f32 %v4562_v44, %v454_v56  ;;  %v401_v62 = vsel %vm273_vm3, %v395_v50, 0  ;;  %v4625_v33 = vrot.slane %v4134_v25, %v4504_v7  ;;  %v527_v34 = vld [vmem:[#allocation2 + $0x20] sm:$0xff] }
  0xb1   : > { %4121 = vmatprep.subr.msk.bf16.mxu0 %vm273_vm3, %v396_v51  ;;  %438 = vmatprep.mubr.bf16.mxu0 %v4362_v1  ;;  %v528_v47 = vpack.c.bf16 %v527_v34, %v527_v34  ;;  %v606_v50 = vpack.c.bf16 %v605_v39, %v605_v39 }
  0xb2   : > { %v473_v5 = vpack.c.bf16 %v469_v60, %v469_v60  ;;  %v474_v9 = vpack.c.bf16 %v470_v61, %v470_v61  ;;  %407 = vmatpush1.bf16.msra.mxu0 %v401_v62  ;;  %v586_v10 = vpop.permute.xlu1 %585  ;;  %v584_v11 = vpop.permute.xlu0 %583  ;;  %516 = vmatprep.mubr.bf16.mxu1 %v4362_v1 }
  0xb3   : > { %v588_v13 = vsel %vm587_vm6, %v584_v11, %v586_v10  ;;  %v589_v18 = vsel %vm587_vm6, %v586_v10, %v584_v11  ;;  %4126 = vmatprep.subr.msk.bf16.mxu0 %vm273_vm3, %v530_v59 }
  0xb4   : > { %4124 = vmatprep.subr.msk.bf16.mxu1 %vm273_vm3, %v474_v9  ;;  %v479_v22 = vsel %vm273_vm3, %v473_v5, 0  ;;  %v603_v23 = vmul.f32 %v4579_v58, %v588_v13  ;;  %v604_v0 = vmul.f32 %v4589_v63, %v589_v18  ;;  %v683_v5 = vld [vmem:[#allocation2 + $0x30] sm:$0xff]  ;;  %v761_v9 = vld [vmem:[#allocation2 + $0x38] sm:$0xff] }
  0xb5   : > { %485 = vmatpush1.bf16.msra.mxu1 %v479_v22  ;;  %v684_v12 = vpack.c.bf16 %v683_v5, %v683_v5  ;;  %v762_v13 = vpack.c.bf16 %v761_v9, %v761_v9  ;;  %v839_v22 = vld [vmem:[#allocation2 + $0x40] sm:$0xff] }
  0xb6   : > { %v607_v26 = vpack.c.bf16 %v603_v23, %v603_v23  ;;  %v608_v27 = vpack.c.bf16 %v604_v0, %v604_v0  ;;  %v664_v28 = vpop.permute.xlu1 %663  ;;  %v662_v29 = vpop.permute.xlu0 %661  ;;  %v840_v23 = vpack.c.bf16 %v839_v22, %v839_v22 }
  0xb7   : > { %v666_v31 = vsel %vm665_vm7, %v662_v29, %v664_v28  ;;  %v667_v32 = vsel %vm665_vm7, %v664_v28, %v662_v29 }
  0xb8   : > { %4122 = vmatmul.mubr.msk.bf16.vlgmr.msra.gmra.mrb[4].mxu0 %vm269_vm5, %v394_v2  ;;  %4125 = vmatmul.mubr.msk.bf16.vlgmr.msra.gmra.mrb[4].mxu1 %vm269_vm5, %v472_v4  ;;  %v681_v35 = vmul.f32 %v4606_v19, %v666_v31  ;;  %v682_v36 = vmul.f32 %v4613_v24, %v667_v32  ;;  %v613_v37 = vsel %vm273_vm3, %v607_v26, 0 }
  0xb9   : > { %541 = vmatpush1.bf16.msra.mxu0 %v535_v30  ;;  %4129 = vmatprep.subr.msk.bf16.mxu1 %vm273_vm3, %v608_v27 }
  0xba   : > { %v685_v41 = vpack.c.bf16 %v681_v35, %v681_v35  ;;  %v686_v42 = vpack.c.bf16 %v682_v36, %v682_v36  ;;  %572 = vmatprep.mubr.bf16.mxu0 %v4362_v1  ;;  %619 = vmatpush1.bf16.msra.mxu1 %v613_v37  ;;  %v742_v45 = vpop.permute.xlu1 %741  ;;  %v740_v46 = vpop.permute.xlu0 %739 }
  0xbb   : > { %v744_v48 = vsel %vm743_vm8, %v740_v46, %v742_v45  ;;  %v745_v49 = vsel %vm743_vm8, %v742_v45, %v740_v46  ;;  %650 = vmatprep.mubr.bf16.mxu1 %v4362_v1 }
  0xbc   : > { %v759_v51 = vmul.f32 %v4625_v33, %v744_v48  ;;  %v760_v52 = vmul.f32 %v4633_v38, %v745_v49  ;;  %4132 = vmatprep.subr.msk.bf16.mxu0 %vm273_vm3, %v686_v42  ;;  %v691_v57 = vsel %vm273_vm3, %v685_v41, 0 }
  0xbe   : > { %v763_v55 = vpack.c.bf16 %v759_v51, %v759_v51  ;;  %v764_v56 = vpack.c.bf16 %v760_v52, %v760_v52  ;;  %v820_v59 = vpop.permute.xlu1 %819  ;;  %v818_v60 = vpop.permute.xlu0 %817 }
  0xbf   : > { %v822_v61 = vsel %vm821_vm9, %v818_v60, %v820_v59  ;;  %v823_v62 = vsel %vm821_vm9, %v820_v59, %v818_v60 }
  0xc0   : > { %4127 = vmatmul.mubr.msk.bf16.vlgmr.msra.gmra.mrb[8].mxu0 %vm269_vm5, %v528_v47  ;;  %4130 = vmatmul.mubr.msk.bf16.vlgmr.msra.gmra.mrb[8].mxu1 %vm269_vm5, %v606_v50  ;;  %v837_v3 = vmul.f32 %v4650_v53, %v822_v61  ;;  %v838_v2 = vmul.f32 %v4653_v54, %v823_v62  ;;  %v769_v4 = vsel %vm273_vm3, %v763_v55, 0 }
  0xc1   : > { %697 = vmatpush1.bf16.msra.mxu0 %v691_v57  ;;  %4135 = vmatprep.subr.msk.bf16.mxu1 %vm273_vm3, %v764_v56 }
  0xc2   : > { %v841_v10 = vpack.c.bf16 %v837_v3, %v837_v3  ;;  %v842_v11 = vpack.c.bf16 %v838_v2, %v838_v2  ;;  %728 = vmatprep.mubr.bf16.mxu0 %v4362_v1  ;;  %775 = vmatpush1.bf16.msra.mxu1 %v769_v4 }
  0xc3   : > { %806 = vmatprep.mubr.bf16.mxu1 %v4362_v1 }
  0xc4   : > { %4138 = vmatprep.subr.msk.bf16.mxu0 %vm273_vm3, %v842_v11  ;;  %v847_v18 = vsel %vm273_vm3, %v841_v10, 0 }
  0xc8   : > { %4133 = vmatmul.mubr.msk.bf16.vlgmr.msra.gmra.mrb[12].mxu0 %vm269_vm5, %v684_v12  ;;  %4136 = vmatmul.mubr.msk.bf16.vlgmr.msra.gmra.mrb[12].mxu1 %vm269_vm5, %v762_v13 }
  0xc9   : > { %853 = vmatpush1.bf16.msra.mxu0 %v847_v18  ;;  %884 = vmatprep.mubr.bf16.mxu0 %v4362_v1 }
  0xca   : > { %968 = vmatprep.mubr.bf16.mxu1 %v4362_v1 }
  0xd0   : > { %4139 = vmatmul.mubr.msk.bf16.vlgmr.msra.gmra.mrb[16].mxu0 %vm269_vm5, %v840_v23 }
  0xd1   : > { %1018 = vmatprep.mubr.bf16.mxu0 %v4362_v1 }
 0x183   : > { %v314_v0 = vpop.f32.mrb[0].mxu0  ;;  %v364_v25 = vpop.f32.mrb[0].mxu1 }
 0x184   : > { %v365_v26 = vadd.f32 %v364_v25, %v314_v0  ;;  %v316_v27 = vpop.f32.mrb[1].mxu0  ;;  %v366_v28 = vpop.f32.mrb[1].mxu1 }
 0x185   : > { %v367_v29 = vadd.f32 %v366_v28, %v316_v27  ;;  %v318_v30 = vpop.f32.mrb[2].mxu0  ;;  %v368_v31 = vpop.f32.mrb[2].mxu1 }
 0x186   : > { %v319_v32 = vpop.f32.mrb[3].mxu0  ;;  %v369_v34 = vpop.f32.mrb[3].mxu1 }
 0x187   : > { %v899_v27 = vpop.permute.xlu0 %898 }
 0x18b   : > { %v440_v35 = vpop.f32.mrb[4].mxu0  ;;  %v518_v36 = vpop.f32.mrb[4].mxu1 }
 0x18c   : > { %v447_v37 = vadd.f32 %v440_v35, %v365_v26  ;;  %v442_v39 = vpop.f32.mrb[5].mxu0  ;;  %v520_v40 = vpop.f32.mrb[5].mxu1 }
 0x18d   : > { %v448_v41 = vadd.f32 %v442_v39, %v367_v29  ;;  %v444_v42 = vpop.f32.mrb[6].mxu0  ;;  %v522_v45 = vpop.f32.mrb[6].mxu1 }
 0x18e   : > { %v525_v46 = vadd.f32 %v518_v36, %v447_v37  ;;  %v445_v47 = vpop.f32.mrb[7].mxu0  ;;  %v523_v48 = vpop.f32.mrb[7].mxu1  ;;  %v1467_v36 = vld [vmem:[%s5352_s2 + $0x8] sm:$0xff] }
 0x18f   : > { %v526_v49 = vadd.f32 %v520_v40, %v448_v41  ;;  %v923_v48 = vld [vmem:[#allocation2 + $0x50] sm:$0xff] }
 0x193   : > { %v574_v50 = vpop.f32.mrb[8].mxu0  ;;  %v652_v51 = vpop.f32.mrb[8].mxu1 }
 0x194   : > { %v581_v52 = vadd.f32 %v574_v50, %v525_v46  ;;  %v576_v55 = vpop.f32.mrb[9].mxu0  ;;  %v654_v56 = vpop.f32.mrb[9].mxu1 }
 0x195   : > { %v582_v57 = vadd.f32 %v576_v55, %v526_v49  ;;  %v578_v59 = vpop.f32.mrb[10].mxu0  ;;  %v656_v60 = vpop.f32.mrb[10].mxu1 }
 0x196   : > { %v659_v61 = vadd.f32 %v652_v51, %v581_v52  ;;  %v579_v62 = vpop.f32.mrb[11].mxu0  ;;  %v657_v3 = vpop.f32.mrb[11].mxu1 }
 0x197   : > { %v660_v2 = vadd.f32 %v654_v56, %v582_v57  ;;  %v911_v62 = vld [vmem:[#allocation2 + $0x48] sm:$0xff] }
 0x19b   : > { %v730_v4 = vpop.f32.mrb[12].mxu0  ;;  %v808_v5 = vpop.f32.mrb[12].mxu1 }
 0x19c   : > { %v737_v9 = vadd.f32 %v730_v4, %v659_v61  ;;  %v732_v10 = vpop.f32.mrb[13].mxu0  ;;  %v810_v11 = vpop.f32.mrb[13].mxu1  ;;  %v924_v61 = vpack.c.bf16 %v923_v48, %v923_v48 }
 0x19d   : > { %v738_v12 = vadd.f32 %v732_v10, %v660_v2  ;;  %v734_v13 = vpop.f32.mrb[14].mxu0  ;;  %v812_v18 = vpop.f32.mrb[14].mxu1 }
 0x19e   : > { %v815_v22 = vadd.f32 %v808_v5, %v737_v9  ;;  %v735_v23 = vpop.f32.mrb[15].mxu0  ;;  %v813_v0 = vpop.f32.mrb[15].mxu1  ;;  %v912_v18 = vpack.c.bf16 %v911_v62, %v911_v62 }
 0x19f   : > { %v816_v25 = vadd.f32 %v810_v11, %v738_v12 }
 0x1a3   : > { %v886_v26 = vpop.f32.mrb[16].mxu0 }
 0x1a4   : > { %v893_v28 = vadd.f32 %v886_v26, %v815_v22  ;;  %v888_v29 = vpop.f32.mrb[17].mxu0  ;;  %v1035_v22 = vld [vmem:[#allocation2 + $0x58] sm:$0xff] }
 0x1a5   : > { %v894_v30 = vadd.f32 %v888_v29, %v816_v25  ;;  %v890_v31 = vpop.f32.mrb[18].mxu0 }
 0x1a6   : > { %v4676_v32 = vadd.f32 %v899_v27, %v893_v28  ;;  %v891_v34 = vpop.f32.mrb[19].mxu0 }
 0x1a7   : > { %v4682_v35 = vadd.f32 %v899_v27, %v894_v30 }
 0x1a8   : > { %903 = vrot.lane.b32.xlu0 %v4676_v32, %s4363_s11  ;;  %915 = vrot.lane.b32.xlu1 %v4676_v32, %s4364_s12  ;;  %v1157_v29 = vpack.c.bf16 %v4676_v32, %v4676_v32 }
 0x1a9   : > { %v1158_v28 = vpack.c.bf16 %v4682_v35, %v4682_v35 }
 0x1ac   : > { %1027 = vrot.lane.b32.xlu0 %v4676_v32, %s4365_s13  ;;  %917 = vrot.lane.b32.xlu1 %v4682_v35, %s4364_s12 }
 0x1b0   : > { %1091 = vrot.lane.b32.xlu0 %v4676_v32, %s4366_s14  ;;  %905 = vrot.lane.b32.xlu1 %v4682_v35, %s4363_s11 }
 0x1b4   : > { %1211 = vrot.lane.b32.xlu0 %v4676_v32, %s4367_s17  ;;  %1029 = vrot.lane.b32.xlu1 %v4682_v35, %s4365_s13 }
 0x1b8   : > { %1275 = vrot.lane.b32.xlu0 %v4676_v32, %s4368_s18  ;;  %1093 = vrot.lane.b32.xlu1 %v4682_v35, %s4366_s14 }
 0x1bc   : > { %1339 = vrot.lane.b32.xlu0 %v4676_v32, %s4369_s19  ;;  %1213 = vrot.lane.b32.xlu1 %v4682_v35, %s4367_s17 }
 0x1c0   : > { %1403 = vrot.lane.b32.xlu0 %v4676_v32, %s4370_s20  ;;  %1277 = vrot.lane.b32.xlu1 %v4682_v35, %s4368_s18 }
 0x1c4   : > { %1470 = vperm.xlu0 %4317, %v1467_v36   ;;  %1341 = vrot.lane.b32.xlu1 %v4682_v35, %s4369_s19  ;;  %v1036_v36 = vpack.c.bf16 %v1035_v22, %v1035_v22 }
 0x1c8   : > { %1405 = vrot.lane.b32.xlu1 %v4682_v35, %s4370_s20 }
 0x21a   : > { %v904_v37 = vpop.permute.xlu0 %903  ;;  %v916_v39 = vpop.permute.xlu1 %915 }
 0x21e   : > { %v1028_v40 = vpop.permute.xlu0 %1027  ;;  %v918_v41 = vpop.permute.xlu1 %917 }
 0x21f   : > { %v919_v42 = vsel %vm247_vm1, %v916_v39, %v918_v41  ;;  %v920_v45 = vsel %vm247_vm1, %v918_v41, %v916_v39 }
 0x220   : > { %v921_v46 = vmul.f32 %v920_v45, %v4526_v16  ;;  %v922_v47 = vmul.f32 %v919_v42, %v4523_v15  ;;  %v1163_v45 = vsel %vm273_vm3, %v1157_v29, 0 }
 0x222   : > { %v925_v49 = vpack.c.bf16 %v921_v46, %v921_v46  ;;  %v926_v50 = vpack.c.bf16 %v922_v47, %v922_v47  ;;  %v1092_v51 = vpop.permute.xlu0 %1091  ;;  %v906_v52 = vpop.permute.xlu1 %905 }
 0x223   : > { %v907_v55 = vsel %vm222_vm0, %v904_v37, %v906_v52  ;;  %v908_v56 = vsel %vm222_vm0, %v906_v52, %v904_v37  ;;  %v1099_v37 = vld [vmem:[#allocation2 + $0x60] sm:$0xff] }
 0x224   : > { %v909_v57 = vmul.f32 %v908_v56, %v4529_v17  ;;  %v910_v59 = vmul.f32 %v907_v55, %v4520_v14  ;;  %4140 = vmatprep.subr.msk.bf16.mxu1 %vm273_vm3, %v926_v50  ;;  %v931_v60 = vsel %vm273_vm3, %v925_v49, 0  ;;  %v1100_v49 = vpack.c.bf16 %v1099_v37, %v1099_v37  ;;  %v1155_v50 = vld [vmem:[#allocation2 + $0x68] sm:$0xff]  ;;  %v1347_v37 = vld [vmem:[#allocation2 + $0x80] sm:$0xff] }
 0x225   : > { %937 = vmatpush1.bf16.msra.mxu1 %v931_v60 }
 0x226   : > { %v913_v3 = vpack.c.bf16 %v909_v57, %v909_v57  ;;  %v914_v2 = vpack.c.bf16 %v910_v59, %v910_v59  ;;  %v1030_v4 = vpop.permute.xlu1 %1029  ;;  %v1212_v10 = vpop.permute.xlu0 %1211 }
 0x227   : > { %v1031_v5 = vsel %vm375_vm2, %v1028_v40, %v1030_v4  ;;  %v1032_v9 = vsel %vm375_vm2, %v1030_v4, %v1028_v40 }
 0x228   : > { %v1033_v11 = vmul.f32 %v1032_v9, %v4533_v20  ;;  %v1034_v12 = vmul.f32 %v1031_v5, %v4536_v21  ;;  %4141 = vmatmul.mubr.msk.bf16.vlgmr.msra.gmra.mrb[16].mxu1 %vm269_vm5, %v924_v61  ;;  %4142 = vmatprep.subr.msk.bf16.mxu0 %vm273_vm3, %v914_v2  ;;  %v981_v13 = vsel %vm273_vm3, %v913_v3, 0  ;;  %v1156_v3 = vpack.c.bf16 %v1155_v50, %v1155_v50  ;;  %v1219_v2 = vld [vmem:[#allocation2 + $0x70] sm:$0xff] }
 0x229   : > { %987 = vmatpush1.bf16.msra.mxu0 %v981_v13  ;;  %1080 = vmatprep.mubr.bf16.mxu1 %v4362_v1  ;;  %v1220_v22 = vpack.c.bf16 %v1219_v2, %v1219_v2 }
 0x22a   : > { %v1037_v23 = vpack.c.bf16 %v1033_v11, %v1033_v11  ;;  %v1038_v0 = vpack.c.bf16 %v1034_v12, %v1034_v12  ;;  %v1094_v25 = vpop.permute.xlu1 %1093  ;;  %v1276_v39 = vpop.permute.xlu0 %1275 }
 0x22b   : > { %v1095_v26 = vsel %vm453_vm4, %v1092_v51, %v1094_v25  ;;  %v1096_v27 = vsel %vm453_vm4, %v1094_v25, %v1092_v51 }
 0x22c   : > { %v1097_v30 = vmul.f32 %v1096_v27, %v4559_v43  ;;  %v1098_v31 = vmul.f32 %v1095_v26, %v4562_v44  ;;  %4143 = vmatmul.mubr.msk.bf16.vlgmr.msra.gmra.mrb[20].mxu0 %vm269_vm5, %v912_v18  ;;  %4144 = vmatprep.subr.msk.bf16.mxu1 %vm273_vm3, %v1038_v0  ;;  %v1043_v34 = vsel %vm273_vm3, %v1037_v23, 0  ;;  %v1283_v23 = vld [vmem:[#allocation2 + $0x78] sm:$0xff] }
 0x22d   : > { %1049 = vmatpush1.bf16.msra.mxu1 %v1043_v34  ;;  %1144 = vmatprep.mubr.bf16.mxu0 %v4362_v1 }
 0x22e   : > { %v1101_v35 = vpack.c.bf16 %v1097_v30, %v1097_v30  ;;  %v1102_v40 = vpack.c.bf16 %v1098_v31, %v1098_v31  ;;  %v1214_v41 = vpop.permute.xlu1 %1213  ;;  %4148 = vmatprep.subr.msk.bf16.mxu1 %vm273_vm3, %v1158_v28  ;;  %v1340_v59 = vpop.permute.xlu0 %1339 }
 0x22f   : > { %v1215_v32 = vsel %vm587_vm6, %v1212_v10, %v1214_v41  ;;  %v1216_v42 = vsel %vm587_vm6, %v1214_v41, %v1212_v10  ;;  %v1348_v41 = vpack.c.bf16 %v1347_v37, %v1347_v37 }
 0x230   : > { %v1217_v46 = vmul.f32 %v1215_v32, %v4579_v58  ;;  %v1218_v47 = vmul.f32 %v1216_v42, %v4589_v63  ;;  %4145 = vmatmul.mubr.msk.bf16.vlgmr.msra.gmra.mrb[20].mxu1 %vm269_vm5, %v1036_v36  ;;  %4146 = vmatprep.subr.msk.bf16.mxu0 %vm273_vm3, %v1102_v40  ;;  %v1107_v48 = vsel %vm273_vm3, %v1101_v35, 0  ;;  %v1284_v36 = vpack.c.bf16 %v1283_v23, %v1283_v23  ;;  %v1411_v32 = vld [vmem:[#allocation2 + $0x88] sm:$0xff] }
 0x231   : > { %1113 = vmatpush1.bf16.msra.mxu0 %v1107_v48  ;;  %1169 = vmatpush1.bf16.msra.mxu1 %v1163_v45  ;;  %v1412_v42 = vpack.c.bf16 %v1411_v32, %v1411_v32 }
 0x232   : > { %v1221_v51 = vpack.c.bf16 %v1217_v46, %v1217_v46  ;;  %v1222_v52 = vpack.c.bf16 %v1218_v47, %v1218_v47  ;;  %v1278_v55 = vpop.permute.xlu1 %1277  ;;  %1200 = vmatprep.mubr.bf16.mxu1 %v4362_v1  ;;  %v1404_v0 = vpop.permute.xlu0 %1403 }
 0x233   : > { %v1279_v56 = vsel %vm665_vm7, %v1276_v39, %v1278_v55  ;;  %v1280_v57 = vsel %vm665_vm7, %v1278_v55, %v1276_v39 }
 0x234   : > { %v1281_v60 = vmul.f32 %v1279_v56, %v4606_v19  ;;  %v1282_v61 = vmul.f32 %v1280_v57, %v4613_v24  ;;  %4147 = vmatmul.mubr.msk.bf16.vlgmr.msra.gmra.mrb[24].mxu0 %vm269_vm5, %v1100_v49  ;;  %4150 = vmatprep.subr.msk.bf16.mxu0 %vm273_vm3, %v1222_v52  ;;  %v1227_v62 = vsel %vm273_vm3, %v1221_v51, 0 }
 0x235   : > { %1233 = vmatpush1.bf16.msra.mxu0 %v1227_v62  ;;  %1264 = vmatprep.mubr.bf16.mxu0 %v4362_v1 }
 0x236   : > { %v1285_v4 = vpack.c.bf16 %v1281_v60, %v1281_v60  ;;  %v1286_v5 = vpack.c.bf16 %v1282_v61, %v1282_v61  ;;  %v1342_v9 = vpop.permute.xlu1 %1341 }
 0x237   : > { %v1343_v10 = vsel %vm743_vm8, %v1340_v59, %v1342_v9  ;;  %v1344_v11 = vsel %vm743_vm8, %v1342_v9, %v1340_v59 }
 0x238   : > { %v1345_v12 = vmul.f32 %v1343_v10, %v4625_v33  ;;  %v1346_v13 = vmul.f32 %v1344_v11, %v4633_v38  ;;  %4149 = vmatmul.mubr.msk.bf16.vlgmr.msra.gmra.mrb[24].mxu1 %vm269_vm5, %v1156_v3  ;;  %4152 = vmatprep.subr.msk.bf16.mxu1 %vm273_vm3, %v1286_v5  ;;  %v1291_v18 = vsel %vm273_vm3, %v1285_v4, 0 }
 0x239   : > { %1297 = vmatpush1.bf16.msra.mxu1 %v1291_v18  ;;  %1328 = vmatprep.mubr.bf16.mxu1 %v4362_v1 }
 0x23a   : > { %v1349_v25 = vpack.c.bf16 %v1345_v12, %v1345_v12  ;;  %v1350_v26 = vpack.c.bf16 %v1346_v13, %v1346_v13  ;;  %v1406_v27 = vpop.permute.xlu1 %1405 }
 0x23b   : > { %v1407_v28 = vsel %vm821_vm9, %v1404_v0, %v1406_v27  ;;  %v1408_v29 = vsel %vm821_vm9, %v1406_v27, %v1404_v0 }
 0x23c   : > { %v1409_v30 = vmul.f32 %v1407_v28, %v4650_v53  ;;  %v1410_v31 = vmul.f32 %v1408_v29, %v4653_v54  ;;  %4151 = vmatmul.mubr.msk.bf16.vlgmr.msra.gmra.mrb[28].mxu0 %vm269_vm5, %v1220_v22  ;;  %4154 = vmatprep.subr.msk.bf16.mxu0 %vm273_vm3, %v1350_v26  ;;  %v1355_v34 = vsel %vm273_vm3, %v1349_v25, 0 }
 0x23d   : > { %1361 = vmatpush1.bf16.msra.mxu0 %v1355_v34  ;;  %1392 = vmatprep.mubr.bf16.mxu0 %v4362_v1 }
 0x23e   : > { %v1413_v39 = vpack.c.bf16 %v1409_v30, %v1409_v30  ;;  %v1414_v35 = vpack.c.bf16 %v1410_v31, %v1410_v31 }
 0x240   : > { %4153 = vmatmul.mubr.msk.bf16.vlgmr.msra.gmra.mrb[28].mxu1 %vm269_vm5, %v1284_v36  ;;  %4156 = vmatprep.subr.msk.bf16.mxu1 %vm273_vm3, %v1414_v35  ;;  %v1419_v40 = vsel %vm273_vm3, %v1413_v39, 0 }
 0x241   : > { %1425 = vmatpush1.bf16.msra.mxu1 %v1419_v40  ;;  %1456 = vmatprep.mubr.bf16.mxu1 %v4362_v1 }
 0x244   : > { %4155 = vmatmul.mubr.msk.bf16.vlgmr.msra.gmra.mrb[32].mxu0 %vm269_vm5, %v1348_v41 }
 0x245   : > { %1534 = vmatprep.mubr.bf16.mxu0 %v4362_v1 }
 0x248   : > { %4157 = vmatmul.mubr.msk.bf16.vlgmr.msra.gmra.mrb[32].mxu1 %vm269_vm5, %v1412_v42 }
 0x249   : > { %1857 = vmatprep.mubr.bf16.mxu1 %v4362_v1 }
 0x2fb   : > { %v970_v45 = vpop.f32.mrb[16].mxu1 }
 0x2fc   : > { %v972_v46 = vpop.f32.mrb[17].mxu1 }
 0x2fd   : > { %v974_v47 = vpop.f32.mrb[18].mxu1 }
 0x2fe   : > { %v975_v48 = vpop.f32.mrb[19].mxu1 }
 0x2ff   : > { %v1020_v49 = vpop.f32.mrb[20].mxu0 }
 0x300   : > { %v1021_v50 = vadd.f32 %v1020_v49, %v970_v45  ;;  %v1022_v51 = vpop.f32.mrb[21].mxu0 }
 0x301   : > { %v1023_v52 = vadd.f32 %v1022_v51, %v972_v46  ;;  %v1024_v55 = vpop.f32.mrb[22].mxu0 }
 0x302   : > { %v1025_v56 = vpop.f32.mrb[23].mxu0 }
 0x303   : > { %v1082_v57 = vpop.f32.mrb[20].mxu1 }
 0x304   : > { %v1089_v59 = vadd.f32 %v1082_v57, %v1021_v50  ;;  %v1084_v60 = vpop.f32.mrb[21].mxu1  ;;  %v1471_v50 = vpop.permute.xlu0 %1470 }
 0x305   : > { %v1090_v61 = vadd.f32 %v1084_v60, %v1023_v52  ;;  %v1086_v62 = vpop.f32.mrb[22].mxu1 }
 0x306   : > { %v1087_v3 = vpop.f32.mrb[23].mxu1  ;;  %v1731_v62 = vld [vmem:[%s5352_s2 + $0x10] sm:$0xff] }
 0x307   : > { %v1146_v2 = vpop.f32.mrb[24].mxu0 }
 0x308   : > { %v1153_v4 = vadd.f32 %v1146_v2, %v1089_v59  ;;  %v1148_v5 = vpop.f32.mrb[25].mxu0 }
 0x309   : > { %v1154_v9 = vadd.f32 %v1148_v5, %v1090_v61  ;;  %v1150_v10 = vpop.f32.mrb[26].mxu0  ;;  %v1732_v61 = vld [vmem:[%s5352_s2 + $0x18] sm:$0xff] }
 0x30a   : > { %v1151_v11 = vpop.f32.mrb[27].mxu0  ;;  %v1489_v10 = vld [vmem:[#allocation2 + $0xa8] sm:$0xff] }
 0x30b   : > { %v1202_v12 = vpop.f32.mrb[24].mxu1 }
 0x30c   : > { %v1209_v13 = vadd.f32 %v1202_v12, %v1153_v4  ;;  %v1204_v18 = vpop.f32.mrb[25].mxu1 }
 0x30d   : > { %v1210_v22 = vadd.f32 %v1204_v18, %v1154_v9  ;;  %v1206_v23 = vpop.f32.mrb[26].mxu1  ;;  %v1488_v9 = vld [vmem:[#allocation2 + $0xa0] sm:$0xff] }
 0x30e   : > { %v1207_v0 = vpop.f32.mrb[27].mxu1 }
 0x30f   : > { %v1266_v25 = vpop.f32.mrb[28].mxu0  ;;  %v1490_v0 = vpack.c.bf16 %v1489_v10, %v1488_v9 }
 0x310   : > { %v1273_v26 = vadd.f32 %v1266_v25, %v1209_v13  ;;  %v1268_v27 = vpop.f32.mrb[29].mxu0 }
 0x311   : > { %v1274_v28 = vadd.f32 %v1268_v27, %v1210_v22  ;;  %v1270_v29 = vpop.f32.mrb[30].mxu0 }
 0x312   : > { %v1271_v30 = vpop.f32.mrb[31].mxu0 }
 0x313   : > { %v1330_v31 = vpop.f32.mrb[28].mxu1  ;;  %v1477_v30 = vld [vmem:[#allocation2 + $0x90] sm:$0xff] }
 0x314   : > { %v1337_v34 = vadd.f32 %v1330_v31, %v1273_v26  ;;  %v1332_v36 = vpop.f32.mrb[29].mxu1  ;;  %v1478_v31 = vld [vmem:[#allocation2 + $0x98] sm:$0xff] }
 0x315   : > { %v1338_v37 = vadd.f32 %v1332_v36, %v1274_v28  ;;  %v1334_v39 = vpop.f32.mrb[30].mxu1 }
 0x316   : > { %v1335_v35 = vpop.f32.mrb[31].mxu1  ;;  %v1479_v39 = vpack.c.bf16 %v1478_v31, %v1477_v30  ;;  %v2769_v30 = vld [vmem:[%s5352_s2 + $0x30] sm:$0xff] }
 0x317   : > { %v1394_v40 = vpop.f32.mrb[32].mxu0 }
 0x318   : > { %v1401_v41 = vadd.f32 %v1394_v40, %v1337_v34  ;;  %v1396_v32 = vpop.f32.mrb[33].mxu0 }
 0x319   : > { %v1402_v42 = vadd.f32 %v1396_v32, %v1338_v37  ;;  %v1398_v45 = vpop.f32.mrb[34].mxu0 }
 0x31a   : > { %v1399_v46 = vpop.f32.mrb[35].mxu0  ;;  %v1604_v45 = vld [vmem:[#allocation2 + $0xb8] sm:$0xff] }
 0x31b   : > { %v1458_v47 = vpop.f32.mrb[32].mxu1 }
 0x31c   : > { %v1465_v48 = vadd.f32 %v1458_v47, %v1401_v41  ;;  %v1460_v49 = vpop.f32.mrb[33].mxu1 }
 0x31d   : > { %v1466_v51 = vadd.f32 %v1460_v49, %v1402_v42  ;;  %v1462_v52 = vpop.f32.mrb[34].mxu1  ;;  %v1603_v42 = vld [vmem:[#allocation2 + $0xb0] sm:$0xff]  ;;  %v1670_v49 = vld [vmem:[#allocation2 + $0xc0] sm:$0xff] }
 0x31e   : > { %v1473_v55 = vadd.f32 %v1471_v50, %v1465_v48  ;;  %v1463_v56 = vpop.f32.mrb[35].mxu1  ;;  %v1605_v47 = vpack.c.bf16 %v1604_v45, %v1603_v42 }
 0x31f   : > { %v1474_v57 = vadd.f32 %v1471_v50, %v1466_v51  ;;  %v1671_v50 = vld [vmem:[#allocation2 + $0xc8] sm:$0xff] }
 0x320   : > { %v4803_v59 = vmax.f32 %v1473_v55, 0.0  ;;  %v1672_v51 = vpack.c.bf16 %v1671_v50, %v1670_v49 }
 0x321   : > { %v4805_v60 = vmax.f32 %v1474_v57, 0.0 }
 0x322   : > { %1482 = vrot.lane.b32.xlu1 %v4803_v59, %s4367_s17  ;;  %v1480_v25 = vpack.c.bf16 %v4803_v59, %v4803_v59 }
 0x323   : > { %1484 = vrot.lane.b32.xlu0 %v4805_v60, %s4367_s17  ;;  %v4841_v23 = vpack.c.bf16 %v4805_v60, %v4805_v60 }
 0x324   : > { %v4855_v28 = vsel %vm273_vm3, %v1480_v25, 0  ;;  %v2479_v25 = vld [vmem:[%s5352_s2 + $0x20] sm:$0xff] }
 0x326   : > { %1597 = vrot.lane.b32.xlu1 %v4803_v59, %s4369_s19 }
 0x327   : > { %1599 = vrot.lane.b32.xlu0 %v4805_v60, %s4369_s19 }
 0x32a   : > { %1664 = vrot.lane.b32.xlu1 %v4803_v59, %s4370_s20 }
 0x32b   : > { %1666 = vrot.lane.b32.xlu0 %v4805_v60, %s4370_s20 }
 0x32e   : > { %1735 = vperm.xlu1 %4318, %v1731_v62  }
 0x32f   : > { %1740 = vperm.xlu0 %4317, %v1732_v61  }
 0x394   : > { %v1483_v3 = vpop.permute.xlu1 %1482 }
 0x395   : > { %v1485_v2 = vpop.permute.xlu0 %1484 }
 0x396   : > { %v4827_v4 = vsel %vm587_vm6, %v1483_v3, %v1485_v2  ;;  %v4831_v5 = vsel %vm587_vm6, %v1485_v2, %v1483_v3 }
 0x397   : > { %v1491_v11 = vpack.c.bf16 %v4827_v4, %v4827_v4  ;;  %v1492_v12 = vpack.c.bf16 %v4831_v5, %v4831_v5 }
 0x398   : > { %v1598_v13 = vpop.permute.xlu1 %1597 }
 0x399   : > { %v1600_v18 = vpop.permute.xlu0 %1599  ;;  %4158 = vmatprep.subr.msk.bf16.mxu0 %vm273_vm3, %v1492_v12  ;;  %v1497_v22 = vsel %vm273_vm3, %v1491_v11, 0 }
 0x39a   : > { %v4847_v26 = vsel %vm743_vm8, %v1600_v18, %v1598_v13  ;;  %1503 = vmatpush1.bf16.msra.mxu0 %v1497_v22  ;;  %v4862_v29 = vsel %vm743_vm8, %v1598_v13, %v1600_v18 }
 0x39b   : > { %4160 = vmatprep.subr.msk.bf16.mxu0 %vm273_vm3, %v4841_v23  ;;  %v1607_v27 = vpack.c.bf16 %v4847_v26, %v4847_v26  ;;  %v1606_v37 = vpack.c.bf16 %v4862_v29, %v4862_v29 }
 0x39c   : > { %v1665_v34 = vpop.permute.xlu1 %1664 }
 0x39d   : > { %4159 = vmatmul.mubr.msk.bf16.vlgmr.msra.gmra.mrb[36].mxu0 %vm269_vm5, %v1490_v0  ;;  %v1667_v36 = vpop.permute.xlu0 %1666  ;;  %v1612_v41 = vsel %vm273_vm3, %v1606_v37, 0 }
 0x39e   : > { %1555 = vmatpush1.bf16.msra.mxu0 %v4855_v28  ;;  %1586 = vmatprep.mubr.bf16.mxu0 %v4362_v1  ;;  %v4868_v35 = vsel %vm821_vm9, %v1667_v36, %v1665_v34  ;;  %v4878_v32 = vsel %vm821_vm9, %v1665_v34, %v1667_v36  ;;  %v4167_v34 = vld [vmem:[%s5353_s3 + $0x12] sm:$0x3] }
 0x39f   : > { %4162 = vmatprep.subr.msk.bf16.mxu0 %vm273_vm3, %v1607_v27  ;;  %v1674_v40 = vpack.c.bf16 %v4868_v35, %v4868_v35  ;;  %v1673_v46 = vpack.c.bf16 %v4878_v32, %v4878_v32  ;;  %v2480_v27 = vld [vmem:[%s5352_s2 + $0x28] sm:$0xff]  ;;  %v1805_v37 = vrot.slane %v4167_v34, %v4504_v7 }
 0x3a1   : > { %v1679_v48 = vsel %vm273_vm3, %v1673_v46, 0 }
 0x3a9   : > { %4161 = vmatmul.mubr.msk.bf16.vlgmr.msra.gmra.mrb[36].mxu0 %vm269_vm5, %v1479_v39  ;;  %v1809_v39 = vrot.slane %v4167_v34, %v4506_v8 }
 0x3aa   : > { %1618 = vmatpush1.bf16.msra.mxu0 %v1612_v41  ;;  %1649 = vmatprep.mubr.bf16.mxu0 %v4362_v1 }
 0x3ab   : > { %4164 = vmatprep.subr.msk.bf16.mxu0 %vm273_vm3, %v1674_v40 }
 0x3ad   : > { %v1736_v52 = vpop.permute.xlu1 %1735 }
 0x3ae   : > { %v1741_v61 = vpop.permute.xlu0 %1740 }
 0x3b5   : > { %4163 = vmatmul.mubr.msk.bf16.vlgmr.msra.gmra.mrb[36].mxu0 %vm269_vm5, %v1605_v47 }
 0x3b6   : > { %1685 = vmatpush1.bf16.msra.mxu0 %v1679_v48  ;;  %1716 = vmatprep.mubr.bf16.mxu0 %v4362_v1 }
 0x3c1   : > { %4165 = vmatmul.mubr.msk.bf16.vlgmr.msra.gmra.mrb[36].mxu0 %vm269_vm5, %v1672_v51 }
 0x3c2   : > { %2538 = vmatprep.mubr.bf16.mxu0 %v4362_v1 }
 0x494   : > { %v1718_v55 = vpop.f32.mrb[36].mxu0 }
 0x495   : > { %v1743_v56 = vadd.f32 %v1736_v52, %v1718_v55  ;;  %v1720_v57 = vpop.f32.mrb[37].mxu0  ;;  %v4166_v55 = vld [vmem:[%s5353_s3 + $0x10] sm:$0x3] }
 0x496   : > { %v1744_v62 = vadd.f32 %v1736_v52, %v1720_v57  ;;  %v1722_v3 = vpop.f32.mrb[38].mxu0  ;;  %v1817_v57 = vld [vmem:[#allocation2 + $0xe8] sm:$0xff] }
 0x497   : > { %v4887_v2 = vmax.f32 %v1743_v56, 0.0  ;;  %v1745_v9 = vadd.f32 %v1741_v61, %v1722_v3  ;;  %v1724_v10 = vpop.f32.mrb[39].mxu0  ;;  %v1816_v56 = vld [vmem:[#allocation2 + $0xe0] sm:$0xff] }
 0x498   : > { %v1746_v11 = vadd.f32 %v1741_v61, %v1724_v10  ;;  %v4892_v13 = vmax.f32 %v1744_v62, 0.0  ;;  %v1774_v10 = vrot.slane %v4166_v55, %v4506_v8 }
 0x499   : > { %v4889_v12 = vmax.f32 %v1745_v9, 0.0  ;;  %1786 = vrot.lane.b32.xlu1 %v4887_v2, %s4371_s30  ;;  %v1770_v9 = vrot.slane %v4166_v55, %v4504_v7  ;;  %v1782_v55 = vld [vmem:[#allocation2 + $0xd8] sm:$0xff] }
 0x49a   : > { %v4894_v18 = vmax.f32 %v1746_v11, 0.0 }
 0x49b   : > { %1788 = vrot.lane.b32.xlu0 %v4889_v12, %s4371_s30  ;;  %v2087_v22 = vpack.c.bf16 %v4889_v12, %v4887_v2 }
 0x49c   : > { %v2088_v0 = vpack.c.bf16 %v4894_v18, %v4892_v13 }
 0x49d   : > { %1790 = vrot.lane.b32.xlu1 %v4892_v13, %s4371_s30 }
 0x49f   : > { %1792 = vrot.lane.b32.xlu0 %v4894_v18, %s4371_s30 }
 0x4a1   : > { %1751 = vrot.lane.b32.xlu1 %v4887_v2, %s4372_s5 }
 0x4a3   : > { %1753 = vrot.lane.b32.xlu0 %v4889_v12, %s4372_s5 }
 0x4a5   : > { %1755 = vrot.lane.b32.xlu1 %v4892_v13, %s4372_s5 }
 0x4a7   : > { %1757 = vrot.lane.b32.xlu0 %v4894_v18, %s4372_s5 }
 0x4a9   : > { %1914 = vrot.lane.b32.xlu1 %v4887_v2, %s4373_s6 }
 0x4ab   : > { %1916 = vrot.lane.b32.xlu0 %v4889_v12, %s4373_s6 }
 0x4ad   : > { %1918 = vrot.lane.b32.xlu1 %v4892_v13, %s4373_s6 }
 0x4af   : > { %1920 = vrot.lane.b32.xlu0 %v4894_v18, %s4373_s6 }
 0x4b1   : > { %1999 = vrot.lane.b32.xlu1 %v4887_v2, %s4374_s8 }
 0x4b3   : > { %2001 = vrot.lane.b32.xlu0 %v4889_v12, %s4374_s8 }
 0x4b5   : > { %2003 = vrot.lane.b32.xlu1 %v4892_v13, %s4374_s8 }
 0x4b7   : > { %2005 = vrot.lane.b32.xlu0 %v4894_v18, %s4374_s8 }
 0x4b9   : > { %2139 = vrot.lane.b32.xlu1 %v4887_v2, %s4375_s9 }
 0x4bb   : > { %2141 = vrot.lane.b32.xlu0 %v4889_v12, %s4375_s9 }
 0x4bd   : > { %2143 = vrot.lane.b32.xlu1 %v4892_v13, %s4375_s9 }
 0x4bf   : > { %2145 = vrot.lane.b32.xlu0 %v4894_v18, %s4375_s9 }
 0x4c1   : > { %2224 = vrot.lane.b32.xlu1 %v4887_v2, %s4376_s10 }
 0x4c3   : > { %2226 = vrot.lane.b32.xlu0 %v4889_v12, %s4376_s10 }
 0x4c5   : > { %2228 = vrot.lane.b32.xlu1 %v4892_v13, %s4376_s10 }
 0x4c7   : > { %2230 = vrot.lane.b32.xlu0 %v4894_v18, %s4376_s10 }
 0x4c9   : > { %2309 = vrot.lane.b32.xlu1 %v4887_v2, %s4377_s21 }
 0x4cb   : > { %2311 = vrot.lane.b32.xlu0 %v4889_v12, %s4377_s21 }
 0x4cd   : > { %2313 = vrot.lane.b32.xlu1 %v4892_v13, %s4377_s21 }
 0x4cf   : > { %2315 = vrot.lane.b32.xlu0 %v4894_v18, %s4377_s21 }
 0x4d1   : > { %2394 = vrot.lane.b32.xlu1 %v4887_v2, %s4378_s22 }
 0x4d3   : > { %2396 = vrot.lane.b32.xlu0 %v4889_v12, %s4378_s22  ;;  %v2084_v12 = vld [vmem:[#allocation2 + $0x110] sm:$0xff] }
 0x4d5   : > { %2398 = vrot.lane.b32.xlu1 %v4892_v13, %s4378_s22 }
 0x4d7   : > { %2400 = vrot.lane.b32.xlu0 %v4894_v18, %s4378_s22 }
 0x4d9   : > { %2483 = vperm.xlu1 %4318, %v2479_v25   ;;  %v1818_v25 = vpack.c.bf16 %v1817_v57, %v1816_v56 }
 0x4db   : > { %2488 = vperm.xlu0 %4317, %v2480_v27  }
 0x4dd   : > { %2772 = vperm.xlu1 %4318, %v2769_v30  }
 0x50b   : > { %v1787_v31 = vpop.permute.xlu1 %1786 }
 0x50d   : > { %v1789_v36 = vpop.permute.xlu0 %1788 }
 0x50f   : > { %v1791_v40 = vpop.permute.xlu1 %1790 }
 0x510   : > { %v1795_v41 = vsel %vm1794_vm10, %v1787_v31, %v1791_v40  ;;  %v1797_v42 = vsel %vm1794_vm10, %v1791_v40, %v1787_v31 }
 0x511   : > { %v1793_v45 = vpop.permute.xlu0 %1792  ;;  %v1812_v48 = vmul.f32 %v1805_v37, %v1797_v42  ;;  %v1813_v49 = vmul.f32 %v1809_v39, %v1795_v41 }
 0x512   : > { %v1796_v46 = vsel %vm1794_vm10, %v1789_v36, %v1793_v45  ;;  %v1798_v47 = vsel %vm1794_vm10, %v1793_v45, %v1789_v36  ;;  %v4170_v45 = vld [vmem:[%s5353_s3 + $0x14] sm:$0x3]  ;;  %vm2232_vm10 = vcmp.lt.s32.totalorder %v4502_v6, 98 }
 0x513   : > { %v1814_v50 = vmul.f32 %v1805_v37, %v1798_v47  ;;  %v1815_v51 = vmul.f32 %v1809_v39, %v1796_v46  ;;  %v1752_v52 = vpop.permute.xlu1 %1751 }
 0x515   : > { %v1819_v61 = vpack.c.bf16 %v1814_v50, %v1812_v48  ;;  %v1754_v62 = vpop.permute.xlu0 %1753  ;;  %v1820_v3 = vpack.c.bf16 %v1815_v51, %v1813_v49  ;;  %v1933_v49 = vrot.slane %v4170_v45, %v4504_v7  ;;  %v1937_v50 = vrot.slane %v4170_v45, %v4506_v8 }
 0x517   : > { %v1756_v11 = vpop.permute.xlu1 %1755  ;;  %1825 = vmatprep.subr.bf16.mxu1 %v1820_v3 }
 0x518   : > { %v1760_v27 = vsel %vm1759_vm11, %v1752_v52, %v1756_v11  ;;  %v1762_v30 = vsel %vm1759_vm11, %v1756_v11, %v1752_v52  ;;  %1826 = vmatpush1.bf16.msra.mxu1 %v1819_v61  ;;  %v1781_v52 = vld [vmem:[#allocation2 + $0xd0] sm:$0xff] }
 0x519   : > { %v1758_v31 = vpop.permute.xlu0 %1757  ;;  %v1777_v37 = vmul.f32 %v1770_v9, %v1762_v30  ;;  %v1778_v39 = vmul.f32 %v1774_v10, %v1760_v27 }
 0x51a   : > { %v1761_v34 = vsel %vm1759_vm11, %v1754_v62, %v1758_v31  ;;  %v1763_v36 = vsel %vm1759_vm11, %v1758_v31, %v1754_v62  ;;  %v4172_v31 = vld [vmem:[%s5353_s3 + $0x16] sm:$0x3]  ;;  %vm2317_vm11 = vcmp.lt.s32.totalorder %v4502_v6, 96 }
 0x51b   : > { %v1779_v40 = vmul.f32 %v1770_v9, %v1763_v36  ;;  %v1780_v41 = vmul.f32 %v1774_v10, %v1761_v34  ;;  %v1915_v42 = vpop.permute.xlu1 %1914  ;;  %4168 = vmatmul.mubr.msk.bf16.vlgmr.msra.gmra.mrb[36].mxu1 %vm1821_vm12, %v1818_v25  ;;  %v1783_v9 = vpack.c.bf16 %v1782_v55, %v1781_v52 }
 0x51c   : > { %1903 = vmatprep.mubr.bf16.mxu1 %v4362_v1 }
 0x51d   : > { %v1784_v46 = vpack.c.bf16 %v1779_v40, %v1777_v37  ;;  %v1917_v47 = vpop.permute.xlu0 %1916  ;;  %v1785_v48 = vpack.c.bf16 %v1780_v41, %v1778_v39  ;;  %v2022_v39 = vrot.slane %v4172_v31, %v4506_v8 }
 0x51f   : > { %v1919_v51 = vpop.permute.xlu1 %1918  ;;  %1871 = vmatprep.subr.bf16.mxu1 %v1785_v48 }
 0x520   : > { %v1923_v56 = vsel %vm1922_vm13, %v1915_v42, %v1919_v51  ;;  %v1925_v57 = vsel %vm1922_vm13, %v1919_v51, %v1915_v42  ;;  %1872 = vmatpush1.bf16.msra.mxu1 %v1784_v46  ;;  %v1945_v51 = vld [vmem:[#allocation2 + $0xf8] sm:$0xff] }
 0x521   : > { %v1921_v61 = vpop.permute.xlu0 %1920  ;;  %v1940_v10 = vmul.f32 %v1933_v49, %v1925_v57  ;;  %v1941_v11 = vmul.f32 %v1937_v50, %v1923_v56 }
 0x522   : > { %v1924_v62 = vsel %vm1922_vm13, %v1917_v47, %v1921_v61  ;;  %v1926_v3 = vsel %vm1922_vm13, %v1921_v61, %v1917_v47  ;;  %vm2402_vm13 = vcmp.lt.s32.totalorder %v4502_v6, 94 }
 0x523   : > { %v1942_v25 = vmul.f32 %v1933_v49, %v1926_v3  ;;  %v1943_v27 = vmul.f32 %v1937_v50, %v1924_v62  ;;  %v2000_v30 = vpop.permute.xlu1 %1999  ;;  %v2018_v49 = vrot.slane %v4172_v31, %v4504_v7  ;;  %v1944_v50 = vld [vmem:[#allocation2 + $0xf0] sm:$0xff]  ;;  %v2030_v31 = vld [vmem:[#allocation2 + $0x108] sm:$0xff] }
 0x524   : > { %v1946_v61 = vpack.c.bf16 %v1945_v51, %v1944_v50 }
 0x525   : > { %v1947_v34 = vpack.c.bf16 %v1942_v25, %v1940_v10  ;;  %v2002_v36 = vpop.permute.xlu0 %2001  ;;  %v1948_v37 = vpack.c.bf16 %v1943_v27, %v1941_v11  ;;  %v4175_v11 = vld [vmem:[%s5353_s3 + $0x18] sm:$0x3] }
 0x527   : > { %v2004_v40 = vpop.permute.xlu1 %2003  ;;  %4169 = vmatmul.mubr.msk.bf16.vlgmr.msra.gmra.mrb[36].mxu1 %vm1821_vm12, %v1783_v9  ;;  %1952 = vmatprep.subr.bf16.mxu1 %v1948_v37 }
 0x528   : > { %v2008_v41 = vsel %vm2007_vm14, %v2000_v30, %v2004_v40  ;;  %1953 = vmatpush1.bf16.msra.mxu1 %v1947_v34  ;;  %1984 = vmatprep.mubr.bf16.mxu1 %v4362_v1  ;;  %v2010_v52 = vsel %vm2007_vm14, %v2004_v40, %v2000_v30  ;;  %v2029_v30 = vld [vmem:[#allocation2 + $0x100] sm:$0xff]  ;;  %v2162_v34 = vrot.slane %v4175_v11, %v4506_v8 }
 0x529   : > { %v2006_v42 = vpop.permute.xlu0 %2005  ;;  %v2026_v46 = vmul.f32 %v2022_v39, %v2008_v41  ;;  %v2025_v62 = vmul.f32 %v2018_v49, %v2010_v52  ;;  %v2031_v18 = vpack.c.bf16 %v2030_v31, %v2029_v30 }
 0x52a   : > { %v2009_v45 = vsel %vm2007_vm14, %v2002_v36, %v2006_v42  ;;  %v2011_v47 = vsel %vm2007_vm14, %v2006_v42, %v2002_v36  ;;  %v4177_v42 = vld [vmem:[%s5353_s3 + $0x1a] sm:$0x3] }
 0x52b   : > { %v2028_v48 = vmul.f32 %v2022_v39, %v2009_v45  ;;  %v2027_v56 = vmul.f32 %v2018_v49, %v2011_v47  ;;  %v2140_v3 = vpop.permute.xlu1 %2139  ;;  %v2158_v47 = vrot.slane %v4175_v11, %v4504_v7  ;;  %v2247_v49 = vrot.slane %v4177_v42, %v4506_v8  ;;  %v4179_v11 = vld [vmem:[%s5353_s3 + $0x1c] sm:$0x3] }
 0x52c   : > { %v2243_v30 = vrot.slane %v4177_v42, %v4504_v7 }
 0x52d   : > { %v2033_v55 = vpack.c.bf16 %v2028_v48, %v2026_v46  ;;  %v2142_v57 = vpop.permute.xlu0 %2141  ;;  %v2032_v9 = vpack.c.bf16 %v2027_v56, %v2025_v62 }
 0x52f   : > { %2037 = vmatprep.subr.bf16.mxu1 %v2033_v55  ;;  %v2144_v25 = vpop.permute.xlu1 %2143 }
 0x530   : > { %v2150_v36 = vsel %vm2147_vm15, %v2144_v25, %v2140_v3  ;;  %v2148_v48 = vsel %vm2147_vm15, %v2140_v3, %v2144_v25 }
 0x531   : > { %v2146_v10 = vpop.permute.xlu0 %2145 }
 0x532   : > { %v2151_v27 = vsel %vm2147_vm15, %v2146_v10, %v2142_v57  ;;  %v2149_v45 = vsel %vm2147_vm15, %v2142_v57, %v2146_v10  ;;  %v2165_v57 = vmul.f32 %v2158_v47, %v2148_v48 }
 0x533   : > { %4171 = vmatmul.mubr.msk.bf16.vlgmr.msra.gmra.mrb[36].mxu1 %vm1821_vm12, %v1946_v61  ;;  %v2168_v37 = vmul.f32 %v2162_v34, %v2151_v27  ;;  %v2225_v39 = vpop.permute.xlu1 %2224  ;;  %v2167_v50 = vmul.f32 %v2158_v47, %v2149_v45 }
 0x534   : > { %2038 = vmatpush1.bf16.msra.mxu1 %v2032_v9  ;;  %2069 = vmatprep.mubr.bf16.mxu1 %v4362_v1 }
 0x535   : > { %2092 = vmatprep.subr.bf16.mxu1 %v2088_v0  ;;  %v2227_v13 = vpop.permute.xlu0 %2226  ;;  %v2166_v0 = vmul.f32 %v2162_v34, %v2150_v36  ;;  %v2172_v9 = vpack.c.bf16 %v2167_v50, %v2165_v57  ;;  %v2169_v34 = vld [vmem:[#allocation2 + $0x120] sm:$0xff]  ;;  %v2170_v36 = vld [vmem:[#allocation2 + $0x128] sm:$0xff]  ;;  %v2328_v50 = vrot.slane %v4179_v11, %v4504_v7 }
 0x536   : > { %v2171_v45 = vpack.c.bf16 %v2170_v36, %v2169_v34  ;;  %v2339_v34 = vld [vmem:[#allocation2 + $0x140] sm:$0xff]  ;;  %v2340_v36 = vld [vmem:[#allocation2 + $0x148] sm:$0xff] }
 0x537   : > { %v2173_v40 = vpack.c.bf16 %v2168_v37, %v2166_v0  ;;  %v2229_v46 = vpop.permute.xlu1 %2228 }
 0x538   : > { %v2235_v51 = vsel %vm2232_vm10, %v2229_v46, %v2225_v39  ;;  %v2233_v37 = vsel %vm2232_vm10, %v2225_v39, %v2229_v46  ;;  %v4181_v46 = vld [vmem:[%s5353_s3 + $0x1e] sm:$0x3] }
 0x539   : > { %v2231_v41 = vpop.permute.xlu0 %2230  ;;  %v2251_v61 = vmul.f32 %v2247_v49, %v2235_v51  ;;  %v2250_v47 = vmul.f32 %v2243_v30, %v2233_v37 }
 0x53a   : > { %v2236_v2 = vsel %vm2232_vm10, %v2231_v41, %v2227_v13  ;;  %v2234_v25 = vsel %vm2232_vm10, %v2227_v13, %v2231_v41 }
 0x53b   : > { %v2253_v52 = vmul.f32 %v2247_v49, %v2236_v2  ;;  %v2310_v62 = vpop.permute.xlu1 %2309  ;;  %v2252_v0 = vmul.f32 %v2243_v30, %v2234_v25 }
 0x53d   : > { %v2312_v55 = vpop.permute.xlu0 %2311  ;;  %v2258_v10 = vpack.c.bf16 %v2253_v52, %v2251_v61  ;;  %v2254_v52 = vld [vmem:[#allocation2 + $0x130] sm:$0xff]  ;;  %v2417_v61 = vrot.slane %v4181_v46, %v4506_v8 }
 0x53f   : > { %4173 = vmatmul.mubr.msk.bf16.vlgmr.msra.gmra.mrb[36].mxu1 %vm1821_vm12, %v2031_v18  ;;  %v2314_v27 = vpop.permute.xlu1 %2313  ;;  %v2332_v18 = vrot.slane %v4179_v11, %v4506_v8 }
 0x540   : > { %2093 = vmatpush1.bf16.msra.mxu1 %v2087_v22  ;;  %2124 = vmatprep.mubr.bf16.mxu1 %v4362_v1  ;;  %v2085_v22 = vld [vmem:[#allocation2 + $0x118] sm:$0xff]  ;;  %v2318_v57 = vsel %vm2317_vm11, %v2310_v62, %v2314_v27 }
 0x541   : > { %2177 = vmatprep.subr.bf16.mxu1 %v2173_v40  ;;  %v2086_v56 = vpack.c.bf16 %v2085_v22, %v2084_v12  ;;  %v2316_v3 = vpop.permute.xlu0 %2315  ;;  %v2320_v40 = vsel %vm2317_vm11, %v2314_v27, %v2310_v62  ;;  %v2257_v12 = vpack.c.bf16 %v2252_v0, %v2250_v47  ;;  %v2335_v25 = vmul.f32 %v2328_v50, %v2318_v57  ;;  %v2425_v47 = vld [vmem:[#allocation2 + $0x158] sm:$0xff] }
 0x542   : > { %v2321_v31 = vsel %vm2317_vm11, %v2316_v3, %v2312_v55  ;;  %v2336_v2 = vmul.f32 %v2332_v18, %v2320_v40  ;;  %v2319_v48 = vsel %vm2317_vm11, %v2312_v55, %v2316_v3  ;;  %v2413_v27 = vrot.slane %v4181_v46, %v4504_v7 }
 0x543   : > { %v2338_v13 = vmul.f32 %v2332_v18, %v2321_v31  ;;  %v2395_v42 = vpop.permute.xlu1 %2394  ;;  %v2341_v0 = vpack.c.bf16 %v2340_v36, %v2339_v34 }
 0x545   : > { %v2397_v41 = vpop.permute.xlu0 %2396  ;;  %v2343_v22 = vpack.c.bf16 %v2338_v13, %v2336_v2 }
 0x547   : > { %v2399_v49 = vpop.permute.xlu1 %2398 }
 0x548   : > { %v2403_v37 = vsel %vm2402_vm13, %v2395_v42, %v2399_v49 }
 0x549   : > { %v2401_v39 = vpop.permute.xlu0 %2400  ;;  %v2420_v40 = vmul.f32 %v2413_v27, %v2403_v37 }
 0x54a   : > { %v2406_v51 = vsel %vm2402_vm13, %v2401_v39, %v2397_v41  ;;  %v2404_v62 = vsel %vm2402_vm13, %v2397_v41, %v2401_v39 }
 0x54b   : > { %4174 = vmatmul.mubr.msk.bf16.vlgmr.msra.gmra.mrb[36].mxu1 %vm1821_vm12, %v2086_v56  ;;  %v2255_v56 = vld [vmem:[#allocation2 + $0x138] sm:$0xff]  ;;  %v2423_v55 = vmul.f32 %v2417_v61, %v2406_v51  ;;  %v2422_v18 = vmul.f32 %v2413_v27, %v2404_v62 }
 0x54c   : > { %2178 = vmatpush1.bf16.msra.mxu1 %v2172_v9  ;;  %2209 = vmatprep.mubr.bf16.mxu1 %v4362_v1  ;;  %v2337_v9 = vmul.f32 %v2328_v50, %v2319_v48  ;;  %v2256_v3 = vpack.c.bf16 %v2255_v56, %v2254_v52  ;;  %v2700_v62 = vld [vmem:[#allocation2 + $0x178] sm:$0xff] }
 0x54d   : > { %2262 = vmatprep.subr.bf16.mxu1 %v2258_v10  ;;  %v2405_v10 = vsel %vm2402_vm13, %v2399_v49, %v2395_v42  ;;  %v2427_v13 = vpack.c.bf16 %v2422_v18, %v2420_v40  ;;  %v2701_v27 = vpack.c.bf16 %v2700_v62, %v2700_v62 }
 0x54e   : > { %v2421_v30 = vmul.f32 %v2417_v61, %v2405_v10  ;;  %v2342_v31 = vpack.c.bf16 %v2337_v9, %v2335_v25  ;;  %v2499_v10 = vld [vmem:[#allocation2 + $0x160] sm:$0xff]  ;;  %v2562_v25 = vld [vmem:[#allocation2 + $0x168] sm:$0xff] }
 0x550   : > { %v2428_v11 = vpack.c.bf16 %v2423_v55, %v2421_v30  ;;  %v2563_v30 = vpack.c.bf16 %v2562_v25, %v2562_v25 }
 0x557   : > { %4176 = vmatmul.mubr.msk.bf16.vlgmr.msra.gmra.mrb[36].mxu1 %vm1821_vm12, %v2171_v45  ;;  %v2424_v45 = vld [vmem:[#allocation2 + $0x150] sm:$0xff] }
 0x558   : > { %2263 = vmatpush1.bf16.msra.mxu1 %v2257_v12  ;;  %2294 = vmatprep.mubr.bf16.mxu1 %v4362_v1  ;;  %v2426_v2 = vpack.c.bf16 %v2425_v47, %v2424_v45  ;;  %v2484_v41 = vpop.permute.xlu1 %2483 }
 0x559   : > { %2347 = vmatprep.subr.bf16.mxu1 %v2343_v22 }
 0x55a   : > { %v2489_v39 = vpop.permute.xlu0 %2488 }
 0x563   : > { %4178 = vmatmul.mubr.msk.bf16.vlgmr.msra.gmra.mrb[36].mxu1 %vm1821_vm12, %v2256_v3  ;;  %v2500_v3 = vpack.c.bf16 %v2499_v10, %v2499_v10 }
 0x564   : > { %2348 = vmatpush1.bf16.msra.mxu1 %v2342_v31  ;;  %2379 = vmatprep.mubr.bf16.mxu1 %v4362_v1  ;;  %v2631_v31 = vld [vmem:[#allocation2 + $0x170] sm:$0xff] }
 0x565   : > { %2432 = vmatprep.subr.bf16.mxu1 %v2428_v11  ;;  %v2632_v11 = vpack.c.bf16 %v2631_v31, %v2631_v31 }
 0x56f   : > { %4180 = vmatmul.mubr.msk.bf16.vlgmr.msra.gmra.mrb[36].mxu1 %vm1821_vm12, %v2341_v0 }
 0x570   : > { %2433 = vmatpush1.bf16.msra.mxu1 %v2427_v13  ;;  %2464 = vmatprep.mubr.bf16.mxu1 %v4362_v1 }
 0x57b   : > { %4182 = vmatmul.mubr.msk.bf16.vlgmr.msra.gmra.mrb[36].mxu1 %vm1821_vm12, %v2426_v2 }
 0x57c   : > { %2956 = vmatprep.mubr.bf16.mxu1 %v4362_v1 }
 0x64e   : > { %v2466_v12 = vpop.f32.mrb[36].mxu1 }
 0x64f   : > { %v2491_v22 = vadd.f32 %v2484_v41, %v2466_v12  ;;  %v2468_v42 = vpop.f32.mrb[37].mxu1 }
 0x650   : > { %v2492_v46 = vadd.f32 %v2484_v41, %v2468_v42  ;;  %v2470_v48 = vpop.f32.mrb[38].mxu1 }
 0x651   : > { %v2493_v49 = vadd.f32 %v2489_v39, %v2470_v48  ;;  %v2472_v50 = vpop.f32.mrb[39].mxu1  ;;  %v2495_v52 = vmax.f32 %v2491_v22, 0.0  ;;  %v2773_v48 = vpop.permute.xlu1 %2772 }
 0x652   : > { %v2494_v51 = vadd.f32 %v2489_v39, %v2472_v50  ;;  %v2496_v57 = vmax.f32 %v2492_v46, 0.0 }
 0x653   : > { %v2497_v56 = vmax.f32 %v2493_v49, 0.0 }
 0x654   : > { %v2498_v61 = vmax.f32 %v2494_v51, 0.0  ;;  %v4186_v51 = vld [vmem:[%s5353_s3 + $0x22] sm:$0x3] }
 0x655   : > { %v2501_v9 = vpack.c.bf16 %v2497_v56, %v2495_v52  ;;  %v4184_v52 = vld [vmem:[%s5353_s3 + $0x20] sm:$0x3]  ;;  %v4188_v56 = vld [vmem:[%s5353_s3 + $0x24] sm:$0x3] }
 0x656   : > { %v2502_v55 = vpack.c.bf16 %v2498_v61, %v2496_v57  ;;  %v2620_v57 = vrot.slane %v4186_v51, %v4504_v7  ;;  %v2624_v61 = vrot.slane %v4186_v51, %v4506_v8  ;;  %v2689_v31 = vrot.slane %v4188_v56, %v4504_v7 }
 0x658   : > { %2506 = vmatprep.subr.bf16.mxu0 %v2502_v55 }
 0x659   : > { %2507 = vmatpush1.bf16.msra.mxu0 %v2501_v9 }
 0x65a   : > { %2567 = vmatprep.subr.bf16.mxu0 %v2502_v55 }
 0x65c   : > { %4183 = vmatmul.mubr.msk.bf16.vlgmr.msra.gmra.mrb[40].mxu0 %vm1821_vm12, %v2500_v3  ;;  %v2557_v3 = vrot.slane %v4184_v52, %v4506_v8 }
 0x65d   : > { %2568 = vmatpush1.bf16.msra.mxu0 %v2501_v9  ;;  %2599 = vmatprep.mubr.bf16.mxu0 %v4362_v1 }
 0x65e   : > { %2636 = vmatprep.subr.bf16.mxu0 %v2502_v55 }
 0x664   : > { %4185 = vmatmul.mubr.msk.bf16.vlgmr.msra.gmra.mrb[44].mxu0 %vm1821_vm12, %v2563_v30 }
 0x665   : > { %2637 = vmatpush1.bf16.msra.mxu0 %v2501_v9  ;;  %2668 = vmatprep.mubr.bf16.mxu0 %v4362_v1 }
 0x666   : > { %2705 = vmatprep.subr.bf16.mxu0 %v2502_v55  ;;  %v2553_v55 = vrot.slane %v4184_v52, %v4504_v7 }
 0x66c   : > { %4187 = vmatmul.mubr.msk.bf16.vlgmr.msra.gmra.mrb[48].mxu0 %vm1821_vm12, %v2632_v11  ;;  %v2693_v11 = vrot.slane %v4188_v56, %v4506_v8 }
 0x66d   : > { %2706 = vmatpush1.bf16.msra.mxu0 %v2501_v9  ;;  %2737 = vmatprep.mubr.bf16.mxu0 %v4362_v1 }
 0x674   : > { %4189 = vmatmul.mubr.msk.bf16.vlgmr.msra.gmra.mrb[52].mxu0 %vm1821_vm12, %v2701_v27 }
 0x675   : > { %2844 = vmatprep.mubr.bf16.mxu0 %v4362_v1 }
 0x72f   : > { %v2540_v34 = vpop.f32.mrb[40].mxu0 }
 0x730   : > { %v2542_v36 = vpop.f32.mrb[41].mxu0 }
 0x731   : > { %v2544_v37 = vpop.f32.mrb[42].mxu0 }
 0x732   : > { %v2545_v18 = vpop.f32.mrb[43].mxu0  ;;  %v4190_v37 = vld [vmem:[%s5353_s3 + $0x26] sm:$0x3] }
 0x737   : > { %v2601_v0 = vpop.f32.mrb[44].mxu0 }
 0x738   : > { %2608 = vrot.lane.b32.xlu1 %v2601_v0, %s4366_s14  ;;  %v2603_v40 = vpop.f32.mrb[45].mxu0 }
 0x739   : > { %2610 = vrot.lane.b32.xlu0 %v2603_v40, %s4366_s14  ;;  %v2605_v13 = vpop.f32.mrb[46].mxu0  ;;  %v2560_v40 = vmul.f32 %v2553_v55, %v2540_v34 }
 0x73a   : > { %v2606_v45 = vpop.f32.mrb[47].mxu0  ;;  %v2561_v13 = vmul.f32 %v2557_v3, %v2542_v36 }
 0x73f   : > { %v2670_v47 = vpop.f32.mrb[48].mxu0 }
 0x740   : > { %2677 = vrot.lane.b32.xlu1 %v2670_v47, %s4364_s12  ;;  %v2672_v2 = vpop.f32.mrb[49].mxu0 }
 0x741   : > { %2679 = vrot.lane.b32.xlu0 %v2672_v2, %s4364_s12  ;;  %v2674_v41 = vpop.f32.mrb[50].mxu0  ;;  %v2758_v2 = vrot.slane %v4190_v37, %v4504_v7 }
 0x742   : > { %v2675_v12 = vpop.f32.mrb[51].mxu0  ;;  %v2762_v41 = vrot.slane %v4190_v37, %v4506_v8 }
 0x747   : > { %v2739_v22 = vpop.f32.mrb[52].mxu0 }
 0x748   : > { %2746 = vrot.lane.b32.xlu0 %v2739_v22, %s4363_s11  ;;  %v2741_v42 = vpop.f32.mrb[53].mxu0 }
 0x749   : > { %2748 = vrot.lane.b32.xlu1 %v2741_v42, %s4363_s11  ;;  %v2743_v39 = vpop.f32.mrb[54].mxu0 }
 0x74a   : > { %v2744_v46 = vpop.f32.mrb[55].mxu0 }
 0x7aa   : > { %v2609_v49 = vpop.permute.xlu1 %2608 }
 0x7ab   : > { %v2611_v50 = vpop.permute.xlu0 %2610 }
 0x7ac   : > { %v2612_v25 = vsel %vm453_vm4, %v2609_v49, %v2611_v50  ;;  %v2613_v30 = vsel %vm453_vm4, %v2611_v50, %v2609_v49 }
 0x7ad   : > { %v2627_v18 = vmul.f32 %v2620_v57, %v2613_v30  ;;  %v2628_v0 = vmul.f32 %v2624_v61, %v2612_v25 }
 0x7af   : > { %v2629_v22 = vadd.f32 %v2627_v18, %v2560_v40  ;;  %v2630_v42 = vadd.f32 %v2628_v0, %v2561_v13 }
 0x7b2   : > { %v2678_v9 = vpop.permute.xlu1 %2677 }
 0x7b3   : > { %v2680_v10 = vpop.permute.xlu0 %2679 }
 0x7b4   : > { %v2681_v62 = vsel %vm247_vm1, %v2678_v9, %v2680_v10  ;;  %v2682_v27 = vsel %vm247_vm1, %v2680_v10, %v2678_v9  ;;  %v3917_v9 = vld [vmem:[%s5352_s2 + $0x50] sm:$0xff]  ;;  %v3979_v10 = vld [vmem:[%s5352_s2 + $0x58] sm:$0xff] }
 0x7b5   : > { %v2696_v45 = vmul.f32 %v2689_v31, %v2682_v27  ;;  %v2697_v47 = vmul.f32 %v2693_v11, %v2681_v62  ;;  %v2799_v62 = vld [vmem:[#allocation2 + $0x188] sm:$0xff] }
 0x7b7   : > { %v2698_v50 = vadd.f32 %v2696_v45, %v2629_v22  ;;  %v2699_v51 = vadd.f32 %v2697_v47, %v2630_v42 }
 0x7ba   : > { %v2747_v12 = vpop.permute.xlu0 %2746 }
 0x7bb   : > { %v2749_v39 = vpop.permute.xlu1 %2748 }
 0x7bc   : > { %v2750_v46 = vsel %vm222_vm0, %v2747_v12, %v2749_v39  ;;  %v2751_v49 = vsel %vm222_vm0, %v2749_v39, %v2747_v12 }
 0x7bd   : > { %v2765_v34 = vmul.f32 %v2758_v2, %v2751_v49  ;;  %v2766_v36 = vmul.f32 %v2762_v41, %v2750_v46  ;;  %v2800_v41 = vpack.c.bf16 %v2799_v62, %v2799_v62 }
 0x7bf   : > { %v2767_v52 = vadd.f32 %v2765_v34, %v2698_v50  ;;  %v2768_v56 = vadd.f32 %v2766_v36, %v2699_v51  ;;  %v2787_v51 = vld [vmem:[#allocation2 + $0x180] sm:$0xff]  ;;  %v2911_v34 = vld [vmem:[#allocation2 + $0x190] sm:$0xff] }
 0x7c1   : > { %v2775_v57 = vadd.f32 %v2773_v48, %v2767_v52  ;;  %v2776_v7 = vadd.f32 %v2773_v48, %v2768_v56  ;;  %v3903_v48 = vld [vmem:[%s5352_s2 + $0x48] sm:$0xff] }
 0x7c3   : > { %v5098_v61 = vmax.f32 %v2775_v57, 0.0  ;;  %v5100_v8 = vmax.f32 %v2776_v7, 0.0 }
 0x7c5   : > { %2791 = vrot.lane.b32.xlu0 %v5098_v61, %s4363_s11  ;;  %2793 = vrot.lane.b32.xlu1 %v5100_v8, %s4363_s11 }
 0x7c9   : > { %2779 = vrot.lane.b32.xlu0 %v4803_v59, %s4363_s11  ;;  %2781 = vrot.lane.b32.xlu1 %v4805_v60, %s4363_s11 }
 0x7cd   : > { %2903 = vrot.lane.b32.xlu0 %v4803_v59, %s4364_s12  ;;  %2905 = vrot.lane.b32.xlu1 %v4805_v60, %s4364_s12 }
 0x7d1   : > { %2967 = vrot.lane.b32.xlu0 %v5098_v61, %s4364_s12  ;;  %2969 = vrot.lane.b32.xlu1 %v5100_v8, %s4364_s12 }
 0x7d5   : > { %3031 = vrot.lane.b32.xlu0 %v4803_v59, %s4365_s13  ;;  %3033 = vrot.lane.b32.xlu1 %v4805_v60, %s4365_s13 }
 0x7d9   : > { %3095 = vrot.lane.b32.xlu0 %v5098_v61, %s4365_s13  ;;  %3097 = vrot.lane.b32.xlu1 %v5100_v8, %s4365_s13 }
 0x7dd   : > { %3159 = vrot.lane.b32.xlu0 %v4803_v59, %s4366_s14  ;;  %3161 = vrot.lane.b32.xlu1 %v4805_v60, %s4366_s14 }
 0x7e1   : > { %3223 = vrot.lane.b32.xlu0 %v5098_v61, %s4366_s14  ;;  %3225 = vrot.lane.b32.xlu1 %v5100_v8, %s4366_s14 }
 0x7e5   : > { %3449 = vrot.lane.b32.xlu0 %v5098_v61, %s4367_s17  ;;  %3451 = vrot.lane.b32.xlu1 %v5100_v8, %s4367_s17 }
 0x7e9   : > { %3513 = vrot.lane.b32.xlu0 %v4803_v59, %s4368_s18  ;;  %3515 = vrot.lane.b32.xlu1 %v4805_v60, %s4368_s18  ;;  %v3885_v59 = vld [vmem:[%s5352_s2 + $0x38] sm:$0xff]  ;;  %v3895_v60 = vld [vmem:[%s5352_s2 + $0x40] sm:$0xff] }
 0x7ed   : > { %3577 = vrot.lane.b32.xlu0 %v5098_v61, %s4368_s18  ;;  %3579 = vrot.lane.b32.xlu1 %v5100_v8, %s4368_s18 }
 0x7f1   : > { %3699 = vrot.lane.b32.xlu0 %v5098_v61, %s4369_s19  ;;  %3701 = vrot.lane.b32.xlu1 %v5100_v8, %s4369_s19 }
 0x7f5   : > { %3821 = vrot.lane.b32.xlu0 %v5098_v61, %s4370_s20  ;;  %3823 = vrot.lane.b32.xlu1 %v5100_v8, %s4370_s20 }
 0x7f9   : > { %3888 = vperm.xlu0 %4317, %v3885_v59   ;;  %3898 = vperm.xlu1 %4318, %v3895_v60   ;;  %v2788_v60 = vpack.c.bf16 %v2787_v51, %v2787_v51 }
 0x7fd   : > { %3906 = vperm.xlu0 %4317, %v3903_v48   ;;  %3920 = vperm.xlu1 %4318, %v3917_v9  }
 0x801   : > { %3982 = vperm.xlu0 %4317, %v3979_v10  }
 0x837   : > { %v2792_v55 = vpop.permute.xlu0 %2791  ;;  %v2794_v3 = vpop.permute.xlu1 %2793 }
 0x838   : > { %v2795_v25 = vsel %vm222_vm0, %v2792_v55, %v2794_v3  ;;  %v2796_v30 = vsel %vm222_vm0, %v2794_v3, %v2792_v55  ;;  %v2912_v55 = vpack.c.bf16 %v2911_v34, %v2911_v34 }
 0x839   : > { %v2797_v31 = vmul.f32 %v2796_v30, %v4529_v17  ;;  %v2798_v11 = vmul.f32 %v2795_v25, %v4520_v14 }
 0x83b   : > { %v2801_v27 = vpack.c.bf16 %v2797_v31, %v2797_v31  ;;  %v2802_v37 = vpack.c.bf16 %v2798_v11, %v2798_v11  ;;  %v2780_v18 = vpop.permute.xlu0 %2779  ;;  %v2782_v0 = vpop.permute.xlu1 %2781 }
 0x83c   : > { %v2783_v40 = vsel %vm222_vm0, %v2780_v18, %v2782_v0  ;;  %v2784_v13 = vsel %vm222_vm0, %v2782_v0, %v2780_v18  ;;  %v3039_v18 = vld [vmem:[#allocation2 + $0x1a0] sm:$0xff] }
 0x83d   : > { %v2785_v45 = vmul.f32 %v2784_v13, %v4529_v17  ;;  %v2786_v47 = vmul.f32 %v2783_v40, %v4520_v14  ;;  %4191 = vmatprep.subr.msk.bf16.mxu0 %vm273_vm3, %v2802_v37  ;;  %v2807_v2 = vsel %vm273_vm3, %v2801_v27, 0  ;;  %v2975_v37 = vld [vmem:[#allocation2 + $0x198] sm:$0xff] }
 0x83e   : > { %2813 = vmatpush1.bf16.msra.mxu0 %v2807_v2 }
 0x83f   : > { %v2789_v12 = vpack.c.bf16 %v2785_v45, %v2785_v45  ;;  %v2790_v22 = vpack.c.bf16 %v2786_v47, %v2786_v47  ;;  %v2904_v42 = vpop.permute.xlu0 %2903  ;;  %v2906_v39 = vpop.permute.xlu1 %2905 }
 0x840   : > { %v2907_v46 = vsel %vm247_vm1, %v2904_v42, %v2906_v39  ;;  %v2908_v49 = vsel %vm247_vm1, %v2906_v39, %v2904_v42  ;;  %v3040_v39 = vpack.c.bf16 %v3039_v18, %v3039_v18 }
 0x841   : > { %v2909_v17 = vmul.f32 %v2908_v49, %v4526_v16  ;;  %v2910_v14 = vmul.f32 %v2907_v46, %v4523_v15  ;;  %4192 = vmatmul.mubr.msk.bf16.vlgmr.msra.gmra.mrb[56].mxu0 %vm269_vm5, %v2800_v41  ;;  %4193 = vmatprep.subr.msk.bf16.mxu0 %vm273_vm3, %v2790_v22  ;;  %v2857_v50 = vsel %vm273_vm3, %v2789_v12, 0  ;;  %v2976_v41 = vpack.c.bf16 %v2975_v37, %v2975_v37  ;;  %v3287_v37 = vld [vmem:[#allocation2 + $0x1c0] sm:$0xff] }
 0x842   : > { %2863 = vmatpush1.bf16.msra.mxu0 %v2857_v50  ;;  %2894 = vmatprep.mubr.bf16.mxu0 %v4362_v1 }
 0x843   : > { %v2913_v36 = vpack.c.bf16 %v2909_v17, %v2909_v17  ;;  %v2914_v52 = vpack.c.bf16 %v2910_v14, %v2910_v14  ;;  %v2968_v56 = vpop.permute.xlu0 %2967  ;;  %v2970_v57 = vpop.permute.xlu1 %2969 }
 0x844   : > { %v2971_v7 = vsel %vm247_vm1, %v2968_v56, %v2970_v57  ;;  %v2972_v59 = vsel %vm247_vm1, %v2970_v57, %v2968_v56 }
 0x845   : > { %v2973_v48 = vmul.f32 %v2972_v59, %v4526_v16  ;;  %v2974_v9 = vmul.f32 %v2971_v7, %v4523_v15  ;;  %4195 = vmatprep.subr.msk.bf16.mxu1 %vm273_vm3, %v2914_v52  ;;  %v2919_v10 = vsel %vm273_vm3, %v2913_v36, 0  ;;  %v3103_v36 = vld [vmem:[#allocation2 + $0x1a8] sm:$0xff]  ;;  %v3167_v52 = vld [vmem:[#allocation2 + $0x1b0] sm:$0xff] }
 0x846   : > { %2925 = vmatpush1.bf16.msra.mxu1 %v2919_v10  ;;  %v3104_v10 = vpack.c.bf16 %v3103_v36, %v3103_v36 }
 0x847   : > { %v2977_v3 = vpack.c.bf16 %v2973_v48, %v2973_v48  ;;  %v2978_v25 = vpack.c.bf16 %v2974_v9, %v2974_v9  ;;  %v3032_v30 = vpop.permute.xlu0 %3031  ;;  %v3034_v31 = vpop.permute.xlu1 %3033 }
 0x848   : > { %v3035_v11 = vsel %vm375_vm2, %v3032_v30, %v3034_v31  ;;  %v3036_v62 = vsel %vm375_vm2, %v3034_v31, %v3032_v30  ;;  %v3168_v30 = vpack.c.bf16 %v3167_v52, %v3167_v52 }
 0x849   : > { %v3037_v16 = vmul.f32 %v3036_v62, %v4533_v20  ;;  %v3038_v15 = vmul.f32 %v3035_v11, %v4536_v21  ;;  %4194 = vmatmul.mubr.msk.bf16.vlgmr.msra.gmra.mrb[60].mxu0 %vm269_vm5, %v2788_v60  ;;  %4196 = vmatmul.mubr.msk.bf16.vlgmr.msra.gmra.mrb[40].mxu1 %vm269_vm5, %v2912_v55  ;;  %v2983_v27 = vsel %vm273_vm3, %v2977_v3, 0  ;;  %v3392_v60 = vmul.f32 %v4831_v5, %v4589_v63 }
 0x84a   : > { %4197 = vmatprep.subr.msk.bf16.mxu0 %vm273_vm3, %v2978_v25  ;;  %3020 = vmatprep.mubr.bf16.mxu0 %v4362_v1 }
 0x84b   : > { %v3041_v0 = vpack.c.bf16 %v3037_v16, %v3037_v16  ;;  %v3042_v40 = vpack.c.bf16 %v3038_v15, %v3038_v15  ;;  %2989 = vmatpush1.bf16.msra.mxu0 %v2983_v27  ;;  %v3096_v13 = vpop.permute.xlu0 %3095  ;;  %v3098_v45 = vpop.permute.xlu1 %3097  ;;  %3084 = vmatprep.mubr.bf16.mxu1 %v4362_v1  ;;  %v3391_v16 = vmul.f32 %v4827_v4, %v4579_v58  ;;  %v3231_v27 = vld [vmem:[#allocation2 + $0x1b8] sm:$0xff] }
 0x84c   : > { %v3099_v47 = vsel %vm375_vm2, %v3096_v13, %v3098_v45  ;;  %v3100_v2 = vsel %vm375_vm2, %v3098_v45, %v3096_v13  ;;  %v3396_v15 = vpack.c.bf16 %v3392_v60, %v3392_v60  ;;  %v3232_v45 = vpack.c.bf16 %v3231_v27, %v3231_v27  ;;  %v3585_v27 = vld [vmem:[#allocation2 + $0x1e8] sm:$0xff] }
 0x84d   : > { %v3101_v12 = vmul.f32 %v3100_v2, %v4533_v20  ;;  %v3102_v22 = vmul.f32 %v3099_v47, %v4536_v21  ;;  %4199 = vmatprep.subr.msk.bf16.mxu1 %vm273_vm3, %v3042_v40  ;;  %v3047_v42 = vsel %vm273_vm3, %v3041_v0, 0  ;;  %v3395_v0 = vpack.c.bf16 %v3391_v16, %v3391_v16 }
 0x84e   : > { %3053 = vmatpush1.bf16.msra.mxu1 %v3047_v42  ;;  %v3288_v47 = vpack.c.bf16 %v3287_v37, %v3287_v37  ;;  %v3763_v16 = vmul.f32 %v4878_v32, %v4650_v53  ;;  %v3643_v37 = vld [vmem:[#allocation2 + $0x1f0] sm:$0xff] }
 0x84f   : > { %v3105_v46 = vpack.c.bf16 %v3101_v12, %v3101_v12  ;;  %v3106_v49 = vpack.c.bf16 %v3102_v22, %v3102_v22  ;;  %v3160_v17 = vpop.permute.xlu0 %3159  ;;  %v3162_v14 = vpop.permute.xlu1 %3161 }
 0x850   : > { %v3163_v50 = vsel %vm453_vm4, %v3160_v17, %v3162_v14  ;;  %v3164_v51 = vsel %vm453_vm4, %v3162_v14, %v3160_v17  ;;  %v3335_v17 = vld [vmem:[#allocation2 + $0x1c8] sm:$0xff]  ;;  %v3767_v32 = vpack.c.bf16 %v3763_v16, %v3763_v16 }
 0x851   : > { %v3165_v20 = vmul.f32 %v3164_v51, %v4559_v43  ;;  %v3166_v21 = vmul.f32 %v3163_v50, %v4562_v44  ;;  %4198 = vmatmul.mubr.msk.bf16.vlgmr.msra.gmra.mrb[64].mxu0 %vm269_vm5, %v2976_v41  ;;  %4200 = vmatmul.mubr.msk.bf16.vlgmr.msra.gmra.mrb[44].mxu1 %vm269_vm5, %v3040_v39  ;;  %v3111_v34 = vsel %vm273_vm3, %v3105_v46, 0  ;;  %v3401_v39 = vsel %vm273_vm3, %v3395_v0, 0  ;;  %v3393_v50 = vld [vmem:[#allocation2 + $0x1d0] sm:$0xff] }
 0x852   : > { %4201 = vmatprep.subr.msk.bf16.mxu0 %vm273_vm3, %v3106_v49  ;;  %3148 = vmatprep.mubr.bf16.mxu0 %v4362_v1  ;;  %v3336_v51 = vpack.c.bf16 %v3335_v17, %v3335_v17  ;;  %v3394_v36 = vpack.c.bf16 %v3393_v50, %v3393_v50  ;;  %v3644_v0 = vpack.c.bf16 %v3643_v37, %v3643_v37 }
 0x853   : > { %v3169_v56 = vpack.c.bf16 %v3165_v20, %v3165_v20  ;;  %v3170_v57 = vpack.c.bf16 %v3166_v21, %v3166_v21  ;;  %3117 = vmatpush1.bf16.msra.mxu0 %v3111_v34  ;;  %v3224_v7 = vpop.permute.xlu0 %3223  ;;  %v3226_v59 = vpop.permute.xlu1 %3225  ;;  %3212 = vmatprep.mubr.bf16.mxu1 %v4362_v1 }
 0x854   : > { %v3227_v48 = vsel %vm453_vm4, %v3224_v7, %v3226_v59  ;;  %v3228_v9 = vsel %vm453_vm4, %v3226_v59, %v3224_v7  ;;  %v3641_v7 = vmul.f32 %v4862_v29, %v4625_v33  ;;  %v3764_v29 = vmul.f32 %v4868_v35, %v4653_v54 }
 0x855   : > { %v3229_v55 = vmul.f32 %v3228_v9, %v4559_v43  ;;  %v3230_v3 = vmul.f32 %v3227_v48, %v4562_v44  ;;  %4203 = vmatprep.subr.msk.bf16.mxu1 %vm273_vm3, %v3170_v57  ;;  %v3175_v25 = vsel %vm273_vm3, %v3169_v56, 0 }
 0x856   : > { %3181 = vmatpush1.bf16.msra.mxu1 %v3175_v25  ;;  %v3768_v35 = vpack.c.bf16 %v3764_v29, %v3764_v29 }
 0x857   : > { %v3233_v31 = vpack.c.bf16 %v3229_v55, %v3229_v55  ;;  %v3234_v11 = vpack.c.bf16 %v3230_v3, %v3230_v3  ;;  %v3450_v5 = vpop.permute.xlu0 %3449  ;;  %4207 = vmatprep.subr.msk.bf16.mxu1 %vm273_vm3, %v4841_v23  ;;  %v3452_v62 = vpop.permute.xlu1 %3451  ;;  %v3338_v23 = vpack.c.bf16 %v5100_v8, %v5100_v8  ;;  %v3521_v55 = vld [vmem:[#allocation2 + $0x1e0] sm:$0xff] }
 0x858   : > { %v3454_v44 = vsel %vm587_vm6, %v3452_v62, %v3450_v5  ;;  %v3453_v2 = vsel %vm587_vm6, %v3450_v5, %v3452_v62 }
 0x859   : > { %4202 = vmatmul.mubr.msk.bf16.vlgmr.msra.gmra.mrb[68].mxu0 %vm269_vm5, %v3104_v10  ;;  %4204 = vmatmul.mubr.msk.bf16.vlgmr.msra.gmra.mrb[48].mxu1 %vm269_vm5, %v3168_v30  ;;  %v3239_v43 = vsel %vm273_vm3, %v3233_v31, 0  ;;  %v3456_v8 = vmul.f32 %v3454_v44, %v4589_v63  ;;  %v3457_v10 = vld [vmem:[#allocation2 + $0x1d8] sm:$0xff]  ;;  %v3522_v31 = vpack.c.bf16 %v3521_v55, %v3521_v55 }
 0x85a   : > { %4205 = vmatprep.subr.msk.bf16.mxu0 %vm273_vm3, %v3234_v11  ;;  %3293 = vmatpush1.bf16.msra.mxu1 %v4855_v28  ;;  %v3337_v28 = vpack.c.bf16 %v5098_v61, %v5098_v61  ;;  %v3455_v61 = vmul.f32 %v3453_v2, %v4579_v58  ;;  %v3642_v58 = vmul.f32 %v4847_v26, %v4633_v38 }
 0x85b   : > { %3245 = vmatpush1.bf16.msra.mxu0 %v3239_v43  ;;  %v3514_v4 = vpop.permute.xlu0 %3513  ;;  %4211 = vmatprep.subr.msk.bf16.mxu1 %vm273_vm3, %v3396_v15  ;;  %v3516_v18 = vpop.permute.xlu1 %3515  ;;  %v3460_v63 = vpack.c.bf16 %v3456_v8, %v3456_v8  ;;  %v3458_v30 = vpack.c.bf16 %v3457_v10, %v3457_v10 }
 0x85c   : > { %v3518_v40 = vsel %vm665_vm7, %v3516_v18, %v3514_v4  ;;  %4209 = vmatprep.subr.msk.bf16.mxu0 %vm273_vm3, %v3338_v23  ;;  %3276 = vmatprep.mubr.bf16.mxu0 %v4362_v1  ;;  %v3517_v41 = vsel %vm665_vm7, %v3514_v4, %v3516_v18  ;;  %v3343_v49 = vsel %vm273_vm3, %v3337_v28, 0  ;;  %v3459_v20 = vpack.c.bf16 %v3455_v61, %v3455_v61 }
 0x85d   : > { %v3520_v13 = vmul.f32 %v3518_v40, %v4613_v24  ;;  %3324 = vmatprep.mubr.bf16.mxu1 %v4362_v1  ;;  %v3519_v46 = vmul.f32 %v3517_v41, %v4606_v19  ;;  %v3646_v59 = vpack.c.bf16 %v3642_v58, %v3642_v58  ;;  %v3586_v18 = vpack.c.bf16 %v3585_v27, %v3585_v27 }
 0x85e   : > { %v3465_v48 = vsel %vm273_vm3, %v3459_v20, 0 }
 0x85f   : > { %v3524_v12 = vpack.c.bf16 %v3520_v13, %v3520_v13  ;;  %v3578_v22 = vpop.permute.xlu0 %3577  ;;  %v3580_v42 = vpop.permute.xlu1 %3579  ;;  %v3523_v21 = vpack.c.bf16 %v3519_v46, %v3519_v46 }
 0x860   : > { %v3582_v14 = vsel %vm665_vm7, %v3580_v42, %v3578_v22  ;;  %v3581_v52 = vsel %vm665_vm7, %v3578_v22, %v3580_v42 }
 0x861   : > { %4206 = vmatmul.mubr.msk.bf16.vlgmr.msra.gmra.mrb[72].mxu0 %vm269_vm5, %v3232_v45  ;;  %4208 = vmatmul.mubr.msk.bf16.vlgmr.msra.gmra.mrb[52].mxu1 %vm269_vm5, %v3288_v47  ;;  %v3584_v34 = vmul.f32 %v3582_v14, %v4613_v24  ;;  %v3583_v26 = vmul.f32 %v3581_v52, %v4606_v19  ;;  %v3529_v24 = vsel %vm273_vm3, %v3523_v21, 0  ;;  %v3645_v19 = vpack.c.bf16 %v3641_v7, %v3641_v7  ;;  %v3707_v47 = vld [vmem:[#allocation2 + $0x1f8] sm:$0xff] }
 0x862   : > { %3349 = vmatpush1.bf16.msra.mxu0 %v3343_v49  ;;  %3407 = vmatpush1.bf16.msra.mxu1 %v3401_v39  ;;  %v3773_v45 = vsel %vm273_vm3, %v3767_v32, 0 }
 0x863   : > { %4213 = vmatprep.subr.msk.bf16.mxu0 %vm273_vm3, %v3460_v63  ;;  %4215 = vmatprep.subr.msk.bf16.mxu1 %vm273_vm3, %v3524_v12  ;;  %v3700_v56 = vpop.permute.xlu0 %3699  ;;  %v3702_v57 = vpop.permute.xlu1 %3701  ;;  %v3588_v60 = vpack.c.bf16 %v3584_v34, %v3584_v34  ;;  %v3587_v3 = vpack.c.bf16 %v3583_v26, %v3583_v26  ;;  %v3651_v15 = vsel %vm273_vm3, %v3645_v19, 0  ;;  %v3829_v12 = vld [vmem:[#allocation2 + $0x208] sm:$0xff] }
 0x864   : > { %3380 = vmatprep.mubr.bf16.mxu0 %v4362_v1  ;;  %3438 = vmatprep.mubr.bf16.mxu1 %v4362_v1  ;;  %v3704_v9 = vsel %vm743_vm8, %v3702_v57, %v3700_v56  ;;  %v3703_v11 = vsel %vm743_vm8, %v3700_v56, %v3702_v57  ;;  %v3830_v22 = vpack.c.bf16 %v3829_v12, %v3829_v12 }
 0x865   : > { %v3706_v25 = vmul.f32 %v3704_v9, %v4633_v38  ;;  %v3705_v43 = vmul.f32 %v3703_v11, %v4625_v33  ;;  %v3593_v38 = vsel %vm273_vm3, %v3587_v3, 0 }
 0x867   : > { %v3822_v5 = vpop.permute.xlu0 %3821  ;;  %v3824_v62 = vpop.permute.xlu1 %3823  ;;  %v3710_v44 = vpack.c.bf16 %v3706_v25, %v3706_v25  ;;  %v3709_v33 = vpack.c.bf16 %v3705_v43, %v3705_v43 }
 0x868   : > { %v3826_v23 = vsel %vm821_vm9, %v3824_v62, %v3822_v5  ;;  %v3825_v40 = vsel %vm821_vm9, %v3822_v5, %v3824_v62 }
 0x869   : > { %4210 = vmatmul.mubr.msk.bf16.vlgmr.msra.gmra.mrb[76].mxu0 %vm269_vm5, %v3336_v51  ;;  %4212 = vmatmul.mubr.msk.bf16.vlgmr.msra.gmra.mrb[56].mxu1 %vm269_vm5, %v3394_v36  ;;  %v3828_v4 = vmul.f32 %v3826_v23, %v4653_v54  ;;  %v3827_v28 = vmul.f32 %v3825_v40, %v4650_v53  ;;  %v3715_v13 = vsel %vm273_vm3, %v3709_v33, 0  ;;  %v3765_v54 = vld [vmem:[#allocation2 + $0x200] sm:$0xff]  ;;  %v3708_v53 = vpack.c.bf16 %v3707_v47, %v3707_v47 }
 0x86a   : > { %3471 = vmatpush1.bf16.msra.mxu0 %v3465_v48  ;;  %3535 = vmatpush1.bf16.msra.mxu1 %v3529_v24  ;;  %v3766_v2 = vpack.c.bf16 %v3765_v54, %v3765_v54 }
 0x86b   : > { %4217 = vmatprep.subr.msk.bf16.mxu0 %vm273_vm3, %v3588_v60  ;;  %4219 = vmatprep.subr.msk.bf16.mxu1 %vm273_vm3, %v3646_v59  ;;  %v3832_v8 = vpack.c.bf16 %v3828_v4, %v3828_v4  ;;  %v3831_v6 = vpack.c.bf16 %v3827_v28, %v3827_v28 }
 0x86c   : > { %3502 = vmatprep.mubr.bf16.mxu0 %v4362_v1  ;;  %3566 = vmatprep.mubr.bf16.mxu1 %v4362_v1 }
 0x86d   : > { %v3837_v41 = vsel %vm273_vm3, %v3831_v6, 0 }
 0x871   : > { %4214 = vmatmul.mubr.msk.bf16.vlgmr.msra.gmra.mrb[80].mxu0 %vm269_vm5, %v3458_v30  ;;  %4216 = vmatmul.mubr.msk.bf16.vlgmr.msra.gmra.mrb[60].mxu1 %vm269_vm5, %v3522_v31 }
 0x872   : > { %3599 = vmatpush1.bf16.msra.mxu0 %v3593_v38  ;;  %3657 = vmatpush1.bf16.msra.mxu1 %v3651_v15 }
 0x873   : > { %4221 = vmatprep.subr.msk.bf16.mxu0 %vm273_vm3, %v3710_v44  ;;  %4223 = vmatprep.subr.msk.bf16.mxu1 %vm273_vm3, %v3768_v35 }
 0x874   : > { %3688 = vmatprep.mubr.bf16.mxu1 %v4362_v1  ;;  %3630 = vmatprep.mubr.bf16.mxu0 %v4362_v1 }
 0x879   : > { %4218 = vmatmul.mubr.msk.bf16.vlgmr.msra.gmra.mrb[84].mxu0 %vm269_vm5, %v3586_v18  ;;  %4220 = vmatmul.mubr.msk.bf16.vlgmr.msra.gmra.mrb[64].mxu1 %vm269_vm5, %v3644_v0 }
 0x87a   : > { %3721 = vmatpush1.bf16.msra.mxu0 %v3715_v13  ;;  %3779 = vmatpush1.bf16.msra.mxu1 %v3773_v45 }
 0x87b   : > { %4225 = vmatprep.subr.msk.bf16.mxu0 %vm273_vm3, %v3832_v8  ;;  %3752 = vmatprep.mubr.bf16.mxu0 %v4362_v1 }
 0x87c   : > { %3810 = vmatprep.mubr.bf16.mxu1 %v4362_v1 }
 0x881   : > { %4222 = vmatmul.mubr.msk.bf16.vlgmr.msra.gmra.mrb[88].mxu0 %vm269_vm5, %v3708_v53  ;;  %4224 = vmatmul.mubr.msk.bf16.vlgmr.msra.gmra.mrb[68].mxu1 %vm269_vm5, %v3766_v2 }
 0x882   : > { %3843 = vmatpush1.bf16.msra.mxu0 %v3837_v41  ;;  %3874 = vmatprep.mubr.bf16.mxu0 %v4362_v1 }
 0x883   : > { %3964 = vmatprep.mubr.bf16.mxu1 %v4362_v1 }
 0x889   : > { %4226 = vmatmul.mubr.msk.bf16.vlgmr.msra.gmra.mrb[92].mxu0 %vm269_vm5, %v3830_v22 }
 0x88a   : > { %4026 = vmatprep.mubr.bf16.mxu0 %v4362_v1 }
 0x914   : > { %v2846_v42 = vpop.f32.mrb[56].mxu0 }
 0x915   : > { %v2848_v39 = vpop.f32.mrb[57].mxu0 }
 0x916   : > { %v2850_v61 = vpop.f32.mrb[58].mxu0 }
 0x917   : > { %v2851_v63 = vpop.f32.mrb[59].mxu0 }
 0x91c   : > { %v2896_v46 = vpop.f32.mrb[60].mxu0  ;;  %v2958_v49 = vpop.f32.mrb[40].mxu1 }
 0x91d   : > { %v2897_v17 = vadd.f32 %v2896_v46, %v2846_v42  ;;  %v2898_v14 = vpop.f32.mrb[61].mxu0  ;;  %v2960_v50 = vpop.f32.mrb[41].mxu1 }
 0x91e   : > { %v2899_v58 = vadd.f32 %v2898_v14, %v2848_v39  ;;  %v2900_v51 = vpop.f32.mrb[62].mxu0  ;;  %v2962_v20 = vpop.f32.mrb[42].mxu1 }
 0x91f   : > { %v2965_v21 = vadd.f32 %v2958_v49, %v2897_v17  ;;  %v2901_v34 = vpop.f32.mrb[63].mxu0  ;;  %v2963_v36 = vpop.f32.mrb[43].mxu1 }
 0x920   : > { %v2966_v52 = vadd.f32 %v2960_v50, %v2899_v58 }
 0x924   : > { %v3022_v56 = vpop.f32.mrb[64].mxu0  ;;  %v3086_v57 = vpop.f32.mrb[44].mxu1 }
 0x925   : > { %v3029_v7 = vadd.f32 %v3022_v56, %v2965_v21  ;;  %v3024_v1 = vpop.f32.mrb[65].mxu0  ;;  %v3088_v59 = vpop.f32.mrb[45].mxu1 }
 0x926   : > { %v3030_v26 = vadd.f32 %v3024_v1, %v2966_v52  ;;  %v3026_v60 = vpop.f32.mrb[66].mxu0  ;;  %v3090_v48 = vpop.f32.mrb[46].mxu1 }
 0x927   : > { %v3093_v24 = vadd.f32 %v3086_v57, %v3029_v7  ;;  %v3027_v9 = vpop.f32.mrb[67].mxu0  ;;  %v3091_v10 = vpop.f32.mrb[47].mxu1 }
 0x928   : > { %v3094_v55 = vadd.f32 %v3088_v59, %v3030_v26 }
 0x92c   : > { %v3150_v19 = vpop.f32.mrb[68].mxu0  ;;  %v3214_v29 = vpop.f32.mrb[48].mxu1 }
 0x92d   : > { %v3157_v3 = vadd.f32 %v3150_v19, %v3093_v24  ;;  %v3152_v25 = vpop.f32.mrb[69].mxu0  ;;  %v3216_v30 = vpop.f32.mrb[49].mxu1 }
 0x92e   : > { %v3158_v31 = vadd.f32 %v3152_v25, %v3094_v55  ;;  %v3154_v11 = vpop.f32.mrb[70].mxu0  ;;  %v3218_v5 = vpop.f32.mrb[50].mxu1 }
 0x92f   : > { %v3221_v62 = vadd.f32 %v3214_v29, %v3157_v3  ;;  %v3155_v16 = vpop.f32.mrb[71].mxu0  ;;  %v3219_v15 = vpop.f32.mrb[51].mxu1 }
 0x930   : > { %v3222_v35 = vadd.f32 %v3216_v30, %v3158_v31 }
 0x934   : > { %v3278_v43 = vpop.f32.mrb[72].mxu0  ;;  %v3326_v44 = vpop.f32.mrb[52].mxu1 }
 0x935   : > { %v3285_v38 = vadd.f32 %v3278_v43, %v3221_v62  ;;  %v3280_v23 = vpop.f32.mrb[73].mxu0  ;;  %v3328_v27 = vpop.f32.mrb[53].mxu1 }
 0x936   : > { %v3286_v37 = vadd.f32 %v3280_v23, %v3222_v35  ;;  %v3282_v32 = vpop.f32.mrb[74].mxu0  ;;  %v3330_v33 = vpop.f32.mrb[54].mxu1 }
 0x937   : > { %v3333_v4 = vadd.f32 %v3326_v44, %v3285_v38  ;;  %v3283_v18 = vpop.f32.mrb[75].mxu0  ;;  %v3331_v0 = vpop.f32.mrb[55].mxu1 }
 0x938   : > { %v3334_v40 = vadd.f32 %v3328_v27, %v3286_v37  ;;  %v3889_v35 = vpop.permute.xlu0 %3888  ;;  %v3899_v32 = vpop.permute.xlu1 %3898 }
 0x93c   : > { %v3382_v28 = vpop.f32.mrb[76].mxu0  ;;  %v3440_v8 = vpop.f32.mrb[56].mxu1 }
 0x93d   : > { %v3389_v13 = vadd.f32 %v3382_v28, %v3333_v4  ;;  %v3384_v45 = vpop.f32.mrb[77].mxu0  ;;  %v3442_v47 = vpop.f32.mrb[57].mxu1 }
 0x93e   : > { %v3390_v54 = vadd.f32 %v3384_v45, %v3334_v40  ;;  %v3386_v6 = vpop.f32.mrb[78].mxu0  ;;  %v3444_v53 = vpop.f32.mrb[58].mxu1 }
 0x93f   : > { %v3447_v2 = vadd.f32 %v3440_v8, %v3389_v13  ;;  %v3387_v41 = vpop.f32.mrb[79].mxu0  ;;  %v3445_v12 = vpop.f32.mrb[59].mxu1 }
 0x940   : > { %v3448_v22 = vadd.f32 %v3442_v47, %v3390_v54  ;;  %v3907_v18 = vpop.permute.xlu0 %3906  ;;  %v3913_v47 = vld [vmem:[#allocation2 + $0x210] sm:$0xff] }
 0x941   : > { %v3914_v53 = vpack.c.bf16 %v3913_v47, %v3913_v47 }
 0x944   : > { %v3504_v42 = vpop.f32.mrb[80].mxu0  ;;  %v3568_v39 = vpop.f32.mrb[60].mxu1 }
 0x945   : > { %v3511_v61 = vadd.f32 %v3504_v42, %v3447_v2  ;;  %v3506_v63 = vpop.f32.mrb[81].mxu0  ;;  %v3570_v46 = vpop.f32.mrb[61].mxu1 }
 0x946   : > { %v3512_v49 = vadd.f32 %v3506_v63, %v3448_v22  ;;  %v3508_v17 = vpop.f32.mrb[82].mxu0  ;;  %v3572_v14 = vpop.f32.mrb[62].mxu1 }
 0x947   : > { %v3575_v50 = vadd.f32 %v3568_v39, %v3511_v61  ;;  %v3509_v58 = vpop.f32.mrb[83].mxu0  ;;  %v3573_v51 = vpop.f32.mrb[63].mxu1  ;;  %v3975_v17 = vld [vmem:[#allocation2 + $0x218] sm:$0xff] }
 0x948   : > { %v3576_v20 = vadd.f32 %v3570_v46, %v3512_v49  ;;  %v3921_v2 = vpop.permute.xlu1 %3920  ;;  %v3976_v58 = vpack.c.bf16 %v3975_v17, %v3975_v17  ;;  %v3983_v51 = vpop.permute.xlu0 %3982 }
 0x94c   : > { %v3632_v21 = vpop.f32.mrb[84].mxu0  ;;  %v3690_v34 = vpop.f32.mrb[64].mxu1 }
 0x94d   : > { %v3639_v36 = vadd.f32 %v3632_v21, %v3575_v50  ;;  %v3634_v52 = vpop.f32.mrb[85].mxu0  ;;  %v3692_v56 = vpop.f32.mrb[65].mxu1 }
 0x94e   : > { %v3640_v57 = vadd.f32 %v3634_v52, %v3576_v20  ;;  %v3636_v7 = vpop.f32.mrb[86].mxu0  ;;  %v3694_v1 = vpop.f32.mrb[66].mxu1 }
 0x94f   : > { %v3697_v59 = vadd.f32 %v3690_v34, %v3639_v36  ;;  %v3637_v26 = vpop.f32.mrb[87].mxu0  ;;  %v3695_v60 = vpop.f32.mrb[67].mxu1 }
 0x950   : > { %v3698_v48 = vadd.f32 %v3692_v56, %v3640_v57 }
 0x954   : > { %v3754_v24 = vpop.f32.mrb[88].mxu0  ;;  %v3812_v9 = vpop.f32.mrb[68].mxu1 }
 0x955   : > { %v3761_v10 = vadd.f32 %v3754_v24, %v3697_v59  ;;  %v3756_v55 = vpop.f32.mrb[89].mxu0  ;;  %v3814_v19 = vpop.f32.mrb[69].mxu1 }
 0x956   : > { %v3762_v29 = vadd.f32 %v3756_v55, %v3698_v48  ;;  %v3758_v3 = vpop.f32.mrb[90].mxu0  ;;  %v3816_v25 = vpop.f32.mrb[70].mxu1 }
 0x957   : > { %v3819_v30 = vadd.f32 %v3812_v9, %v3761_v10  ;;  %v3759_v31 = vpop.f32.mrb[91].mxu0  ;;  %v3817_v11 = vpop.f32.mrb[71].mxu1 }
 0x958   : > { %v3820_v5 = vadd.f32 %v3814_v19, %v3762_v29 }
 0x95c   : > { %v3876_v62 = vpop.f32.mrb[92].mxu0 }
 0x95d   : > { %v3883_v16 = vadd.f32 %v3876_v62, %v3819_v30  ;;  %v3878_v15 = vpop.f32.mrb[93].mxu0 }
 0x95e   : > { %v3884_v43 = vadd.f32 %v3878_v15, %v3820_v5  ;;  %v3880_v44 = vpop.f32.mrb[94].mxu0 }
 0x95f   : > { %v3891_v38 = vadd.f32 %v3889_v35, %v3883_v16  ;;  %v3881_v23 = vpop.f32.mrb[95].mxu0 }
 0x960   : > { %v3892_v27 = vadd.f32 %v3889_v35, %v3884_v43 }
 0x961   : > { %v3893_v37 = vmax.f32 %v3891_v38, 0.0 }
 0x962   : > { %v3894_v33 = vmax.f32 %v3892_v27, 0.0 }
 0x963   : > { %v3901_v4 = vmul.f32 %v3899_v32, %v3893_v37 }
 0x964   : > { %v3902_v0 = vmul.f32 %v3899_v32, %v3894_v33 }
 0x965   : > { %v3909_v40 = vadd.f32 %v3907_v18, %v3901_v4 }
 0x966   : > { %v3910_v28 = vadd.f32 %v3907_v18, %v3902_v0 }
 0x967   : > { %v3911_v8 = vmax.f32 %v3909_v40, 0.0 }
 0x968   : > { %v3912_v13 = vmax.f32 %v3910_v28, 0.0 }
 0x969   : > { %v3915_v45 = vpack.c.bf16 %v3911_v8, %v3911_v8 }
 0x96a   : > { %v3916_v54 = vpack.c.bf16 %v3912_v13, %v3912_v13 }
 0x96b   : > { %v3927_v6 = vsel %vm273_vm3, %v3915_v45, 0 }
 0x96c   : > { %4227 = vmatprep.subr.msk.bf16.mxu1 %vm273_vm3, %v3916_v54 }
 0x96d   : > { %3933 = vmatpush1.bf16.msra.mxu1 %v3927_v6 }
 0x970   : > { %4228 = vmatmul.mubr.msk.bf16.vlgmr.msra.gmra.mrb[72].mxu1 %vm269_vm5, %v3914_v53 }
 0xa43   : > { %v3966_v41 = vpop.f32.mrb[72].mxu1 }
 0xa44   : > { %v3967_v12 = vadd.f32 %v3966_v41, %v3921_v2  ;;  %v3968_v22 = vpop.f32.mrb[73].mxu1 }
 0xa45   : > { %v3969_v42 = vadd.f32 %v3968_v22, %v3921_v2  ;;  %v3970_v39 = vpop.f32.mrb[74].mxu1 }
 0xa46   : > { %v3973_v61 = vmax.f32 %v3967_v12, 0.0  ;;  %v3971_v63 = vpop.f32.mrb[75].mxu1 }
 0xa47   : > { %v3974_v46 = vmax.f32 %v3969_v42, 0.0 }
 0xa48   : > { %v3977_v49 = vpack.c.bf16 %v3973_v61, %v3973_v61 }
 0xa49   : > { %v3978_v14 = vpack.c.bf16 %v3974_v46, %v3974_v46 }
 0xa4a   : > { %v3989_v50 = vsel %vm273_vm3, %v3977_v49, 0 }
 0xa4b   : > { %4229 = vmatprep.subr.msk.bf16.mxu0 %vm273_vm3, %v3978_v14 }
 0xa4c   : > { %3995 = vmatpush1.bf16.msra.mxu0 %v3989_v50 }
 0xa4f   : > { %4230 = vmatmul.mubr.msk.bf16.vlgmr.msra.gmra.mrb[96].mxu0 %vm269_vm5, %v3976_v58 }
 0xb22   : > { %v4028_v20 = vpop.f32.mrb[96].mxu0 }
 0xb23   : > { %v4029_v21 = vadd.f32 %v4028_v20, %v3983_v51  ;;  %v4030_v34 = vpop.f32.mrb[97].mxu0 }
 0xb24   : > { %v4031_v36 = vadd.f32 %v4030_v34, %v3983_v51  ;;  %v4032_v52 = vpop.f32.mrb[98].mxu0 }
 0xb25   : > { %4035 = vst [vmem:[%s212_s27] sm:$0xff] %v4029_v21  ;;  %v4033_v56 = vpop.f32.mrb[99].mxu0 }
 0xb26   : > { %4036 = vst [vmem:[%s212_s27 + $0x8] sm:$0xff] %v4031_v36 }
 0xb27 PF: > { %s15_s15 = sadd.s32 1, %s4357_s15  }
 0xb28   : > { %p12_p3 = scmp.ge.s32.totalorder %s15_s15, 4  }
 0xb2a   :  { %14 = sbr.rel (!%p12_p3) target bundleno = 1 (0x1), region = 90 }
 0xb31   :  { %4058 = vsyncpa [#allocation3], 1 }
 0xb32   :  { %4060 = vsyncpa [#allocation3 + $0x1], 1 }

</bundles_post_ra>
